<compile_context>
chip_gen: v5e
topology: v5e:2x2
jax: 0.10.0
libtpu: 0.0.40
codegen_flags: <defaults>
</compile_context>

<pallas_src>
import jax
import jax.numpy as jnp
from jax.experimental import pallas as pl
from jax.experimental.pallas import tpu as pltpu

EMB_DIM = 16
HIDDEN = 32
N_LAYERS = 1          # with n_layers=1 the LSTM dropout has no effect
NUM_TAGS = 2
SEQ_LEN = 8
BATCH = 16            # total sequences per forward call
B_TILE = 8            # sequences per grid step (multiple of 8 sublanes)


# ----------------------------------------------------------------------------
# Fused kernel: BiLSTM (gate-stacked, unrolled) -> Linear+sigmoid head -> CRF NLL.
# One grid step handles B_TILE sequences; grid axis is "parallel".
# ----------------------------------------------------------------------------
def _lstmcrf_fused_kernel(x_ref,        # (T*Bt, E)  f32  tile-major, time-major inside
                          wih_ref,      # (E, 8H)    f32  [fwd i,f,g,o | bwd i,f,g,o]
                          bih_ref,      # (1, 8H)    f32  (b_ih + b_hh, both dirs)
                          whh_f_ref,    # (H, 4H)    f32
                          whh_b_ref,    # (H, 4H)    f32
                          wd_ref,       # (2H, 1)    f32  lin_w[:,1]-lin_w[:,0]
                          tags_ref,     # (T, Bt, 1) int32
                          mask_ref,     # (T, Bt, 1) f32
                          crf_ref,      # (9,)       f32  SMEM: s0,s1,e0,e1,t00,t01,t10,t11,b_diff
                          llh_ref,      # (Bt, 1)    f32  per-sequence log-likelihood
                          xp_scr,       # (T*Bt, 8H) f32  VMEM scratch (input projection)
                          hf_scr,       # (T*Bt, H)  f32  VMEM scratch (fwd hidden)
                          hb_scr):      # (T*Bt, H)  f32  VMEM scratch (bwd hidden)
    T = tags_ref.shape[0]
    B = tags_ref.shape[1]
    H = whh_f_ref.shape[0]
    H4 = 4 * H

    # ---- hoisted, fused input projection: one (T*B, E) x (E, 8H) MXU pass ----
    xp = (jnp.dot(x_ref[...], wih_ref[...], preferred_element_type=jnp.float32)
          + bih_ref[...])
    xp_scr[...] = xp                       # stream to scratch; reload per step below

    whh_f = whh_f_ref[...]
    whh_b = whh_b_ref[...]

    def cell(xp_t, h, c, whh):
        # g-gate columns were pre-scaled by 2 host-side -> tanh(x) = 2*sigmoid(2x) - 1,
        # so a single sigmoid over the (B, 4H) slab covers all four gates.
        gates = xp_t + jnp.dot(h, whh, preferred_element_type=jnp.float32)
        sig = jax.nn.sigmoid(gates)
        # NOTE: gate extracts at lane offsets 0/H/2H/3H; host-side gate reordering /
        # block-diagonal recurrent-weight fusion left as measure-first follow-ups.
        i_g = sig[:, 0:H]
        f_g = sig[:, H:2 * H]
        g_g = 2.0 * sig[:, 2 * H:3 * H] - 1.0          # == tanh(g_preact)
        o_g = sig[:, 3 * H:4 * H]
        c_new = f_g * c + i_g * g_g
        h_new = o_g * jnp.tanh(c_new)
        return h_new, c_new

    h_f = jnp.zeros((B, H), jnp.float32)
    c_f = jnp.zeros((B, H), jnp.float32)
    h_b = jnp.zeros((B, H), jnp.float32)
    c_b = jnp.zeros((B, H), jnp.float32)

    for t in range(T):                                  # static unroll, T = 8
        tr = T - 1 - t
        h_f, c_f = cell(xp_scr[t * B:(t + 1) * B, 0:H4],        h_f, c_f, whh_f)
        h_b, c_b = cell(xp_scr[tr * B:(tr + 1) * B, H4:2 * H4], h_b, c_b, whh_b)
        hf_scr[t * B:(t + 1) * B, :] = h_f              # stream hidden to scratch
        hb_scr[tr * B:(tr + 1) * B, :] = h_b

    # ---- hidden2ta + Softmax(dim=-1) via the exact 2-class sigmoid shortcut ----
    wd = wd_ref[...]                                    # (2H, 1)
    logit = (jnp.dot(hf_scr[...], wd[0:H, :], preferred_element_type=jnp.float32)
             + jnp.dot(hb_scr[...], wd[H:2 * H, :], preferred_element_type=jnp.float32)
             + crf_ref[8])                              # (T*B, 1) = l1 - l0
    em1 = jax.nn.sigmoid(logit)                         # softmax probability of tag 1
    em0 = 1.0 - em1
    em2 = jnp.concatenate([em0, em1], axis=1)           # (T*B, 2)
    # NOTE: probabilities (not log-probs) feed the CRF, mirroring the PyTorch module.

    # ---- CRF negative log-likelihood (torchcrf semantics, reduction='sum') ----
    def b1(v):
        return jnp.full((B, 1), v, jnp.float32)

    s0, s1 = b1(crf_ref[0]), b1(crf_ref[1])             # start transitions
    e0, e1 = b1(crf_ref[2]), b1(crf_ref[3])             # end transitions
    t00, t01 = b1(crf_ref[4]), b1(crf_ref[5])
    t10, t11 = b1(crf_ref[6]), b1(crf_ref[7])
    trow0 = jnp.concatenate([t00, t01], axis=1)         # (B, 2) transitions from prev=0
    trow1 = jnp.concatenate([t10, t11], axis=1)         # (B, 2) transitions from prev=1
    erow = jnp.concatenate([e0, e1], axis=1)            # (B, 2)

    tag0 = tags_ref[0]                                  # (B, 1) int32
    is1 = tag0 != 0
    num = jnp.where(is1, s1, s0) + jnp.where(is1, em1[0:B, :], em0[0:B, :])
    norm = jnp.concatenate([s0, s1], axis=1) + em2[0:B, :]   # (B, 2) forward scores
    prev_tag = tag0
    last_tag = tag0

    for t in range(1, T):                               # unrolled (T-1 steps)
        tag_t = tags_ref[t]                             # (B, 1)
        on = mask_ref[t] > 0.5                          # (B, 1) bool
        p1 = prev_tag != 0
        c1 = tag_t != 0
        # numerator: gold-path transition + emission, masked
        tr_sel = jnp.where(p1, jnp.where(c1, t11, t10), jnp.where(c1, t01, t00))
        em_sel = jnp.where(c1, em1[t * B:(t + 1) * B, :], em0[t * B:(t + 1) * B, :])
        num = num + jnp.where(on, tr_sel + em_sel, 0.0)
        # normalizer: forward algorithm vectorized over the tag lane,
        # logaddexp(a, b) = max(a, b) + log(1 + exp(-|a - b|))  (one exp, one log)
        cand0 = norm[:, 0:1] + trow0                    # from prev tag 0, (B, 2)
        cand1 = norm[:, 1:2] + trow1                    # from prev tag 1, (B, 2)
        mx = jnp.maximum(cand0, cand1)
        nx = mx + jnp.log(1.0 + jnp.exp(-jnp.abs(cand0 - cand1))) \
            + em2[t * B:(t + 1) * B, :]
        norm = jnp.where(on, nx, norm)
        # last valid tag (assumes contiguous-prefix masks, as torchcrf seq_ends does)
        last_tag = jnp.where(on, tag_t, last_tag)
        prev_tag = tag_t

    num = num + jnp.where(last_tag != 0, e1, e0)
    fin = norm + erow                                   # (B, 2)
    a = fin[:, 0:1]
    b = fin[:, 1:2]
    denom = jnp.maximum(a, b) + jnp.log(1.0 + jnp.exp(-jnp.abs(a - b)))
    llh_ref[...] = num - denom                          # per-sequence log-likelihood


# ----------------------------------------------------------------------------
# Parameter init (deterministic, PyTorch-like ranges), kernel-friendly layout.
# ----------------------------------------------------------------------------
def _direction_params(kw_ih, kw_hh, kb_ih, kb_hh):
    k = HIDDEN ** -0.5
    w_ih = jax.random.uniform(kw_ih, (4 * HIDDEN, EMB_DIM), minval=-k, maxval=k)
    w_hh = jax.random.uniform(kw_hh, (4 * HIDDEN, HIDDEN), minval=-k, maxval=k)
    b = (jax.random.uniform(kb_ih, (4 * HIDDEN,), minval=-k, maxval=k)
         + jax.random.uniform(kb_hh, (4 * HIDDEN,), minval=-k, maxval=k))
    # Pre-scale the g-gate block by 2 so the kernel can use tanh(x) = 2*sigmoid(2x) - 1.
    g = slice(2 * HIDDEN, 3 * HIDDEN)
    w_ih = w_ih.at[g].multiply(2.0)
    w_hh = w_hh.at[g].multiply(2.0)
    b = b.at[g].multiply(2.0)
    return jnp.transpose(w_ih), jnp.transpose(w_hh), b        # (E,4H), (H,4H), (4H,)


def init_params(key):
    keys = jax.random.split(key, 13)
    wih_f, whh_f, b_f = _direction_params(*keys[0:4])
    wih_b, whh_b, b_b = _direction_params(*keys[4:8])
    params = {
        'wih': jnp.concatenate([wih_f, wih_b], axis=1),        # (E, 8H) = (16, 256)
        'bih': jnp.concatenate([b_f, b_b]).reshape(1, 8 * HIDDEN),
        'whh_f': whh_f,
        'whh_b': whh_b,
    }
    # TODO(synk): only n_layers=1 is fused; stacked BiLSTM layers would need a layer loop.

    k_lin = (2 * HIDDEN) ** -0.5
    w = jax.random.uniform(keys[8], (NUM_TAGS, 2 * HIDDEN), minval=-k_lin, maxval=k_lin)
    b = jax.random.uniform(keys[9], (NUM_TAGS,), minval=-k_lin, maxval=k_lin)
    # 2-class softmax == sigmoid(logit_1 - logit_0): only the difference is needed.
    params['wd'] = jnp.transpose(w[1:2] - w[0:1])              # (2H, 1)
    params['b_diff'] = (b[1] - b[0]).reshape(1)                # (1,)

    params['crf_start'] = jax.random.uniform(keys[10], (NUM_TAGS,), minval=-0.1, maxval=0.1)
    params['crf_end'] = jax.random.uniform(keys[11], (NUM_TAGS,), minval=-0.1, maxval=0.1)
    params['crf_trans'] = jax.random.uniform(keys[12], (NUM_TAGS, NUM_TAGS),
                                             minval=-0.1, maxval=0.1)
    return params


# ----------------------------------------------------------------------------
# Forward wrapper: host-side permutes (as in the PyTorch forward) + one batched call.
# ----------------------------------------------------------------------------
def lstmcrf_forward(params, seq_emb, tags, masks):
    Btot, T, E = seq_emb.shape
    H = HIDDEN
    assert Btot % B_TILE == 0
    n_tiles = Btot // B_TILE

    x_tbe = jnp.transpose(seq_emb, (1, 0, 2)).astype(jnp.float32)       # (T, B, E)
    # Tile-major, time-major-within-tile flattening: each grid step gets a contiguous
    # lane-dense (T*B_TILE, E) slab with rows ordered t*B_TILE + b (layout plumbing
    # done by XLA so the kernel needs no in-kernel reshape).
    x_tiles = (x_tbe.reshape(T, n_tiles, B_TILE, E)
               .transpose(1, 0, 2, 3)
               .reshape(n_tiles * T * B_TILE, E))
    tags_tb = jnp.transpose(tags, (1, 0, 2)).astype(jnp.int32)          # (T, B, 1)
    mask_tb = masks.astype(jnp.float32)                                 # (T, B, 1)

    crf_packed = jnp.concatenate([
        params['crf_start'], params['crf_end'],
        params['crf_trans'].reshape(-1), params['b_diff']]).astype(jnp.float32)  # (9,)

    smem = pltpu.MemorySpace.SMEM

    # advisory cost estimate so XLA can schedule/overlap the surrounding ops
    TB = T * Btot
    flops = (2 * TB * E * (8 * H)          # fused input projection
             + 2 * 2 * TB * H * (4 * H)    # recurrent dots (both directions)
             + 2 * 2 * TB * H              # linear-diff head
             + 64 * TB)                    # elementwise cell / CRF updates (approx)
    transcendentals = TB * (8 * H) + 2 * TB * H + TB + 6 * (T - 1) * Btot
    bytes_accessed = 4 * (x_tiles.size + params['wih'].size + params['bih'].size
                          + params['whh_f'].size + params['whh_b'].size
                          + params['wd'].size + crf_packed.size
                          + tags_tb.size + mask_tb.size + Btot)

    llh = pl.pallas_call(
        _lstmcrf_fused_kernel,
        out_shape=jax.ShapeDtypeStruct((Btot, 1), jnp.float32),
        grid=(n_tiles,),
        in_specs=[
            pl.BlockSpec((T * B_TILE, E), lambda j: (j, 0)),       # x tile (pipelined)
            pl.BlockSpec((E, 8 * H), lambda j: (0, 0)),            # W_ih both dirs (resident)
            pl.BlockSpec((1, 8 * H), lambda j: (0, 0)),            # bias
            pl.BlockSpec((H, 4 * H), lambda j: (0, 0)),            # W_hh fwd
            pl.BlockSpec((H, 4 * H), lambda j: (0, 0)),            # W_hh bwd
            pl.BlockSpec((2 * H, 1), lambda j: (0, 0)),            # linear diff weight
            pl.BlockSpec((T, B_TILE, 1), lambda j: (0, j, 0)),     # tags tile
            pl.BlockSpec((T, B_TILE, 1), lambda j: (0, j, 0)),     # mask tile
            pl.BlockSpec(memory_space=smem),                       # CRF scalars
        ],
        out_specs=pl.BlockSpec((B_TILE, 1), lambda j: (j, 0)),
        scratch_shapes=[
            pltpu.VMEM((T * B_TILE, 8 * H), jnp.float32),          # input projection
            pltpu.VMEM((T * B_TILE, H), jnp.float32),              # fwd hidden states
            pltpu.VMEM((T * B_TILE, H), jnp.float32),              # bwd hidden states
        ],
        compiler_params=pltpu.CompilerParams(dimension_semantics=("parallel",)),
        cost_estimate=pl.CostEstimate(flops=flops,
                                      transcendentals=transcendentals,
                                      bytes_accessed=bytes_accessed),
    )(x_tiles, params['wih'], params['bih'], params['whh_f'], params['whh_b'],
      params['wd'], tags_tb, mask_tb, crf_packed)

    # torchcrf default reduction='sum'; the module returns -likelihood.
    return -jnp.sum(llh)


if __name__ == "__main__":
    key = jax.random.PRNGKey(0)
    k_param, k_x, k_tags = jax.random.split(key, 3)
    params = init_params(k_param)

    seq_emb = jax.random.normal(k_x, (BATCH, SEQ_LEN, EMB_DIM), dtype=jnp.float32)
    tags = jax.random.randint(k_tags, (BATCH, SEQ_LEN, 1), 0, NUM_TAGS, dtype=jnp.int32)
    # masks: time-major (T, B, 1) uint8, contiguous prefixes, mask[0] all-on
    # (the PyTorch module squeezes masks WITHOUT permuting; torchcrf asserts mask[0]).
    lengths = 4 + (jnp.arange(BATCH, dtype=jnp.int32) % (SEQ_LEN - 3))
    t_idx = jnp.arange(SEQ_LEN, dtype=jnp.int32)[:, None]
    masks = (t_idx < lengths[None, :]).astype(jnp.uint8)[:, :, None]

    loss = jax.jit(lstmcrf_forward)(params, seq_emb, tags, masks)
    jax.block_until_ready(loss)
    print("KERNEL_OK")
</pallas_src>

<mosaic_0001>
module attributes {stable_mosaic.version = 11 : i64} {
  func.func @_lstmcrf_fused_kernel(%arg0: i32, %arg1: memref<64x16xf32, #tpu.memory_space<vmem>>, %arg2: memref<16x256xf32, #tpu.memory_space<vmem>>, %arg3: memref<1x256xf32, #tpu.memory_space<vmem>>, %arg4: memref<32x128xf32, #tpu.memory_space<vmem>>, %arg5: memref<32x128xf32, #tpu.memory_space<vmem>>, %arg6: memref<64x1xf32, #tpu.memory_space<vmem>>, %arg7: memref<8x8x1xi32, #tpu.memory_space<vmem>>, %arg8: memref<8x8x1xf32, #tpu.memory_space<vmem>>, %arg9: memref<9xf32, #tpu.memory_space<smem>>, %arg10: memref<8x1xf32, #tpu.memory_space<vmem>>, %arg11: memref<64x256xf32, #tpu.memory_space<vmem>>, %arg12: memref<64x32xf32, #tpu.memory_space<vmem>>, %arg13: memref<64x32xf32, #tpu.memory_space<vmem>>) attributes {dimension_semantics = [#tpu.dimension_semantics<parallel>], iteration_bounds = array<i64: 2>, scalar_prefetch = 0 : i64, scratch_operands = 3 : i64, tpu.core_type = #tpu.core_type<tc>, window_params = [{transform_indices = @transform_0, window_bounds = array<i64: 64, 16>}, {pipeline_mode = #tpu.pipeline_mode<synchronous>, transform_indices = @transform_1, window_bounds = array<i64: 16, 256>}, {pipeline_mode = #tpu.pipeline_mode<synchronous>, transform_indices = @transform_2, window_bounds = array<i64: 1, 256>}, {pipeline_mode = #tpu.pipeline_mode<synchronous>, transform_indices = @transform_3, window_bounds = array<i64: 32, 128>}, {pipeline_mode = #tpu.pipeline_mode<synchronous>, transform_indices = @transform_4, window_bounds = array<i64: 32, 128>}, {pipeline_mode = #tpu.pipeline_mode<synchronous>, transform_indices = @transform_5, window_bounds = array<i64: 64, 1>}, {transform_indices = @transform_6, window_bounds = array<i64: 8, 8, 1>}, {transform_indices = @transform_7, window_bounds = array<i64: 8, 8, 1>}, {transform_indices = @transform_8, window_bounds = array<i64: 9>}, {transform_indices = @transform_9, window_bounds = array<i64: 8, 1>}]} {
    %c0 = arith.constant 0 : index
    %c0_0 = arith.constant 0 : index
    %0 = vector.load %arg1[%c0, %c0_0] : memref<64x16xf32, #tpu.memory_space<vmem>>, vector<64x16xf32>
    %c0_1 = arith.constant 0 : index
    %c0_2 = arith.constant 0 : index
    %1 = vector.load %arg2[%c0_1, %c0_2] : memref<16x256xf32, #tpu.memory_space<vmem>>, vector<16x256xf32>
    %cst = arith.constant dense<0.000000e+00> : vector<64x256xf32>
    %2 = tpu.matmul %0, %1, %cst {dimension_numbers = #tpu.dot_dimension_numbers<[1], [0], [0], [1], [0, 0, 1, 1], [], []>} : vector<64x16xf32>, vector<16x256xf32>, vector<64x256xf32> -> vector<64x256xf32>
    %c0_3 = arith.constant 0 : index
    %c0_4 = arith.constant 0 : index
    %3 = vector.load %arg3[%c0_3, %c0_4] : memref<1x256xf32, #tpu.memory_space<vmem>>, vector<1x256xf32>
    %4 = vector.broadcast %3 : vector<1x256xf32> to vector<64x256xf32>
    %5 = arith.addf %2, %4 : vector<64x256xf32>
    %c0_5 = arith.constant 0 : index
    %c0_6 = arith.constant 0 : index
    %6 = vector.load %arg11[%c0_5, %c0_6] : memref<64x256xf32, #tpu.memory_space<vmem>>, vector<64x256xf32>
    tpu.vector_store %arg11[%c0_5, %c0_6], %5 {strides = array<i32>} : memref<64x256xf32, #tpu.memory_space<vmem>>, vector<64x256xf32>,
    %c0_7 = arith.constant 0 : index
    %c0_8 = arith.constant 0 : index
    %7 = vector.load %arg4[%c0_7, %c0_8] : memref<32x128xf32, #tpu.memory_space<vmem>>, vector<32x128xf32>
    %c0_9 = arith.constant 0 : index
    %c0_10 = arith.constant 0 : index
    %8 = vector.load %arg5[%c0_9, %c0_10] : memref<32x128xf32, #tpu.memory_space<vmem>>, vector<32x128xf32>
    %cst_11 = arith.constant 0.000000e+00 : f32
    %9 = vector.broadcast %cst_11 : f32 to vector<8x32xf32>
    %cst_12 = arith.constant 0.000000e+00 : f32
    %10 = vector.broadcast %cst_12 : f32 to vector<8x32xf32>
    %cst_13 = arith.constant 0.000000e+00 : f32
    %11 = vector.broadcast %cst_13 : f32 to vector<8x32xf32>
    %cst_14 = arith.constant 0.000000e+00 : f32
    %12 = vector.broadcast %cst_14 : f32 to vector<8x32xf32>
    %c0_15 = arith.constant 0 : index
    %c0_16 = arith.constant 0 : index
    %13 = vector.load %arg11[%c0_15, %c0_16] : memref<64x256xf32, #tpu.memory_space<vmem>>, vector<8x128xf32>
    %cst_17 = arith.constant dense<0.000000e+00> : vector<8x128xf32>
    %14 = tpu.matmul %9, %7, %cst_17 {dimension_numbers = #tpu.dot_dimension_numbers<[1], [0], [0], [1], [0, 0, 1, 1], [], []>} : vector<8x32xf32>, vector<32x128xf32>, vector<8x128xf32> -> vector<8x128xf32>
    %15 = arith.addf %13, %14 : vector<8x128xf32>
    %16 = arith.negf %15 : vector<8x128xf32>
    %17 = math.exp %16 : vector<8x128xf32>
    %cst_18 = arith.constant 1.000000e+00 : f32
    %18 = vector.broadcast %cst_18 : f32 to vector<8x128xf32>
    %19 = arith.addf %18, %17 : vector<8x128xf32>
    %20 = arith.divf %18, %19 : vector<8x128xf32>
    %21 = vector.extract_strided_slice %20 {offsets = [0, 0], sizes = [8, 32], strides = [1, 1]} : vector<8x128xf32> to vector<8x32xf32>
    %22 = vector.extract_strided_slice %20 {offsets = [0, 32], sizes = [8, 32], strides = [1, 1]} : vector<8x128xf32> to vector<8x32xf32>
    %23 = vector.extract_strided_slice %20 {offsets = [0, 64], sizes = [8, 32], strides = [1, 1]} : vector<8x128xf32> to vector<8x32xf32>
    %cst_19 = arith.constant 2.000000e+00 : f32
    %24 = vector.broadcast %cst_19 : f32 to vector<8x32xf32>
    %25 = arith.mulf %24, %23 : vector<8x32xf32>
    %cst_20 = arith.constant 1.000000e+00 : f32
    %26 = vector.broadcast %cst_20 : f32 to vector<8x32xf32>
    %27 = arith.subf %25, %26 : vector<8x32xf32>
    %28 = vector.extract_strided_slice %20 {offsets = [0, 96], sizes = [8, 32], strides = [1, 1]} : vector<8x128xf32> to vector<8x32xf32>
    %29 = arith.mulf %22, %10 : vector<8x32xf32>
    %30 = arith.mulf %21, %27 : vector<8x32xf32>
    %31 = arith.addf %29, %30 : vector<8x32xf32>
    %32 = math.tanh %31 : vector<8x32xf32>
    %33 = arith.mulf %28, %32 : vector<8x32xf32>
    %c56 = arith.constant 56 : index
    %c128 = arith.constant 128 : index
    %34 = vector.load %arg11[%c56, %c128] : memref<64x256xf32, #tpu.memory_space<vmem>>, vector<8x128xf32>
    %cst_21 = arith.constant dense<0.000000e+00> : vector<8x128xf32>
    %35 = tpu.matmul %11, %8, %cst_21 {dimension_numbers = #tpu.dot_dimension_numbers<[1], [0], [0], [1], [0, 0, 1, 1], [], []>} : vector<8x32xf32>, vector<32x128xf32>, vector<8x128xf32> -> vector<8x128xf32>
    %36 = arith.addf %34, %35 : vector<8x128xf32>
    %37 = arith.negf %36 : vector<8x128xf32>
    %38 = math.exp %37 : vector<8x128xf32>
    %cst_22 = arith.constant 1.000000e+00 : f32
    %39 = vector.broadcast %cst_22 : f32 to vector<8x128xf32>
    %40 = arith.addf %39, %38 : vector<8x128xf32>
    %41 = arith.divf %39, %40 : vector<8x128xf32>
    %42 = vector.extract_strided_slice %41 {offsets = [0, 0], sizes = [8, 32], strides = [1, 1]} : vector<8x128xf32> to vector<8x32xf32>
    %43 = vector.extract_strided_slice %41 {offsets = [0, 32], sizes = [8, 32], strides = [1, 1]} : vector<8x128xf32> to vector<8x32xf32>
    %44 = vector.extract_strided_slice %41 {offsets = [0, 64], sizes = [8, 32], strides = [1, 1]} : vector<8x128xf32> to vector<8x32xf32>
    %cst_23 = arith.constant 2.000000e+00 : f32
    %45 = vector.broadcast %cst_23 : f32 to vector<8x32xf32>
    %46 = arith.mulf %45, %44 : vector<8x32xf32>
    %cst_24 = arith.constant 1.000000e+00 : f32
    %47 = vector.broadcast %cst_24 : f32 to vector<8x32xf32>
    %48 = arith.subf %46, %47 : vector<8x32xf32>
    %49 = vector.extract_strided_slice %41 {offsets = [0, 96], sizes = [8, 32], strides = [1, 1]} : vector<8x128xf32> to vector<8x32xf32>
    %50 = arith.mulf %43, %12 : vector<8x32xf32>
    %51 = arith.mulf %42, %48 : vector<8x32xf32>
    %52 = arith.addf %50, %51 : vector<8x32xf32>
    %53 = math.tanh %52 : vector<8x32xf32>
    %54 = arith.mulf %49, %53 : vector<8x32xf32>
    %c0_25 = arith.constant 0 : index
    %c0_26 = arith.constant 0 : index
    %55 = vector.load %arg12[%c0_25, %c0_26] : memref<64x32xf32, #tpu.memory_space<vmem>>, vector<8x32xf32>
    tpu.vector_store %arg12[%c0_25, %c0_26], %33 {strides = array<i32>} : memref<64x32xf32, #tpu.memory_space<vmem>>, vector<8x32xf32>,
    %c56_27 = arith.constant 56 : index
    %c0_28 = arith.constant 0 : index
    %56 = vector.load %arg13[%c56_27, %c0_28] : memref<64x32xf32, #tpu.memory_space<vmem>>, vector<8x32xf32>
    tpu.vector_store %arg13[%c56_27, %c0_28], %54 {strides = array<i32>} : memref<64x32xf32, #tpu.memory_space<vmem>>, vector<8x32xf32>,
    %c8 = arith.constant 8 : index
    %c0_29 = arith.constant 0 : index
    %57 = vector.load %arg11[%c8, %c0_29] : memref<64x256xf32, #tpu.memory_space<vmem>>, vector<8x128xf32>
    %cst_30 = arith.constant dense<0.000000e+00> : vector<8x128xf32>
    %58 = tpu.matmul %33, %7, %cst_30 {dimension_numbers = #tpu.dot_dimension_numbers<[1], [0], [0], [1], [0, 0, 1, 1], [], []>} : vector<8x32xf32>, vector<32x128xf32>, vector<8x128xf32> -> vector<8x128xf32>
    %59 = arith.addf %57, %58 : vector<8x128xf32>
    %60 = arith.negf %59 : vector<8x128xf32>
    %61 = math.exp %60 : vector<8x128xf32>
    %cst_31 = arith.constant 1.000000e+00 : f32
    %62 = vector.broadcast %cst_31 : f32 to vector<8x128xf32>
    %63 = arith.addf %62, %61 : vector<8x128xf32>
    %64 = arith.divf %62, %63 : vector<8x128xf32>
    %65 = vector.extract_strided_slice %64 {offsets = [0, 0], sizes = [8, 32], strides = [1, 1]} : vector<8x128xf32> to vector<8x32xf32>
    %66 = vector.extract_strided_slice %64 {offsets = [0, 32], sizes = [8, 32], strides = [1, 1]} : vector<8x128xf32> to vector<8x32xf32>
    %67 = vector.extract_strided_slice %64 {offsets = [0, 64], sizes = [8, 32], strides = [1, 1]} : vector<8x128xf32> to vector<8x32xf32>
    %cst_32 = arith.constant 2.000000e+00 : f32
    %68 = vector.broadcast %cst_32 : f32 to vector<8x32xf32>
    %69 = arith.mulf %68, %67 : vector<8x32xf32>
    %cst_33 = arith.constant 1.000000e+00 : f32
    %70 = vector.broadcast %cst_33 : f32 to vector<8x32xf32>
    %71 = arith.subf %69, %70 : vector<8x32xf32>
    %72 = vector.extract_strided_slice %64 {offsets = [0, 96], sizes = [8, 32], strides = [1, 1]} : vector<8x128xf32> to vector<8x32xf32>
    %73 = arith.mulf %66, %31 : vector<8x32xf32>
    %74 = arith.mulf %65, %71 : vector<8x32xf32>
    %75 = arith.addf %73, %74 : vector<8x32xf32>
    %76 = math.tanh %75 : vector<8x32xf32>
    %77 = arith.mulf %72, %76 : vector<8x32xf32>
    %c48 = arith.constant 48 : index
    %c128_34 = arith.constant 128 : index
    %78 = vector.load %arg11[%c48, %c128_34] : memref<64x256xf32, #tpu.memory_space<vmem>>, vector<8x128xf32>
    %cst_35 = arith.constant dense<0.000000e+00> : vector<8x128xf32>
    %79 = tpu.matmul %54, %8, %cst_35 {dimension_numbers = #tpu.dot_dimension_numbers<[1], [0], [0], [1], [0, 0, 1, 1], [], []>} : vector<8x32xf32>, vector<32x128xf32>, vector<8x128xf32> -> vector<8x128xf32>
    %80 = arith.addf %78, %79 : vector<8x128xf32>
    %81 = arith.negf %80 : vector<8x128xf32>
    %82 = math.exp %81 : vector<8x128xf32>
    %cst_36 = arith.constant 1.000000e+00 : f32
    %83 = vector.broadcast %cst_36 : f32 to vector<8x128xf32>
    %84 = arith.addf %83, %82 : vector<8x128xf32>
    %85 = arith.divf %83, %84 : vector<8x128xf32>
    %86 = vector.extract_strided_slice %85 {offsets = [0, 0], sizes = [8, 32], strides = [1, 1]} : vector<8x128xf32> to vector<8x32xf32>
    %87 = vector.extract_strided_slice %85 {offsets = [0, 32], sizes = [8, 32], strides = [1, 1]} : vector<8x128xf32> to vector<8x32xf32>
    %88 = vector.extract_strided_slice %85 {offsets = [0, 64], sizes = [8, 32], strides = [1, 1]} : vector<8x128xf32> to vector<8x32xf32>
    %cst_37 = arith.constant 2.000000e+00 : f32
    %89 = vector.broadcast %cst_37 : f32 to vector<8x32xf32>
    %90 = arith.mulf %89, %88 : vector<8x32xf32>
    %cst_38 = arith.constant 1.000000e+00 : f32
    %91 = vector.broadcast %cst_38 : f32 to vector<8x32xf32>
    %92 = arith.subf %90, %91 : vector<8x32xf32>
    %93 = vector.extract_strided_slice %85 {offsets = [0, 96], sizes = [8, 32], strides = [1, 1]} : vector<8x128xf32> to vector<8x32xf32>
    %94 = arith.mulf %87, %52 : vector<8x32xf32>
    %95 = arith.mulf %86, %92 : vector<8x32xf32>
    %96 = arith.addf %94, %95 : vector<8x32xf32>
    %97 = math.tanh %96 : vector<8x32xf32>
    %98 = arith.mulf %93, %97 : vector<8x32xf32>
    %c8_39 = arith.constant 8 : index
    %c0_40 = arith.constant 0 : index
    %99 = vector.load %arg12[%c8_39, %c0_40] : memref<64x32xf32, #tpu.memory_space<vmem>>, vector<8x32xf32>
    tpu.vector_store %arg12[%c8_39, %c0_40], %77 {strides = array<i32>} : memref<64x32xf32, #tpu.memory_space<vmem>>, vector<8x32xf32>,
    %c48_41 = arith.constant 48 : index
    %c0_42 = arith.constant 0 : index
    %100 = vector.load %arg13[%c48_41, %c0_42] : memref<64x32xf32, #tpu.memory_space<vmem>>, vector<8x32xf32>
    tpu.vector_store %arg13[%c48_41, %c0_42], %98 {strides = array<i32>} : memref<64x32xf32, #tpu.memory_space<vmem>>, vector<8x32xf32>,
    %c16 = arith.constant 16 : index
    %c0_43 = arith.constant 0 : index
    %101 = vector.load %arg11[%c16, %c0_43] : memref<64x256xf32, #tpu.memory_space<vmem>>, vector<8x128xf32>
    %cst_44 = arith.constant dense<0.000000e+00> : vector<8x128xf32>
    %102 = tpu.matmul %77, %7, %cst_44 {dimension_numbers = #tpu.dot_dimension_numbers<[1], [0], [0], [1], [0, 0, 1, 1], [], []>} : vector<8x32xf32>, vector<32x128xf32>, vector<8x128xf32> -> vector<8x128xf32>
    %103 = arith.addf %101, %102 : vector<8x128xf32>
    %104 = arith.negf %103 : vector<8x128xf32>
    %105 = math.exp %104 : vector<8x128xf32>
    %cst_45 = arith.constant 1.000000e+00 : f32
    %106 = vector.broadcast %cst_45 : f32 to vector<8x128xf32>
    %107 = arith.addf %106, %105 : vector<8x128xf32>
    %108 = arith.divf %106, %107 : vector<8x128xf32>
    %109 = vector.extract_strided_slice %108 {offsets = [0, 0], sizes = [8, 32], strides = [1, 1]} : vector<8x128xf32> to vector<8x32xf32>
    %110 = vector.extract_strided_slice %108 {offsets = [0, 32], sizes = [8, 32], strides = [1, 1]} : vector<8x128xf32> to vector<8x32xf32>
    %111 = vector.extract_strided_slice %108 {offsets = [0, 64], sizes = [8, 32], strides = [1, 1]} : vector<8x128xf32> to vector<8x32xf32>
    %cst_46 = arith.constant 2.000000e+00 : f32
    %112 = vector.broadcast %cst_46 : f32 to vector<8x32xf32>
    %113 = arith.mulf %112, %111 : vector<8x32xf32>
    %cst_47 = arith.constant 1.000000e+00 : f32
    %114 = vector.broadcast %cst_47 : f32 to vector<8x32xf32>
    %115 = arith.subf %113, %114 : vector<8x32xf32>
    %116 = vector.extract_strided_slice %108 {offsets = [0, 96], sizes = [8, 32], strides = [1, 1]} : vector<8x128xf32> to vector<8x32xf32>
    %117 = arith.mulf %110, %75 : vector<8x32xf32>
    %118 = arith.mulf %109, %115 : vector<8x32xf32>
    %119 = arith.addf %117, %118 : vector<8x32xf32>
    %120 = math.tanh %119 : vector<8x32xf32>
    %121 = arith.mulf %116, %120 : vector<8x32xf32>
    %c40 = arith.constant 40 : index
    %c128_48 = arith.constant 128 : index
    %122 = vector.load %arg11[%c40, %c128_48] : memref<64x256xf32, #tpu.memory_space<vmem>>, vector<8x128xf32>
    %cst_49 = arith.constant dense<0.000000e+00> : vector<8x128xf32>
    %123 = tpu.matmul %98, %8, %cst_49 {dimension_numbers = #tpu.dot_dimension_numbers<[1], [0], [0], [1], [0, 0, 1, 1], [], []>} : vector<8x32xf32>, vector<32x128xf32>, vector<8x128xf32> -> vector<8x128xf32>
    %124 = arith.addf %122, %123 : vector<8x128xf32>
    %125 = arith.negf %124 : vector<8x128xf32>
    %126 = math.exp %125 : vector<8x128xf32>
    %cst_50 = arith.constant 1.000000e+00 : f32
    %127 = vector.broadcast %cst_50 : f32 to vector<8x128xf32>
    %128 = arith.addf %127, %126 : vector<8x128xf32>
    %129 = arith.divf %127, %128 : vector<8x128xf32>
    %130 = vector.extract_strided_slice %129 {offsets = [0, 0], sizes = [8, 32], strides = [1, 1]} : vector<8x128xf32> to vector<8x32xf32>
    %131 = vector.extract_strided_slice %129 {offsets = [0, 32], sizes = [8, 32], strides = [1, 1]} : vector<8x128xf32> to vector<8x32xf32>
    %132 = vector.extract_strided_slice %129 {offsets = [0, 64], sizes = [8, 32], strides = [1, 1]} : vector<8x128xf32> to vector<8x32xf32>
    %cst_51 = arith.constant 2.000000e+00 : f32
    %133 = vector.broadcast %cst_51 : f32 to vector<8x32xf32>
    %134 = arith.mulf %133, %132 : vector<8x32xf32>
    %cst_52 = arith.constant 1.000000e+00 : f32
    %135 = vector.broadcast %cst_52 : f32 to vector<8x32xf32>
    %136 = arith.subf %134, %135 : vector<8x32xf32>
    %137 = vector.extract_strided_slice %129 {offsets = [0, 96], sizes = [8, 32], strides = [1, 1]} : vector<8x128xf32> to vector<8x32xf32>
    %138 = arith.mulf %131, %96 : vector<8x32xf32>
    %139 = arith.mulf %130, %136 : vector<8x32xf32>
    %140 = arith.addf %138, %139 : vector<8x32xf32>
    %141 = math.tanh %140 : vector<8x32xf32>
    %142 = arith.mulf %137, %141 : vector<8x32xf32>
    %c16_53 = arith.constant 16 : index
    %c0_54 = arith.constant 0 : index
    %143 = vector.load %arg12[%c16_53, %c0_54] : memref<64x32xf32, #tpu.memory_space<vmem>>, vector<8x32xf32>
    tpu.vector_store %arg12[%c16_53, %c0_54], %121 {strides = array<i32>} : memref<64x32xf32, #tpu.memory_space<vmem>>, vector<8x32xf32>,
    %c40_55 = arith.constant 40 : index
    %c0_56 = arith.constant 0 : index
    %144 = vector.load %arg13[%c40_55, %c0_56] : memref<64x32xf32, #tpu.memory_space<vmem>>, vector<8x32xf32>
    tpu.vector_store %arg13[%c40_55, %c0_56], %142 {strides = array<i32>} : memref<64x32xf32, #tpu.memory_space<vmem>>, vector<8x32xf32>,
    %c24 = arith.constant 24 : index
    %c0_57 = arith.constant 0 : index
    %145 = vector.load %arg11[%c24, %c0_57] : memref<64x256xf32, #tpu.memory_space<vmem>>, vector<8x128xf32>
    %cst_58 = arith.constant dense<0.000000e+00> : vector<8x128xf32>
    %146 = tpu.matmul %121, %7, %cst_58 {dimension_numbers = #tpu.dot_dimension_numbers<[1], [0], [0], [1], [0, 0, 1, 1], [], []>} : vector<8x32xf32>, vector<32x128xf32>, vector<8x128xf32> -> vector<8x128xf32>
    %147 = arith.addf %145, %146 : vector<8x128xf32>
    %148 = arith.negf %147 : vector<8x128xf32>
    %149 = math.exp %148 : vector<8x128xf32>
    %cst_59 = arith.constant 1.000000e+00 : f32
    %150 = vector.broadcast %cst_59 : f32 to vector<8x128xf32>
    %151 = arith.addf %150, %149 : vector<8x128xf32>
    %152 = arith.divf %150, %151 : vector<8x128xf32>
    %153 = vector.extract_strided_slice %152 {offsets = [0, 0], sizes = [8, 32], strides = [1, 1]} : vector<8x128xf32> to vector<8x32xf32>
    %154 = vector.extract_strided_slice %152 {offsets = [0, 32], sizes = [8, 32], strides = [1, 1]} : vector<8x128xf32> to vector<8x32xf32>
    %155 = vector.extract_strided_slice %152 {offsets = [0, 64], sizes = [8, 32], strides = [1, 1]} : vector<8x128xf32> to vector<8x32xf32>
    %cst_60 = arith.constant 2.000000e+00 : f32
    %156 = vector.broadcast %cst_60 : f32 to vector<8x32xf32>
    %157 = arith.mulf %156, %155 : vector<8x32xf32>
    %cst_61 = arith.constant 1.000000e+00 : f32
    %158 = vector.broadcast %cst_61 : f32 to vector<8x32xf32>
    %159 = arith.subf %157, %158 : vector<8x32xf32>
    %160 = vector.extract_strided_slice %152 {offsets = [0, 96], sizes = [8, 32], strides = [1, 1]} : vector<8x128xf32> to vector<8x32xf32>
    %161 = arith.mulf %154, %119 : vector<8x32xf32>
    %162 = arith.mulf %153, %159 : vector<8x32xf32>
    %163 = arith.addf %161, %162 : vector<8x32xf32>
    %164 = math.tanh %163 : vector<8x32xf32>
    %165 = arith.mulf %160, %164 : vector<8x32xf32>
    %c32 = arith.constant 32 : index
    %c128_62 = arith.constant 128 : index
    %166 = vector.load %arg11[%c32, %c128_62] : memref<64x256xf32, #tpu.memory_space<vmem>>, vector<8x128xf32>
    %cst_63 = arith.constant dense<0.000000e+00> : vector<8x128xf32>
    %167 = tpu.matmul %142, %8, %cst_63 {dimension_numbers = #tpu.dot_dimension_numbers<[1], [0], [0], [1], [0, 0, 1, 1], [], []>} : vector<8x32xf32>, vector<32x128xf32>, vector<8x128xf32> -> vector<8x128xf32>
    %168 = arith.addf %166, %167 : vector<8x128xf32>
    %169 = arith.negf %168 : vector<8x128xf32>
    %170 = math.exp %169 : vector<8x128xf32>
    %cst_64 = arith.constant 1.000000e+00 : f32
    %171 = vector.broadcast %cst_64 : f32 to vector<8x128xf32>
    %172 = arith.addf %171, %170 : vector<8x128xf32>
    %173 = arith.divf %171, %172 : vector<8x128xf32>
    %174 = vector.extract_strided_slice %173 {offsets = [0, 0], sizes = [8, 32], strides = [1, 1]} : vector<8x128xf32> to vector<8x32xf32>
    %175 = vector.extract_strided_slice %173 {offsets = [0, 32], sizes = [8, 32], strides = [1, 1]} : vector<8x128xf32> to vector<8x32xf32>
    %176 = vector.extract_strided_slice %173 {offsets = [0, 64], sizes = [8, 32], strides = [1, 1]} : vector<8x128xf32> to vector<8x32xf32>
    %cst_65 = arith.constant 2.000000e+00 : f32
    %177 = vector.broadcast %cst_65 : f32 to vector<8x32xf32>
    %178 = arith.mulf %177, %176 : vector<8x32xf32>
    %cst_66 = arith.constant 1.000000e+00 : f32
    %179 = vector.broadcast %cst_66 : f32 to vector<8x32xf32>
    %180 = arith.subf %178, %179 : vector<8x32xf32>
    %181 = vector.extract_strided_slice %173 {offsets = [0, 96], sizes = [8, 32], strides = [1, 1]} : vector<8x128xf32> to vector<8x32xf32>
    %182 = arith.mulf %175, %140 : vector<8x32xf32>
    %183 = arith.mulf %174, %180 : vector<8x32xf32>
    %184 = arith.addf %182, %183 : vector<8x32xf32>
    %185 = math.tanh %184 : vector<8x32xf32>
    %186 = arith.mulf %181, %185 : vector<8x32xf32>
    %c24_67 = arith.constant 24 : index
    %c0_68 = arith.constant 0 : index
    %187 = vector.load %arg12[%c24_67, %c0_68] : memref<64x32xf32, #tpu.memory_space<vmem>>, vector<8x32xf32>
    tpu.vector_store %arg12[%c24_67, %c0_68], %165 {strides = array<i32>} : memref<64x32xf32, #tpu.memory_space<vmem>>, vector<8x32xf32>,
    %c32_69 = arith.constant 32 : index
    %c0_70 = arith.constant 0 : index
    %188 = vector.load %arg13[%c32_69, %c0_70] : memref<64x32xf32, #tpu.memory_space<vmem>>, vector<8x32xf32>
    tpu.vector_store %arg13[%c32_69, %c0_70], %186 {strides = array<i32>} : memref<64x32xf32, #tpu.memory_space<vmem>>, vector<8x32xf32>,
    %c32_71 = arith.constant 32 : index
    %c0_72 = arith.constant 0 : index
    %189 = vector.load %arg11[%c32_71, %c0_72] : memref<64x256xf32, #tpu.memory_space<vmem>>, vector<8x128xf32>
    %cst_73 = arith.constant dense<0.000000e+00> : vector<8x128xf32>
    %190 = tpu.matmul %165, %7, %cst_73 {dimension_numbers = #tpu.dot_dimension_numbers<[1], [0], [0], [1], [0, 0, 1, 1], [], []>} : vector<8x32xf32>, vector<32x128xf32>, vector<8x128xf32> -> vector<8x128xf32>
    %191 = arith.addf %189, %190 : vector<8x128xf32>
    %192 = arith.negf %191 : vector<8x128xf32>
    %193 = math.exp %192 : vector<8x128xf32>
    %cst_74 = arith.constant 1.000000e+00 : f32
    %194 = vector.broadcast %cst_74 : f32 to vector<8x128xf32>
    %195 = arith.addf %194, %193 : vector<8x128xf32>
    %196 = arith.divf %194, %195 : vector<8x128xf32>
    %197 = vector.extract_strided_slice %196 {offsets = [0, 0], sizes = [8, 32], strides = [1, 1]} : vector<8x128xf32> to vector<8x32xf32>
    %198 = vector.extract_strided_slice %196 {offsets = [0, 32], sizes = [8, 32], strides = [1, 1]} : vector<8x128xf32> to vector<8x32xf32>
    %199 = vector.extract_strided_slice %196 {offsets = [0, 64], sizes = [8, 32], strides = [1, 1]} : vector<8x128xf32> to vector<8x32xf32>
    %cst_75 = arith.constant 2.000000e+00 : f32
    %200 = vector.broadcast %cst_75 : f32 to vector<8x32xf32>
    %201 = arith.mulf %200, %199 : vector<8x32xf32>
    %cst_76 = arith.constant 1.000000e+00 : f32
    %202 = vector.broadcast %cst_76 : f32 to vector<8x32xf32>
    %203 = arith.subf %201, %202 : vector<8x32xf32>
    %204 = vector.extract_strided_slice %196 {offsets = [0, 96], sizes = [8, 32], strides = [1, 1]} : vector<8x128xf32> to vector<8x32xf32>
    %205 = arith.mulf %198, %163 : vector<8x32xf32>
    %206 = arith.mulf %197, %203 : vector<8x32xf32>
    %207 = arith.addf %205, %206 : vector<8x32xf32>
    %208 = math.tanh %207 : vector<8x32xf32>
    %209 = arith.mulf %204, %208 : vector<8x32xf32>
    %c24_77 = arith.constant 24 : index
    %c128_78 = arith.constant 128 : index
    %210 = vector.load %arg11[%c24_77, %c128_78] : memref<64x256xf32, #tpu.memory_space<vmem>>, vector<8x128xf32>
    %cst_79 = arith.constant dense<0.000000e+00> : vector<8x128xf32>
    %211 = tpu.matmul %186, %8, %cst_79 {dimension_numbers = #tpu.dot_dimension_numbers<[1], [0], [0], [1], [0, 0, 1, 1], [], []>} : vector<8x32xf32>, vector<32x128xf32>, vector<8x128xf32> -> vector<8x128xf32>
    %212 = arith.addf %210, %211 : vector<8x128xf32>
    %213 = arith.negf %212 : vector<8x128xf32>
    %214 = math.exp %213 : vector<8x128xf32>
    %cst_80 = arith.constant 1.000000e+00 : f32
    %215 = vector.broadcast %cst_80 : f32 to vector<8x128xf32>
    %216 = arith.addf %215, %214 : vector<8x128xf32>
    %217 = arith.divf %215, %216 : vector<8x128xf32>
    %218 = vector.extract_strided_slice %217 {offsets = [0, 0], sizes = [8, 32], strides = [1, 1]} : vector<8x128xf32> to vector<8x32xf32>
    %219 = vector.extract_strided_slice %217 {offsets = [0, 32], sizes = [8, 32], strides = [1, 1]} : vector<8x128xf32> to vector<8x32xf32>
    %220 = vector.extract_strided_slice %217 {offsets = [0, 64], sizes = [8, 32], strides = [1, 1]} : vector<8x128xf32> to vector<8x32xf32>
    %cst_81 = arith.constant 2.000000e+00 : f32
    %221 = vector.broadcast %cst_81 : f32 to vector<8x32xf32>
    %222 = arith.mulf %221, %220 : vector<8x32xf32>
    %cst_82 = arith.constant 1.000000e+00 : f32
    %223 = vector.broadcast %cst_82 : f32 to vector<8x32xf32>
    %224 = arith.subf %222, %223 : vector<8x32xf32>
    %225 = vector.extract_strided_slice %217 {offsets = [0, 96], sizes = [8, 32], strides = [1, 1]} : vector<8x128xf32> to vector<8x32xf32>
    %226 = arith.mulf %219, %184 : vector<8x32xf32>
    %227 = arith.mulf %218, %224 : vector<8x32xf32>
    %228 = arith.addf %226, %227 : vector<8x32xf32>
    %229 = math.tanh %228 : vector<8x32xf32>
    %230 = arith.mulf %225, %229 : vector<8x32xf32>
    %c32_83 = arith.constant 32 : index
    %c0_84 = arith.constant 0 : index
    %231 = vector.load %arg12[%c32_83, %c0_84] : memref<64x32xf32, #tpu.memory_space<vmem>>, vector<8x32xf32>
    tpu.vector_store %arg12[%c32_83, %c0_84], %209 {strides = array<i32>} : memref<64x32xf32, #tpu.memory_space<vmem>>, vector<8x32xf32>,
    %c24_85 = arith.constant 24 : index
    %c0_86 = arith.constant 0 : index
    %232 = vector.load %arg13[%c24_85, %c0_86] : memref<64x32xf32, #tpu.memory_space<vmem>>, vector<8x32xf32>
    tpu.vector_store %arg13[%c24_85, %c0_86], %230 {strides = array<i32>} : memref<64x32xf32, #tpu.memory_space<vmem>>, vector<8x32xf32>,
    %c40_87 = arith.constant 40 : index
    %c0_88 = arith.constant 0 : index
    %233 = vector.load %arg11[%c40_87, %c0_88] : memref<64x256xf32, #tpu.memory_space<vmem>>, vector<8x128xf32>
    %cst_89 = arith.constant dense<0.000000e+00> : vector<8x128xf32>
    %234 = tpu.matmul %209, %7, %cst_89 {dimension_numbers = #tpu.dot_dimension_numbers<[1], [0], [0], [1], [0, 0, 1, 1], [], []>} : vector<8x32xf32>, vector<32x128xf32>, vector<8x128xf32> -> vector<8x128xf32>
    %235 = arith.addf %233, %234 : vector<8x128xf32>
    %236 = arith.negf %235 : vector<8x128xf32>
    %237 = math.exp %236 : vector<8x128xf32>
    %cst_90 = arith.constant 1.000000e+00 : f32
    %238 = vector.broadcast %cst_90 : f32 to vector<8x128xf32>
    %239 = arith.addf %238, %237 : vector<8x128xf32>
    %240 = arith.divf %238, %239 : vector<8x128xf32>
    %241 = vector.extract_strided_slice %240 {offsets = [0, 0], sizes = [8, 32], strides = [1, 1]} : vector<8x128xf32> to vector<8x32xf32>
    %242 = vector.extract_strided_slice %240 {offsets = [0, 32], sizes = [8, 32], strides = [1, 1]} : vector<8x128xf32> to vector<8x32xf32>
    %243 = vector.extract_strided_slice %240 {offsets = [0, 64], sizes = [8, 32], strides = [1, 1]} : vector<8x128xf32> to vector<8x32xf32>
    %cst_91 = arith.constant 2.000000e+00 : f32
    %244 = vector.broadcast %cst_91 : f32 to vector<8x32xf32>
    %245 = arith.mulf %244, %243 : vector<8x32xf32>
    %cst_92 = arith.constant 1.000000e+00 : f32
    %246 = vector.broadcast %cst_92 : f32 to vector<8x32xf32>
    %247 = arith.subf %245, %246 : vector<8x32xf32>
    %248 = vector.extract_strided_slice %240 {offsets = [0, 96], sizes = [8, 32], strides = [1, 1]} : vector<8x128xf32> to vector<8x32xf32>
    %249 = arith.mulf %242, %207 : vector<8x32xf32>
    %250 = arith.mulf %241, %247 : vector<8x32xf32>
    %251 = arith.addf %249, %250 : vector<8x32xf32>
    %252 = math.tanh %251 : vector<8x32xf32>
    %253 = arith.mulf %248, %252 : vector<8x32xf32>
    %c16_93 = arith.constant 16 : index
    %c128_94 = arith.constant 128 : index
    %254 = vector.load %arg11[%c16_93, %c128_94] : memref<64x256xf32, #tpu.memory_space<vmem>>, vector<8x128xf32>
    %cst_95 = arith.constant dense<0.000000e+00> : vector<8x128xf32>
    %255 = tpu.matmul %230, %8, %cst_95 {dimension_numbers = #tpu.dot_dimension_numbers<[1], [0], [0], [1], [0, 0, 1, 1], [], []>} : vector<8x32xf32>, vector<32x128xf32>, vector<8x128xf32> -> vector<8x128xf32>
    %256 = arith.addf %254, %255 : vector<8x128xf32>
    %257 = arith.negf %256 : vector<8x128xf32>
    %258 = math.exp %257 : vector<8x128xf32>
    %cst_96 = arith.constant 1.000000e+00 : f32
    %259 = vector.broadcast %cst_96 : f32 to vector<8x128xf32>
    %260 = arith.addf %259, %258 : vector<8x128xf32>
    %261 = arith.divf %259, %260 : vector<8x128xf32>
    %262 = vector.extract_strided_slice %261 {offsets = [0, 0], sizes = [8, 32], strides = [1, 1]} : vector<8x128xf32> to vector<8x32xf32>
    %263 = vector.extract_strided_slice %261 {offsets = [0, 32], sizes = [8, 32], strides = [1, 1]} : vector<8x128xf32> to vector<8x32xf32>
    %264 = vector.extract_strided_slice %261 {offsets = [0, 64], sizes = [8, 32], strides = [1, 1]} : vector<8x128xf32> to vector<8x32xf32>
    %cst_97 = arith.constant 2.000000e+00 : f32
    %265 = vector.broadcast %cst_97 : f32 to vector<8x32xf32>
    %266 = arith.mulf %265, %264 : vector<8x32xf32>
    %cst_98 = arith.constant 1.000000e+00 : f32
    %267 = vector.broadcast %cst_98 : f32 to vector<8x32xf32>
    %268 = arith.subf %266, %267 : vector<8x32xf32>
    %269 = vector.extract_strided_slice %261 {offsets = [0, 96], sizes = [8, 32], strides = [1, 1]} : vector<8x128xf32> to vector<8x32xf32>
    %270 = arith.mulf %263, %228 : vector<8x32xf32>
    %271 = arith.mulf %262, %268 : vector<8x32xf32>
    %272 = arith.addf %270, %271 : vector<8x32xf32>
    %273 = math.tanh %272 : vector<8x32xf32>
    %274 = arith.mulf %269, %273 : vector<8x32xf32>
    %c40_99 = arith.constant 40 : index
    %c0_100 = arith.constant 0 : index
    %275 = vector.load %arg12[%c40_99, %c0_100] : memref<64x32xf32, #tpu.memory_space<vmem>>, vector<8x32xf32>
    tpu.vector_store %arg12[%c40_99, %c0_100], %253 {strides = array<i32>} : memref<64x32xf32, #tpu.memory_space<vmem>>, vector<8x32xf32>,
    %c16_101 = arith.constant 16 : index
    %c0_102 = arith.constant 0 : index
    %276 = vector.load %arg13[%c16_101, %c0_102] : memref<64x32xf32, #tpu.memory_space<vmem>>, vector<8x32xf32>
    tpu.vector_store %arg13[%c16_101, %c0_102], %274 {strides = array<i32>} : memref<64x32xf32, #tpu.memory_space<vmem>>, vector<8x32xf32>,
    %c48_103 = arith.constant 48 : index
    %c0_104 = arith.constant 0 : index
    %277 = vector.load %arg11[%c48_103, %c0_104] : memref<64x256xf32, #tpu.memory_space<vmem>>, vector<8x128xf32>
    %cst_105 = arith.constant dense<0.000000e+00> : vector<8x128xf32>
    %278 = tpu.matmul %253, %7, %cst_105 {dimension_numbers = #tpu.dot_dimension_numbers<[1], [0], [0], [1], [0, 0, 1, 1], [], []>} : vector<8x32xf32>, vector<32x128xf32>, vector<8x128xf32> -> vector<8x128xf32>
    %279 = arith.addf %277, %278 : vector<8x128xf32>
    %280 = arith.negf %279 : vector<8x128xf32>
    %281 = math.exp %280 : vector<8x128xf32>
    %cst_106 = arith.constant 1.000000e+00 : f32
    %282 = vector.broadcast %cst_106 : f32 to vector<8x128xf32>
    %283 = arith.addf %282, %281 : vector<8x128xf32>
    %284 = arith.divf %282, %283 : vector<8x128xf32>
    %285 = vector.extract_strided_slice %284 {offsets = [0, 0], sizes = [8, 32], strides = [1, 1]} : vector<8x128xf32> to vector<8x32xf32>
    %286 = vector.extract_strided_slice %284 {offsets = [0, 32], sizes = [8, 32], strides = [1, 1]} : vector<8x128xf32> to vector<8x32xf32>
    %287 = vector.extract_strided_slice %284 {offsets = [0, 64], sizes = [8, 32], strides = [1, 1]} : vector<8x128xf32> to vector<8x32xf32>
    %cst_107 = arith.constant 2.000000e+00 : f32
    %288 = vector.broadcast %cst_107 : f32 to vector<8x32xf32>
    %289 = arith.mulf %288, %287 : vector<8x32xf32>
    %cst_108 = arith.constant 1.000000e+00 : f32
    %290 = vector.broadcast %cst_108 : f32 to vector<8x32xf32>
    %291 = arith.subf %289, %290 : vector<8x32xf32>
    %292 = vector.extract_strided_slice %284 {offsets = [0, 96], sizes = [8, 32], strides = [1, 1]} : vector<8x128xf32> to vector<8x32xf32>
    %293 = arith.mulf %286, %251 : vector<8x32xf32>
    %294 = arith.mulf %285, %291 : vector<8x32xf32>
    %295 = arith.addf %293, %294 : vector<8x32xf32>
    %296 = math.tanh %295 : vector<8x32xf32>
    %297 = arith.mulf %292, %296 : vector<8x32xf32>
    %c8_109 = arith.constant 8 : index
    %c128_110 = arith.constant 128 : index
    %298 = vector.load %arg11[%c8_109, %c128_110] : memref<64x256xf32, #tpu.memory_space<vmem>>, vector<8x128xf32>
    %cst_111 = arith.constant dense<0.000000e+00> : vector<8x128xf32>
    %299 = tpu.matmul %274, %8, %cst_111 {dimension_numbers = #tpu.dot_dimension_numbers<[1], [0], [0], [1], [0, 0, 1, 1], [], []>} : vector<8x32xf32>, vector<32x128xf32>, vector<8x128xf32> -> vector<8x128xf32>
    %300 = arith.addf %298, %299 : vector<8x128xf32>
    %301 = arith.negf %300 : vector<8x128xf32>
    %302 = math.exp %301 : vector<8x128xf32>
    %cst_112 = arith.constant 1.000000e+00 : f32
    %303 = vector.broadcast %cst_112 : f32 to vector<8x128xf32>
    %304 = arith.addf %303, %302 : vector<8x128xf32>
    %305 = arith.divf %303, %304 : vector<8x128xf32>
    %306 = vector.extract_strided_slice %305 {offsets = [0, 0], sizes = [8, 32], strides = [1, 1]} : vector<8x128xf32> to vector<8x32xf32>
    %307 = vector.extract_strided_slice %305 {offsets = [0, 32], sizes = [8, 32], strides = [1, 1]} : vector<8x128xf32> to vector<8x32xf32>
    %308 = vector.extract_strided_slice %305 {offsets = [0, 64], sizes = [8, 32], strides = [1, 1]} : vector<8x128xf32> to vector<8x32xf32>
    %cst_113 = arith.constant 2.000000e+00 : f32
    %309 = vector.broadcast %cst_113 : f32 to vector<8x32xf32>
    %310 = arith.mulf %309, %308 : vector<8x32xf32>
    %cst_114 = arith.constant 1.000000e+00 : f32
    %311 = vector.broadcast %cst_114 : f32 to vector<8x32xf32>
    %312 = arith.subf %310, %311 : vector<8x32xf32>
    %313 = vector.extract_strided_slice %305 {offsets = [0, 96], sizes = [8, 32], strides = [1, 1]} : vector<8x128xf32> to vector<8x32xf32>
    %314 = arith.mulf %307, %272 : vector<8x32xf32>
    %315 = arith.mulf %306, %312 : vector<8x32xf32>
    %316 = arith.addf %314, %315 : vector<8x32xf32>
    %317 = math.tanh %316 : vector<8x32xf32>
    %318 = arith.mulf %313, %317 : vector<8x32xf32>
    %c48_115 = arith.constant 48 : index
    %c0_116 = arith.constant 0 : index
    %319 = vector.load %arg12[%c48_115, %c0_116] : memref<64x32xf32, #tpu.memory_space<vmem>>, vector<8x32xf32>
    tpu.vector_store %arg12[%c48_115, %c0_116], %297 {strides = array<i32>} : memref<64x32xf32, #tpu.memory_space<vmem>>, vector<8x32xf32>,
    %c8_117 = arith.constant 8 : index
    %c0_118 = arith.constant 0 : index
    %320 = vector.load %arg13[%c8_117, %c0_118] : memref<64x32xf32, #tpu.memory_space<vmem>>, vector<8x32xf32>
    tpu.vector_store %arg13[%c8_117, %c0_118], %318 {strides = array<i32>} : memref<64x32xf32, #tpu.memory_space<vmem>>, vector<8x32xf32>,
    %c56_119 = arith.constant 56 : index
    %c0_120 = arith.constant 0 : index
    %321 = vector.load %arg11[%c56_119, %c0_120] : memref<64x256xf32, #tpu.memory_space<vmem>>, vector<8x128xf32>
    %cst_121 = arith.constant dense<0.000000e+00> : vector<8x128xf32>
    %322 = tpu.matmul %297, %7, %cst_121 {dimension_numbers = #tpu.dot_dimension_numbers<[1], [0], [0], [1], [0, 0, 1, 1], [], []>} : vector<8x32xf32>, vector<32x128xf32>, vector<8x128xf32> -> vector<8x128xf32>
    %323 = arith.addf %321, %322 : vector<8x128xf32>
    %324 = arith.negf %323 : vector<8x128xf32>
    %325 = math.exp %324 : vector<8x128xf32>
    %cst_122 = arith.constant 1.000000e+00 : f32
    %326 = vector.broadcast %cst_122 : f32 to vector<8x128xf32>
    %327 = arith.addf %326, %325 : vector<8x128xf32>
    %328 = arith.divf %326, %327 : vector<8x128xf32>
    %329 = vector.extract_strided_slice %328 {offsets = [0, 0], sizes = [8, 32], strides = [1, 1]} : vector<8x128xf32> to vector<8x32xf32>
    %330 = vector.extract_strided_slice %328 {offsets = [0, 32], sizes = [8, 32], strides = [1, 1]} : vector<8x128xf32> to vector<8x32xf32>
    %331 = vector.extract_strided_slice %328 {offsets = [0, 64], sizes = [8, 32], strides = [1, 1]} : vector<8x128xf32> to vector<8x32xf32>
    %cst_123 = arith.constant 2.000000e+00 : f32
    %332 = vector.broadcast %cst_123 : f32 to vector<8x32xf32>
    %333 = arith.mulf %332, %331 : vector<8x32xf32>
    %cst_124 = arith.constant 1.000000e+00 : f32
    %334 = vector.broadcast %cst_124 : f32 to vector<8x32xf32>
    %335 = arith.subf %333, %334 : vector<8x32xf32>
    %336 = vector.extract_strided_slice %328 {offsets = [0, 96], sizes = [8, 32], strides = [1, 1]} : vector<8x128xf32> to vector<8x32xf32>
    %337 = arith.mulf %330, %295 : vector<8x32xf32>
    %338 = arith.mulf %329, %335 : vector<8x32xf32>
    %339 = arith.addf %337, %338 : vector<8x32xf32>
    %340 = math.tanh %339 : vector<8x32xf32>
    %341 = arith.mulf %336, %340 : vector<8x32xf32>
    %c0_125 = arith.constant 0 : index
    %c128_126 = arith.constant 128 : index
    %342 = vector.load %arg11[%c0_125, %c128_126] : memref<64x256xf32, #tpu.memory_space<vmem>>, vector<8x128xf32>
    %cst_127 = arith.constant dense<0.000000e+00> : vector<8x128xf32>
    %343 = tpu.matmul %318, %8, %cst_127 {dimension_numbers = #tpu.dot_dimension_numbers<[1], [0], [0], [1], [0, 0, 1, 1], [], []>} : vector<8x32xf32>, vector<32x128xf32>, vector<8x128xf32> -> vector<8x128xf32>
    %344 = arith.addf %342, %343 : vector<8x128xf32>
    %345 = arith.negf %344 : vector<8x128xf32>
    %346 = math.exp %345 : vector<8x128xf32>
    %cst_128 = arith.constant 1.000000e+00 : f32
    %347 = vector.broadcast %cst_128 : f32 to vector<8x128xf32>
    %348 = arith.addf %347, %346 : vector<8x128xf32>
    %349 = arith.divf %347, %348 : vector<8x128xf32>
    %350 = vector.extract_strided_slice %349 {offsets = [0, 0], sizes = [8, 32], strides = [1, 1]} : vector<8x128xf32> to vector<8x32xf32>
    %351 = vector.extract_strided_slice %349 {offsets = [0, 32], sizes = [8, 32], strides = [1, 1]} : vector<8x128xf32> to vector<8x32xf32>
    %352 = vector.extract_strided_slice %349 {offsets = [0, 64], sizes = [8, 32], strides = [1, 1]} : vector<8x128xf32> to vector<8x32xf32>
    %cst_129 = arith.constant 2.000000e+00 : f32
    %353 = vector.broadcast %cst_129 : f32 to vector<8x32xf32>
    %354 = arith.mulf %353, %352 : vector<8x32xf32>
    %cst_130 = arith.constant 1.000000e+00 : f32
    %355 = vector.broadcast %cst_130 : f32 to vector<8x32xf32>
    %356 = arith.subf %354, %355 : vector<8x32xf32>
    %357 = vector.extract_strided_slice %349 {offsets = [0, 96], sizes = [8, 32], strides = [1, 1]} : vector<8x128xf32> to vector<8x32xf32>
    %358 = arith.mulf %351, %316 : vector<8x32xf32>
    %359 = arith.mulf %350, %356 : vector<8x32xf32>
    %360 = arith.addf %358, %359 : vector<8x32xf32>
    %361 = math.tanh %360 : vector<8x32xf32>
    %362 = arith.mulf %357, %361 : vector<8x32xf32>
    %c56_131 = arith.constant 56 : index
    %c0_132 = arith.constant 0 : index
    %363 = vector.load %arg12[%c56_131, %c0_132] : memref<64x32xf32, #tpu.memory_space<vmem>>, vector<8x32xf32>
    tpu.vector_store %arg12[%c56_131, %c0_132], %341 {strides = array<i32>} : memref<64x32xf32, #tpu.memory_space<vmem>>, vector<8x32xf32>,
    %c0_133 = arith.constant 0 : index
    %c0_134 = arith.constant 0 : index
    %364 = vector.load %arg13[%c0_133, %c0_134] : memref<64x32xf32, #tpu.memory_space<vmem>>, vector<8x32xf32>
    tpu.vector_store %arg13[%c0_133, %c0_134], %362 {strides = array<i32>} : memref<64x32xf32, #tpu.memory_space<vmem>>, vector<8x32xf32>,
    %c0_135 = arith.constant 0 : index
    %c0_136 = arith.constant 0 : index
    %365 = vector.load %arg6[%c0_135, %c0_136] : memref<64x1xf32, #tpu.memory_space<vmem>>, vector<64x1xf32>
    %c0_137 = arith.constant 0 : index
    %c0_138 = arith.constant 0 : index
    %366 = vector.load %arg12[%c0_137, %c0_138] : memref<64x32xf32, #tpu.memory_space<vmem>>, vector<64x32xf32>
    %367 = vector.extract_strided_slice %365 {offsets = [0, 0], sizes = [32, 1], strides = [1, 1]} : vector<64x1xf32> to vector<32x1xf32>
    %cst_139 = arith.constant dense<0.000000e+00> : vector<64x1xf32>
    %368 = tpu.matmul %366, %367, %cst_139 {dimension_numbers = #tpu.dot_dimension_numbers<[1], [0], [0], [1], [0, 0, 1, 1], [], []>} : vector<64x32xf32>, vector<32x1xf32>, vector<64x1xf32> -> vector<64x1xf32>
    %c0_140 = arith.constant 0 : index
    %c0_141 = arith.constant 0 : index
    %369 = vector.load %arg13[%c0_140, %c0_141] : memref<64x32xf32, #tpu.memory_space<vmem>>, vector<64x32xf32>
    %370 = vector.extract_strided_slice %365 {offsets = [32, 0], sizes = [32, 1], strides = [1, 1]} : vector<64x1xf32> to vector<32x1xf32>
    %cst_142 = arith.constant dense<0.000000e+00> : vector<64x1xf32>
    %371 = tpu.matmul %369, %370, %cst_142 {dimension_numbers = #tpu.dot_dimension_numbers<[1], [0], [0], [1], [0, 0, 1, 1], [], []>} : vector<64x32xf32>, vector<32x1xf32>, vector<64x1xf32> -> vector<64x1xf32>
    %372 = arith.addf %368, %371 : vector<64x1xf32>
    %c8_143 = arith.constant 8 : index
    %373 = memref.load %arg9[%c8_143] : memref<9xf32, #tpu.memory_space<smem>>
    %374 = vector.broadcast %373 : f32 to vector<64x1xf32>
    %375 = arith.addf %372, %374 : vector<64x1xf32>
    %376 = arith.negf %375 : vector<64x1xf32>
    %377 = math.exp %376 : vector<64x1xf32>
    %cst_144 = arith.constant 1.000000e+00 : f32
    %378 = vector.broadcast %cst_144 : f32 to vector<64x1xf32>
    %379 = arith.addf %378, %377 : vector<64x1xf32>
    %380 = arith.divf %378, %379 : vector<64x1xf32>
    %cst_145 = arith.constant 1.000000e+00 : f32
    %381 = vector.broadcast %cst_145 : f32 to vector<64x1xf32>
    %382 = arith.subf %381, %380 : vector<64x1xf32>
    %383 = tpu.concatenate %382, %380 in 1 : vector<64x1xf32>, vector<64x1xf32> -> vector<64x2xf32>
    %c0_146 = arith.constant 0 : index
    %384 = memref.load %arg9[%c0_146] : memref<9xf32, #tpu.memory_space<smem>>
    %385 = vector.broadcast %384 : f32 to vector<8x1xf32>
    %c1 = arith.constant 1 : index
    %386 = memref.load %arg9[%c1] : memref<9xf32, #tpu.memory_space<smem>>
    %387 = vector.broadcast %386 : f32 to vector<8x1xf32>
    %c2 = arith.constant 2 : index
    %388 = memref.load %arg9[%c2] : memref<9xf32, #tpu.memory_space<smem>>
    %389 = vector.broadcast %388 : f32 to vector<8x1xf32>
    %c3 = arith.constant 3 : index
    %390 = memref.load %arg9[%c3] : memref<9xf32, #tpu.memory_space<smem>>
    %391 = vector.broadcast %390 : f32 to vector<8x1xf32>
    %c4 = arith.constant 4 : index
    %392 = memref.load %arg9[%c4] : memref<9xf32, #tpu.memory_space<smem>>
    %393 = vector.broadcast %392 : f32 to vector<8x1xf32>
    %c5 = arith.constant 5 : index
    %394 = memref.load %arg9[%c5] : memref<9xf32, #tpu.memory_space<smem>>
    %395 = vector.broadcast %394 : f32 to vector<8x1xf32>
    %c6 = arith.constant 6 : index
    %396 = memref.load %arg9[%c6] : memref<9xf32, #tpu.memory_space<smem>>
    %397 = vector.broadcast %396 : f32 to vector<8x1xf32>
    %c7 = arith.constant 7 : index
    %398 = memref.load %arg9[%c7] : memref<9xf32, #tpu.memory_space<smem>>
    %399 = vector.broadcast %398 : f32 to vector<8x1xf32>
    %400 = tpu.concatenate %393, %395 in 1 : vector<8x1xf32>, vector<8x1xf32> -> vector<8x2xf32>
    %401 = tpu.concatenate %397, %399 in 1 : vector<8x1xf32>, vector<8x1xf32> -> vector<8x2xf32>
    %402 = tpu.concatenate %389, %391 in 1 : vector<8x1xf32>, vector<8x1xf32> -> vector<8x2xf32>
    %c0_147 = arith.constant 0 : index
    %c0_148 = arith.constant 0 : index
    %c0_149 = arith.constant 0 : index
    %403 = vector.load %arg7[%c0_147, %c0_148, %c0_149] : memref<8x8x1xi32, #tpu.memory_space<vmem>>, vector<1x8x1xi32>
    %404 = vector.shape_cast %403 : vector<1x8x1xi32> to vector<8x1xi32>
    %c0_i32 = arith.constant 0 : i32
    %405 = vector.broadcast %c0_i32 : i32 to vector<8x1xi32>
    %406 = arith.cmpi ne, %404, %405 : vector<8x1xi32>
    %407 = arith.select %406, %387, %385 : vector<8x1xi1>, vector<8x1xf32>
    %408 = vector.extract_strided_slice %380 {offsets = [0, 0], sizes = [8, 1], strides = [1, 1]} : vector<64x1xf32> to vector<8x1xf32>
    %409 = vector.extract_strided_slice %382 {offsets = [0, 0], sizes = [8, 1], strides = [1, 1]} : vector<64x1xf32> to vector<8x1xf32>
    %410 = arith.select %406, %408, %409 : vector<8x1xi1>, vector<8x1xf32>
    %411 = arith.addf %407, %410 : vector<8x1xf32>
    %412 = tpu.concatenate %385, %387 in 1 : vector<8x1xf32>, vector<8x1xf32> -> vector<8x2xf32>
    %413 = vector.extract_strided_slice %383 {offsets = [0, 0], sizes = [8, 2], strides = [1, 1]} : vector<64x2xf32> to vector<8x2xf32>
    %414 = arith.addf %412, %413 : vector<8x2xf32>
    %c1_150 = arith.constant 1 : index
    %c0_151 = arith.constant 0 : index
    %c0_152 = arith.constant 0 : index
    %415 = vector.load %arg7[%c1_150, %c0_151, %c0_152] : memref<8x8x1xi32, #tpu.memory_space<vmem>>, vector<1x8x1xi32>
    %416 = vector.shape_cast %415 : vector<1x8x1xi32> to vector<8x1xi32>
    %c1_153 = arith.constant 1 : index
    %c0_154 = arith.constant 0 : index
    %c0_155 = arith.constant 0 : index
    %417 = vector.load %arg8[%c1_153, %c0_154, %c0_155] : memref<8x8x1xf32, #tpu.memory_space<vmem>>, vector<1x8x1xf32>
    %418 = vector.shape_cast %417 : vector<1x8x1xf32> to vector<8x1xf32>
    %cst_156 = arith.constant 5.000000e-01 : f32
    %419 = vector.broadcast %cst_156 : f32 to vector<8x1xf32>
    %420 = arith.cmpf ogt, %418, %419 : vector<8x1xf32>
    %c0_i32_157 = arith.constant 0 : i32
    %421 = vector.broadcast %c0_i32_157 : i32 to vector<8x1xi32>
    %422 = arith.cmpi ne, %404, %421 : vector<8x1xi32>
    %c0_i32_158 = arith.constant 0 : i32
    %423 = vector.broadcast %c0_i32_158 : i32 to vector<8x1xi32>
    %424 = arith.cmpi ne, %416, %423 : vector<8x1xi32>
    %425 = arith.select %424, %399, %397 : vector<8x1xi1>, vector<8x1xf32>
    %426 = arith.select %424, %395, %393 : vector<8x1xi1>, vector<8x1xf32>
    %427 = arith.select %422, %425, %426 : vector<8x1xi1>, vector<8x1xf32>
    %428 = vector.extract_strided_slice %380 {offsets = [8, 0], sizes = [8, 1], strides = [1, 1]} : vector<64x1xf32> to vector<8x1xf32>
    %429 = vector.extract_strided_slice %382 {offsets = [8, 0], sizes = [8, 1], strides = [1, 1]} : vector<64x1xf32> to vector<8x1xf32>
    %430 = arith.select %424, %428, %429 : vector<8x1xi1>, vector<8x1xf32>
    %431 = arith.addf %427, %430 : vector<8x1xf32>
    %cst_159 = arith.constant 0.000000e+00 : f32
    %432 = vector.broadcast %cst_159 : f32 to vector<8x1xf32>
    %433 = arith.select %420, %431, %432 : vector<8x1xi1>, vector<8x1xf32>
    %434 = arith.addf %411, %433 : vector<8x1xf32>
    %435 = vector.extract_strided_slice %414 {offsets = [0, 0], sizes = [8, 1], strides = [1, 1]} : vector<8x2xf32> to vector<8x1xf32>
    %436 = vector.broadcast %435 : vector<8x1xf32> to vector<8x2xf32>
    %437 = arith.addf %436, %400 : vector<8x2xf32>
    %438 = vector.extract_strided_slice %414 {offsets = [0, 1], sizes = [8, 1], strides = [1, 1]} : vector<8x2xf32> to vector<8x1xf32>
    %439 = vector.broadcast %438 : vector<8x1xf32> to vector<8x2xf32>
    %440 = arith.addf %439, %401 : vector<8x2xf32>
    %441 = arith.maximumf %437, %440 : vector<8x2xf32>
    %442 = arith.subf %437, %440 : vector<8x2xf32>
    %443 = math.absf %442 : vector<8x2xf32>
    %cst_160 = arith.constant 0.000000e+00 : f32
    %444 = vector.broadcast %cst_160 : f32 to vector<8x2xf32>
    %445 = arith.subf %444, %443 : vector<8x2xf32>
    %446 = math.exp %445 : vector<8x2xf32>
    %cst_161 = arith.constant 1.000000e+00 : f32
    %447 = vector.broadcast %cst_161 : f32 to vector<8x2xf32>
    %448 = arith.addf %447, %446 : vector<8x2xf32>
    %449 = math.log %448 : vector<8x2xf32>
    %450 = arith.addf %441, %449 : vector<8x2xf32>
    %451 = vector.extract_strided_slice %383 {offsets = [8, 0], sizes = [8, 2], strides = [1, 1]} : vector<64x2xf32> to vector<8x2xf32>
    %452 = arith.addf %450, %451 : vector<8x2xf32>
    %453 = vector.shape_cast %420 : vector<8x1xi1> to vector<8x1xi1>
    %454 = vector.broadcast %453 : vector<8x1xi1> to vector<8x2xi1>
    %455 = arith.select %454, %452, %414 : vector<8x2xi1>, vector<8x2xf32>
    %456 = arith.select %420, %416, %404 : vector<8x1xi1>, vector<8x1xi32>
    %c2_162 = arith.constant 2 : index
    %c0_163 = arith.constant 0 : index
    %c0_164 = arith.constant 0 : index
    %457 = vector.load %arg7[%c2_162, %c0_163, %c0_164] : memref<8x8x1xi32, #tpu.memory_space<vmem>>, vector<1x8x1xi32>
    %458 = vector.shape_cast %457 : vector<1x8x1xi32> to vector<8x1xi32>
    %c2_165 = arith.constant 2 : index
    %c0_166 = arith.constant 0 : index
    %c0_167 = arith.constant 0 : index
    %459 = vector.load %arg8[%c2_165, %c0_166, %c0_167] : memref<8x8x1xf32, #tpu.memory_space<vmem>>, vector<1x8x1xf32>
    %460 = vector.shape_cast %459 : vector<1x8x1xf32> to vector<8x1xf32>
    %cst_168 = arith.constant 5.000000e-01 : f32
    %461 = vector.broadcast %cst_168 : f32 to vector<8x1xf32>
    %462 = arith.cmpf ogt, %460, %461 : vector<8x1xf32>
    %c0_i32_169 = arith.constant 0 : i32
    %463 = vector.broadcast %c0_i32_169 : i32 to vector<8x1xi32>
    %464 = arith.cmpi ne, %416, %463 : vector<8x1xi32>
    %c0_i32_170 = arith.constant 0 : i32
    %465 = vector.broadcast %c0_i32_170 : i32 to vector<8x1xi32>
    %466 = arith.cmpi ne, %458, %465 : vector<8x1xi32>
    %467 = arith.select %466, %399, %397 : vector<8x1xi1>, vector<8x1xf32>
    %468 = arith.select %466, %395, %393 : vector<8x1xi1>, vector<8x1xf32>
    %469 = arith.select %464, %467, %468 : vector<8x1xi1>, vector<8x1xf32>
    %470 = vector.extract_strided_slice %380 {offsets = [16, 0], sizes = [8, 1], strides = [1, 1]} : vector<64x1xf32> to vector<8x1xf32>
    %471 = vector.extract_strided_slice %382 {offsets = [16, 0], sizes = [8, 1], strides = [1, 1]} : vector<64x1xf32> to vector<8x1xf32>
    %472 = arith.select %466, %470, %471 : vector<8x1xi1>, vector<8x1xf32>
    %473 = arith.addf %469, %472 : vector<8x1xf32>
    %cst_171 = arith.constant 0.000000e+00 : f32
    %474 = vector.broadcast %cst_171 : f32 to vector<8x1xf32>
    %475 = arith.select %462, %473, %474 : vector<8x1xi1>, vector<8x1xf32>
    %476 = arith.addf %434, %475 : vector<8x1xf32>
    %477 = vector.extract_strided_slice %455 {offsets = [0, 0], sizes = [8, 1], strides = [1, 1]} : vector<8x2xf32> to vector<8x1xf32>
    %478 = vector.broadcast %477 : vector<8x1xf32> to vector<8x2xf32>
    %479 = arith.addf %478, %400 : vector<8x2xf32>
    %480 = vector.extract_strided_slice %455 {offsets = [0, 1], sizes = [8, 1], strides = [1, 1]} : vector<8x2xf32> to vector<8x1xf32>
    %481 = vector.broadcast %480 : vector<8x1xf32> to vector<8x2xf32>
    %482 = arith.addf %481, %401 : vector<8x2xf32>
    %483 = arith.maximumf %479, %482 : vector<8x2xf32>
    %484 = arith.subf %479, %482 : vector<8x2xf32>
    %485 = math.absf %484 : vector<8x2xf32>
    %cst_172 = arith.constant 0.000000e+00 : f32
    %486 = vector.broadcast %cst_172 : f32 to vector<8x2xf32>
    %487 = arith.subf %486, %485 : vector<8x2xf32>
    %488 = math.exp %487 : vector<8x2xf32>
    %cst_173 = arith.constant 1.000000e+00 : f32
    %489 = vector.broadcast %cst_173 : f32 to vector<8x2xf32>
    %490 = arith.addf %489, %488 : vector<8x2xf32>
    %491 = math.log %490 : vector<8x2xf32>
    %492 = arith.addf %483, %491 : vector<8x2xf32>
    %493 = vector.extract_strided_slice %383 {offsets = [16, 0], sizes = [8, 2], strides = [1, 1]} : vector<64x2xf32> to vector<8x2xf32>
    %494 = arith.addf %492, %493 : vector<8x2xf32>
    %495 = vector.shape_cast %462 : vector<8x1xi1> to vector<8x1xi1>
    %496 = vector.broadcast %495 : vector<8x1xi1> to vector<8x2xi1>
    %497 = arith.select %496, %494, %455 : vector<8x2xi1>, vector<8x2xf32>
    %498 = arith.select %462, %458, %456 : vector<8x1xi1>, vector<8x1xi32>
    %c3_174 = arith.constant 3 : index
    %c0_175 = arith.constant 0 : index
    %c0_176 = arith.constant 0 : index
    %499 = vector.load %arg7[%c3_174, %c0_175, %c0_176] : memref<8x8x1xi32, #tpu.memory_space<vmem>>, vector<1x8x1xi32>
    %500 = vector.shape_cast %499 : vector<1x8x1xi32> to vector<8x1xi32>
    %c3_177 = arith.constant 3 : index
    %c0_178 = arith.constant 0 : index
    %c0_179 = arith.constant 0 : index
    %501 = vector.load %arg8[%c3_177, %c0_178, %c0_179] : memref<8x8x1xf32, #tpu.memory_space<vmem>>, vector<1x8x1xf32>
    %502 = vector.shape_cast %501 : vector<1x8x1xf32> to vector<8x1xf32>
    %cst_180 = arith.constant 5.000000e-01 : f32
    %503 = vector.broadcast %cst_180 : f32 to vector<8x1xf32>
    %504 = arith.cmpf ogt, %502, %503 : vector<8x1xf32>
    %c0_i32_181 = arith.constant 0 : i32
    %505 = vector.broadcast %c0_i32_181 : i32 to vector<8x1xi32>
    %506 = arith.cmpi ne, %458, %505 : vector<8x1xi32>
    %c0_i32_182 = arith.constant 0 : i32
    %507 = vector.broadcast %c0_i32_182 : i32 to vector<8x1xi32>
    %508 = arith.cmpi ne, %500, %507 : vector<8x1xi32>
    %509 = arith.select %508, %399, %397 : vector<8x1xi1>, vector<8x1xf32>
    %510 = arith.select %508, %395, %393 : vector<8x1xi1>, vector<8x1xf32>
    %511 = arith.select %506, %509, %510 : vector<8x1xi1>, vector<8x1xf32>
    %512 = vector.extract_strided_slice %380 {offsets = [24, 0], sizes = [8, 1], strides = [1, 1]} : vector<64x1xf32> to vector<8x1xf32>
    %513 = vector.extract_strided_slice %382 {offsets = [24, 0], sizes = [8, 1], strides = [1, 1]} : vector<64x1xf32> to vector<8x1xf32>
    %514 = arith.select %508, %512, %513 : vector<8x1xi1>, vector<8x1xf32>
    %515 = arith.addf %511, %514 : vector<8x1xf32>
    %cst_183 = arith.constant 0.000000e+00 : f32
    %516 = vector.broadcast %cst_183 : f32 to vector<8x1xf32>
    %517 = arith.select %504, %515, %516 : vector<8x1xi1>, vector<8x1xf32>
    %518 = arith.addf %476, %517 : vector<8x1xf32>
    %519 = vector.extract_strided_slice %497 {offsets = [0, 0], sizes = [8, 1], strides = [1, 1]} : vector<8x2xf32> to vector<8x1xf32>
    %520 = vector.broadcast %519 : vector<8x1xf32> to vector<8x2xf32>
    %521 = arith.addf %520, %400 : vector<8x2xf32>
    %522 = vector.extract_strided_slice %497 {offsets = [0, 1], sizes = [8, 1], strides = [1, 1]} : vector<8x2xf32> to vector<8x1xf32>
    %523 = vector.broadcast %522 : vector<8x1xf32> to vector<8x2xf32>
    %524 = arith.addf %523, %401 : vector<8x2xf32>
    %525 = arith.maximumf %521, %524 : vector<8x2xf32>
    %526 = arith.subf %521, %524 : vector<8x2xf32>
    %527 = math.absf %526 : vector<8x2xf32>
    %cst_184 = arith.constant 0.000000e+00 : f32
    %528 = vector.broadcast %cst_184 : f32 to vector<8x2xf32>
    %529 = arith.subf %528, %527 : vector<8x2xf32>
    %530 = math.exp %529 : vector<8x2xf32>
    %cst_185 = arith.constant 1.000000e+00 : f32
    %531 = vector.broadcast %cst_185 : f32 to vector<8x2xf32>
    %532 = arith.addf %531, %530 : vector<8x2xf32>
    %533 = math.log %532 : vector<8x2xf32>
    %534 = arith.addf %525, %533 : vector<8x2xf32>
    %535 = vector.extract_strided_slice %383 {offsets = [24, 0], sizes = [8, 2], strides = [1, 1]} : vector<64x2xf32> to vector<8x2xf32>
    %536 = arith.addf %534, %535 : vector<8x2xf32>
    %537 = vector.shape_cast %504 : vector<8x1xi1> to vector<8x1xi1>
    %538 = vector.broadcast %537 : vector<8x1xi1> to vector<8x2xi1>
    %539 = arith.select %538, %536, %497 : vector<8x2xi1>, vector<8x2xf32>
    %540 = arith.select %504, %500, %498 : vector<8x1xi1>, vector<8x1xi32>
    %c4_186 = arith.constant 4 : index
    %c0_187 = arith.constant 0 : index
    %c0_188 = arith.constant 0 : index
    %541 = vector.load %arg7[%c4_186, %c0_187, %c0_188] : memref<8x8x1xi32, #tpu.memory_space<vmem>>, vector<1x8x1xi32>
    %542 = vector.shape_cast %541 : vector<1x8x1xi32> to vector<8x1xi32>
    %c4_189 = arith.constant 4 : index
    %c0_190 = arith.constant 0 : index
    %c0_191 = arith.constant 0 : index
    %543 = vector.load %arg8[%c4_189, %c0_190, %c0_191] : memref<8x8x1xf32, #tpu.memory_space<vmem>>, vector<1x8x1xf32>
    %544 = vector.shape_cast %543 : vector<1x8x1xf32> to vector<8x1xf32>
    %cst_192 = arith.constant 5.000000e-01 : f32
    %545 = vector.broadcast %cst_192 : f32 to vector<8x1xf32>
    %546 = arith.cmpf ogt, %544, %545 : vector<8x1xf32>
    %c0_i32_193 = arith.constant 0 : i32
    %547 = vector.broadcast %c0_i32_193 : i32 to vector<8x1xi32>
    %548 = arith.cmpi ne, %500, %547 : vector<8x1xi32>
    %c0_i32_194 = arith.constant 0 : i32
    %549 = vector.broadcast %c0_i32_194 : i32 to vector<8x1xi32>
    %550 = arith.cmpi ne, %542, %549 : vector<8x1xi32>
    %551 = arith.select %550, %399, %397 : vector<8x1xi1>, vector<8x1xf32>
    %552 = arith.select %550, %395, %393 : vector<8x1xi1>, vector<8x1xf32>
    %553 = arith.select %548, %551, %552 : vector<8x1xi1>, vector<8x1xf32>
    %554 = vector.extract_strided_slice %380 {offsets = [32, 0], sizes = [8, 1], strides = [1, 1]} : vector<64x1xf32> to vector<8x1xf32>
    %555 = vector.extract_strided_slice %382 {offsets = [32, 0], sizes = [8, 1], strides = [1, 1]} : vector<64x1xf32> to vector<8x1xf32>
    %556 = arith.select %550, %554, %555 : vector<8x1xi1>, vector<8x1xf32>
    %557 = arith.addf %553, %556 : vector<8x1xf32>
    %cst_195 = arith.constant 0.000000e+00 : f32
    %558 = vector.broadcast %cst_195 : f32 to vector<8x1xf32>
    %559 = arith.select %546, %557, %558 : vector<8x1xi1>, vector<8x1xf32>
    %560 = arith.addf %518, %559 : vector<8x1xf32>
    %561 = vector.extract_strided_slice %539 {offsets = [0, 0], sizes = [8, 1], strides = [1, 1]} : vector<8x2xf32> to vector<8x1xf32>
    %562 = vector.broadcast %561 : vector<8x1xf32> to vector<8x2xf32>
    %563 = arith.addf %562, %400 : vector<8x2xf32>
    %564 = vector.extract_strided_slice %539 {offsets = [0, 1], sizes = [8, 1], strides = [1, 1]} : vector<8x2xf32> to vector<8x1xf32>
    %565 = vector.broadcast %564 : vector<8x1xf32> to vector<8x2xf32>
    %566 = arith.addf %565, %401 : vector<8x2xf32>
    %567 = arith.maximumf %563, %566 : vector<8x2xf32>
    %568 = arith.subf %563, %566 : vector<8x2xf32>
    %569 = math.absf %568 : vector<8x2xf32>
    %cst_196 = arith.constant 0.000000e+00 : f32
    %570 = vector.broadcast %cst_196 : f32 to vector<8x2xf32>
    %571 = arith.subf %570, %569 : vector<8x2xf32>
    %572 = math.exp %571 : vector<8x2xf32>
    %cst_197 = arith.constant 1.000000e+00 : f32
    %573 = vector.broadcast %cst_197 : f32 to vector<8x2xf32>
    %574 = arith.addf %573, %572 : vector<8x2xf32>
    %575 = math.log %574 : vector<8x2xf32>
    %576 = arith.addf %567, %575 : vector<8x2xf32>
    %577 = vector.extract_strided_slice %383 {offsets = [32, 0], sizes = [8, 2], strides = [1, 1]} : vector<64x2xf32> to vector<8x2xf32>
    %578 = arith.addf %576, %577 : vector<8x2xf32>
    %579 = vector.shape_cast %546 : vector<8x1xi1> to vector<8x1xi1>
    %580 = vector.broadcast %579 : vector<8x1xi1> to vector<8x2xi1>
    %581 = arith.select %580, %578, %539 : vector<8x2xi1>, vector<8x2xf32>
    %582 = arith.select %546, %542, %540 : vector<8x1xi1>, vector<8x1xi32>
    %c5_198 = arith.constant 5 : index
    %c0_199 = arith.constant 0 : index
    %c0_200 = arith.constant 0 : index
    %583 = vector.load %arg7[%c5_198, %c0_199, %c0_200] : memref<8x8x1xi32, #tpu.memory_space<vmem>>, vector<1x8x1xi32>
    %584 = vector.shape_cast %583 : vector<1x8x1xi32> to vector<8x1xi32>
    %c5_201 = arith.constant 5 : index
    %c0_202 = arith.constant 0 : index
    %c0_203 = arith.constant 0 : index
    %585 = vector.load %arg8[%c5_201, %c0_202, %c0_203] : memref<8x8x1xf32, #tpu.memory_space<vmem>>, vector<1x8x1xf32>
    %586 = vector.shape_cast %585 : vector<1x8x1xf32> to vector<8x1xf32>
    %cst_204 = arith.constant 5.000000e-01 : f32
    %587 = vector.broadcast %cst_204 : f32 to vector<8x1xf32>
    %588 = arith.cmpf ogt, %586, %587 : vector<8x1xf32>
    %c0_i32_205 = arith.constant 0 : i32
    %589 = vector.broadcast %c0_i32_205 : i32 to vector<8x1xi32>
    %590 = arith.cmpi ne, %542, %589 : vector<8x1xi32>
    %c0_i32_206 = arith.constant 0 : i32
    %591 = vector.broadcast %c0_i32_206 : i32 to vector<8x1xi32>
    %592 = arith.cmpi ne, %584, %591 : vector<8x1xi32>
    %593 = arith.select %592, %399, %397 : vector<8x1xi1>, vector<8x1xf32>
    %594 = arith.select %592, %395, %393 : vector<8x1xi1>, vector<8x1xf32>
    %595 = arith.select %590, %593, %594 : vector<8x1xi1>, vector<8x1xf32>
    %596 = vector.extract_strided_slice %380 {offsets = [40, 0], sizes = [8, 1], strides = [1, 1]} : vector<64x1xf32> to vector<8x1xf32>
    %597 = vector.extract_strided_slice %382 {offsets = [40, 0], sizes = [8, 1], strides = [1, 1]} : vector<64x1xf32> to vector<8x1xf32>
    %598 = arith.select %592, %596, %597 : vector<8x1xi1>, vector<8x1xf32>
    %599 = arith.addf %595, %598 : vector<8x1xf32>
    %cst_207 = arith.constant 0.000000e+00 : f32
    %600 = vector.broadcast %cst_207 : f32 to vector<8x1xf32>
    %601 = arith.select %588, %599, %600 : vector<8x1xi1>, vector<8x1xf32>
    %602 = arith.addf %560, %601 : vector<8x1xf32>
    %603 = vector.extract_strided_slice %581 {offsets = [0, 0], sizes = [8, 1], strides = [1, 1]} : vector<8x2xf32> to vector<8x1xf32>
    %604 = vector.broadcast %603 : vector<8x1xf32> to vector<8x2xf32>
    %605 = arith.addf %604, %400 : vector<8x2xf32>
    %606 = vector.extract_strided_slice %581 {offsets = [0, 1], sizes = [8, 1], strides = [1, 1]} : vector<8x2xf32> to vector<8x1xf32>
    %607 = vector.broadcast %606 : vector<8x1xf32> to vector<8x2xf32>
    %608 = arith.addf %607, %401 : vector<8x2xf32>
    %609 = arith.maximumf %605, %608 : vector<8x2xf32>
    %610 = arith.subf %605, %608 : vector<8x2xf32>
    %611 = math.absf %610 : vector<8x2xf32>
    %cst_208 = arith.constant 0.000000e+00 : f32
    %612 = vector.broadcast %cst_208 : f32 to vector<8x2xf32>
    %613 = arith.subf %612, %611 : vector<8x2xf32>
    %614 = math.exp %613 : vector<8x2xf32>
    %cst_209 = arith.constant 1.000000e+00 : f32
    %615 = vector.broadcast %cst_209 : f32 to vector<8x2xf32>
    %616 = arith.addf %615, %614 : vector<8x2xf32>
    %617 = math.log %616 : vector<8x2xf32>
    %618 = arith.addf %609, %617 : vector<8x2xf32>
    %619 = vector.extract_strided_slice %383 {offsets = [40, 0], sizes = [8, 2], strides = [1, 1]} : vector<64x2xf32> to vector<8x2xf32>
    %620 = arith.addf %618, %619 : vector<8x2xf32>
    %621 = vector.shape_cast %588 : vector<8x1xi1> to vector<8x1xi1>
    %622 = vector.broadcast %621 : vector<8x1xi1> to vector<8x2xi1>
    %623 = arith.select %622, %620, %581 : vector<8x2xi1>, vector<8x2xf32>
    %624 = arith.select %588, %584, %582 : vector<8x1xi1>, vector<8x1xi32>
    %c6_210 = arith.constant 6 : index
    %c0_211 = arith.constant 0 : index
    %c0_212 = arith.constant 0 : index
    %625 = vector.load %arg7[%c6_210, %c0_211, %c0_212] : memref<8x8x1xi32, #tpu.memory_space<vmem>>, vector<1x8x1xi32>
    %626 = vector.shape_cast %625 : vector<1x8x1xi32> to vector<8x1xi32>
    %c6_213 = arith.constant 6 : index
    %c0_214 = arith.constant 0 : index
    %c0_215 = arith.constant 0 : index
    %627 = vector.load %arg8[%c6_213, %c0_214, %c0_215] : memref<8x8x1xf32, #tpu.memory_space<vmem>>, vector<1x8x1xf32>
    %628 = vector.shape_cast %627 : vector<1x8x1xf32> to vector<8x1xf32>
    %cst_216 = arith.constant 5.000000e-01 : f32
    %629 = vector.broadcast %cst_216 : f32 to vector<8x1xf32>
    %630 = arith.cmpf ogt, %628, %629 : vector<8x1xf32>
    %c0_i32_217 = arith.constant 0 : i32
    %631 = vector.broadcast %c0_i32_217 : i32 to vector<8x1xi32>
    %632 = arith.cmpi ne, %584, %631 : vector<8x1xi32>
    %c0_i32_218 = arith.constant 0 : i32
    %633 = vector.broadcast %c0_i32_218 : i32 to vector<8x1xi32>
    %634 = arith.cmpi ne, %626, %633 : vector<8x1xi32>
    %635 = arith.select %634, %399, %397 : vector<8x1xi1>, vector<8x1xf32>
    %636 = arith.select %634, %395, %393 : vector<8x1xi1>, vector<8x1xf32>
    %637 = arith.select %632, %635, %636 : vector<8x1xi1>, vector<8x1xf32>
    %638 = vector.extract_strided_slice %380 {offsets = [48, 0], sizes = [8, 1], strides = [1, 1]} : vector<64x1xf32> to vector<8x1xf32>
    %639 = vector.extract_strided_slice %382 {offsets = [48, 0], sizes = [8, 1], strides = [1, 1]} : vector<64x1xf32> to vector<8x1xf32>
    %640 = arith.select %634, %638, %639 : vector<8x1xi1>, vector<8x1xf32>
    %641 = arith.addf %637, %640 : vector<8x1xf32>
    %cst_219 = arith.constant 0.000000e+00 : f32
    %642 = vector.broadcast %cst_219 : f32 to vector<8x1xf32>
    %643 = arith.select %630, %641, %642 : vector<8x1xi1>, vector<8x1xf32>
    %644 = arith.addf %602, %643 : vector<8x1xf32>
    %645 = vector.extract_strided_slice %623 {offsets = [0, 0], sizes = [8, 1], strides = [1, 1]} : vector<8x2xf32> to vector<8x1xf32>
    %646 = vector.broadcast %645 : vector<8x1xf32> to vector<8x2xf32>
    %647 = arith.addf %646, %400 : vector<8x2xf32>
    %648 = vector.extract_strided_slice %623 {offsets = [0, 1], sizes = [8, 1], strides = [1, 1]} : vector<8x2xf32> to vector<8x1xf32>
    %649 = vector.broadcast %648 : vector<8x1xf32> to vector<8x2xf32>
    %650 = arith.addf %649, %401 : vector<8x2xf32>
    %651 = arith.maximumf %647, %650 : vector<8x2xf32>
    %652 = arith.subf %647, %650 : vector<8x2xf32>
    %653 = math.absf %652 : vector<8x2xf32>
    %cst_220 = arith.constant 0.000000e+00 : f32
    %654 = vector.broadcast %cst_220 : f32 to vector<8x2xf32>
    %655 = arith.subf %654, %653 : vector<8x2xf32>
    %656 = math.exp %655 : vector<8x2xf32>
    %cst_221 = arith.constant 1.000000e+00 : f32
    %657 = vector.broadcast %cst_221 : f32 to vector<8x2xf32>
    %658 = arith.addf %657, %656 : vector<8x2xf32>
    %659 = math.log %658 : vector<8x2xf32>
    %660 = arith.addf %651, %659 : vector<8x2xf32>
    %661 = vector.extract_strided_slice %383 {offsets = [48, 0], sizes = [8, 2], strides = [1, 1]} : vector<64x2xf32> to vector<8x2xf32>
    %662 = arith.addf %660, %661 : vector<8x2xf32>
    %663 = vector.shape_cast %630 : vector<8x1xi1> to vector<8x1xi1>
    %664 = vector.broadcast %663 : vector<8x1xi1> to vector<8x2xi1>
    %665 = arith.select %664, %662, %623 : vector<8x2xi1>, vector<8x2xf32>
    %666 = arith.select %630, %626, %624 : vector<8x1xi1>, vector<8x1xi32>
    %c7_222 = arith.constant 7 : index
    %c0_223 = arith.constant 0 : index
    %c0_224 = arith.constant 0 : index
    %667 = vector.load %arg7[%c7_222, %c0_223, %c0_224] : memref<8x8x1xi32, #tpu.memory_space<vmem>>, vector<1x8x1xi32>
    %668 = vector.shape_cast %667 : vector<1x8x1xi32> to vector<8x1xi32>
    %c7_225 = arith.constant 7 : index
    %c0_226 = arith.constant 0 : index
    %c0_227 = arith.constant 0 : index
    %669 = vector.load %arg8[%c7_225, %c0_226, %c0_227] : memref<8x8x1xf32, #tpu.memory_space<vmem>>, vector<1x8x1xf32>
    %670 = vector.shape_cast %669 : vector<1x8x1xf32> to vector<8x1xf32>
    %cst_228 = arith.constant 5.000000e-01 : f32
    %671 = vector.broadcast %cst_228 : f32 to vector<8x1xf32>
    %672 = arith.cmpf ogt, %670, %671 : vector<8x1xf32>
    %c0_i32_229 = arith.constant 0 : i32
    %673 = vector.broadcast %c0_i32_229 : i32 to vector<8x1xi32>
    %674 = arith.cmpi ne, %626, %673 : vector<8x1xi32>
    %c0_i32_230 = arith.constant 0 : i32
    %675 = vector.broadcast %c0_i32_230 : i32 to vector<8x1xi32>
    %676 = arith.cmpi ne, %668, %675 : vector<8x1xi32>
    %677 = arith.select %676, %399, %397 : vector<8x1xi1>, vector<8x1xf32>
    %678 = arith.select %676, %395, %393 : vector<8x1xi1>, vector<8x1xf32>
    %679 = arith.select %674, %677, %678 : vector<8x1xi1>, vector<8x1xf32>
    %680 = vector.extract_strided_slice %380 {offsets = [56, 0], sizes = [8, 1], strides = [1, 1]} : vector<64x1xf32> to vector<8x1xf32>
    %681 = vector.extract_strided_slice %382 {offsets = [56, 0], sizes = [8, 1], strides = [1, 1]} : vector<64x1xf32> to vector<8x1xf32>
    %682 = arith.select %676, %680, %681 : vector<8x1xi1>, vector<8x1xf32>
    %683 = arith.addf %679, %682 : vector<8x1xf32>
    %cst_231 = arith.constant 0.000000e+00 : f32
    %684 = vector.broadcast %cst_231 : f32 to vector<8x1xf32>
    %685 = arith.select %672, %683, %684 : vector<8x1xi1>, vector<8x1xf32>
    %686 = arith.addf %644, %685 : vector<8x1xf32>
    %687 = vector.extract_strided_slice %665 {offsets = [0, 0], sizes = [8, 1], strides = [1, 1]} : vector<8x2xf32> to vector<8x1xf32>
    %688 = vector.broadcast %687 : vector<8x1xf32> to vector<8x2xf32>
    %689 = arith.addf %688, %400 : vector<8x2xf32>
    %690 = vector.extract_strided_slice %665 {offsets = [0, 1], sizes = [8, 1], strides = [1, 1]} : vector<8x2xf32> to vector<8x1xf32>
    %691 = vector.broadcast %690 : vector<8x1xf32> to vector<8x2xf32>
    %692 = arith.addf %691, %401 : vector<8x2xf32>
    %693 = arith.maximumf %689, %692 : vector<8x2xf32>
    %694 = arith.subf %689, %692 : vector<8x2xf32>
    %695 = math.absf %694 : vector<8x2xf32>
    %cst_232 = arith.constant 0.000000e+00 : f32
    %696 = vector.broadcast %cst_232 : f32 to vector<8x2xf32>
    %697 = arith.subf %696, %695 : vector<8x2xf32>
    %698 = math.exp %697 : vector<8x2xf32>
    %cst_233 = arith.constant 1.000000e+00 : f32
    %699 = vector.broadcast %cst_233 : f32 to vector<8x2xf32>
    %700 = arith.addf %699, %698 : vector<8x2xf32>
    %701 = math.log %700 : vector<8x2xf32>
    %702 = arith.addf %693, %701 : vector<8x2xf32>
    %703 = vector.extract_strided_slice %383 {offsets = [56, 0], sizes = [8, 2], strides = [1, 1]} : vector<64x2xf32> to vector<8x2xf32>
    %704 = arith.addf %702, %703 : vector<8x2xf32>
    %705 = vector.shape_cast %672 : vector<8x1xi1> to vector<8x1xi1>
    %706 = vector.broadcast %705 : vector<8x1xi1> to vector<8x2xi1>
    %707 = arith.select %706, %704, %665 : vector<8x2xi1>, vector<8x2xf32>
    %708 = arith.select %672, %668, %666 : vector<8x1xi1>, vector<8x1xi32>
    %c0_i32_234 = arith.constant 0 : i32
    %709 = vector.broadcast %c0_i32_234 : i32 to vector<8x1xi32>
    %710 = arith.cmpi ne, %708, %709 : vector<8x1xi32>
    %711 = arith.select %710, %391, %389 : vector<8x1xi1>, vector<8x1xf32>
    %712 = arith.addf %686, %711 : vector<8x1xf32>
    %713 = arith.addf %707, %402 : vector<8x2xf32>
    %714 = vector.extract_strided_slice %713 {offsets = [0, 0], sizes = [8, 1], strides = [1, 1]} : vector<8x2xf32> to vector<8x1xf32>
    %715 = vector.extract_strided_slice %713 {offsets = [0, 1], sizes = [8, 1], strides = [1, 1]} : vector<8x2xf32> to vector<8x1xf32>
    %716 = arith.maximumf %714, %715 : vector<8x1xf32>
    %717 = arith.subf %714, %715 : vector<8x1xf32>
    %718 = math.absf %717 : vector<8x1xf32>
    %cst_235 = arith.constant 0.000000e+00 : f32
    %719 = vector.broadcast %cst_235 : f32 to vector<8x1xf32>
    %720 = arith.subf %719, %718 : vector<8x1xf32>
    %721 = math.exp %720 : vector<8x1xf32>
    %cst_236 = arith.constant 1.000000e+00 : f32
    %722 = vector.broadcast %cst_236 : f32 to vector<8x1xf32>
    %723 = arith.addf %722, %721 : vector<8x1xf32>
    %724 = math.log %723 : vector<8x1xf32>
    %725 = arith.addf %716, %724 : vector<8x1xf32>
    %726 = arith.subf %712, %725 : vector<8x1xf32>
    %c0_237 = arith.constant 0 : index
    %c0_238 = arith.constant 0 : index
    %727 = vector.load %arg10[%c0_237, %c0_238] : memref<8x1xf32, #tpu.memory_space<vmem>>, vector<8x1xf32>
    tpu.vector_store %arg10[%c0_237, %c0_238], %726 {strides = array<i32>} : memref<8x1xf32, #tpu.memory_space<vmem>>, vector<8x1xf32>,
    return
  }
  func.func @transform_0(%arg0: i32) -> (i32, i32) {
    %c0_i32 = arith.constant 0 : i32
    %c0_i32_0 = arith.constant 0 : i32
    return %arg0, %c0_i32 : i32, i32
  }
  func.func @transform_1(%arg0: i32) -> (i32, i32) {
    %c0_i32 = arith.constant 0 : i32
    %c0_i32_0 = arith.constant 0 : i32
    %c0_i32_1 = arith.constant 0 : i32
    return %c0_i32, %c0_i32_0 : i32, i32
  }
  func.func @transform_2(%arg0: i32) -> (i32, i32) {
    %c0_i32 = arith.constant 0 : i32
    %c0_i32_0 = arith.constant 0 : i32
    %c0_i32_1 = arith.constant 0 : i32
    return %c0_i32, %c0_i32_0 : i32, i32
  }
  func.func @transform_3(%arg0: i32) -> (i32, i32) {
    %c0_i32 = arith.constant 0 : i32
    %c0_i32_0 = arith.constant 0 : i32
    %c0_i32_1 = arith.constant 0 : i32
    return %c0_i32, %c0_i32_0 : i32, i32
  }
  func.func @transform_4(%arg0: i32) -> (i32, i32) {
    %c0_i32 = arith.constant 0 : i32
    %c0_i32_0 = arith.constant 0 : i32
    %c0_i32_1 = arith.constant 0 : i32
    return %c0_i32, %c0_i32_0 : i32, i32
  }
  func.func @transform_5(%arg0: i32) -> (i32, i32) {
    %c0_i32 = arith.constant 0 : i32
    %c0_i32_0 = arith.constant 0 : i32
    %c0_i32_1 = arith.constant 0 : i32
    return %c0_i32, %c0_i32_0 : i32, i32
  }
  func.func @transform_6(%arg0: i32) -> (i32, i32, i32) {
    %c0_i32 = arith.constant 0 : i32
    %c0_i32_0 = arith.constant 0 : i32
    %c0_i32_1 = arith.constant 0 : i32
    return %c0_i32, %arg0, %c0_i32_0 : i32, i32, i32
  }
  func.func @transform_7(%arg0: i32) -> (i32, i32, i32) {
    %c0_i32 = arith.constant 0 : i32
    %c0_i32_0 = arith.constant 0 : i32
    %c0_i32_1 = arith.constant 0 : i32
    return %c0_i32, %arg0, %c0_i32_0 : i32, i32, i32
  }
  func.func @transform_8(%arg0: i32) -> i32 {
    %c0_i32 = arith.constant 0 : i32
    %c0_i32_0 = arith.constant 0 : i32
    return %c0_i32 : i32
  }
  func.func @transform_9(%arg0: i32) -> (i32, i32) {
    %c0_i32 = arith.constant 0 : i32
    %c0_i32_0 = arith.constant 0 : i32
    return %arg0, %c0_i32 : i32, i32
  }
}

</mosaic_0001>

<bundles_post_ra>
// kernel: lstmcrf_forward.1
= control target key start
LH: loop header
LB: loop body
LE: loop exit
PB: predicated region body
PF: predicated region fallthrough
CT: control target
= control target key end

     0   :  { %14 = vsyncpa [#allocation8], 0  ;;  %s2984_s30 = smov 0   ;;  %s2986_s10 = smov 0   ;;  %s3871_s0 = inlined_call_operand.vmem [shape: f32[128,16], index: 0, kind: input, shape index: {}]   ;;  %s3872_s1 = inlined_call_operand.vmem [shape: f32[16,256], index: 1, kind: input, shape index: {}]   ;;  %s3873_s2 = inlined_call_operand.vmem [shape: f32[1,256], index: 2, kind: input, shape index: {}]   ;;  %s3874_s3 = inlined_call_operand.vmem [shape: f32[32,128], index: 3, kind: input, shape index: {}]   ;;  %s3875_s4 = inlined_call_operand.vmem [shape: f32[32,128], index: 4, kind: input, shape index: {}]   ;;  %s3876_s5 = inlined_call_operand.vmem [shape: f32[64,1], index: 5, kind: input, shape index: {}]   ;;  %s3877_s6 = inlined_call_operand.vmem [shape: s32[8,16,1], index: 6, kind: input, shape index: {}]   ;;  %s3878_s7 = inlined_call_operand.vmem [shape: f32[8,16,1], index: 7, kind: input, shape index: {}]   ;;  %s3879_s8 = inlined_call_operand.vmem [shape: f32[9], index: 8, kind: input, shape index: {}]   ;;  %s3880_s9 = inlined_call_operand.vmem [shape: f32[16,1], index: 9, kind: output, shape index: {}]  }
   0x1   :  { %s2988_s11 = smov 0  }
   0x2 LB: > { %s3000_s12 = sadd.s32 4294967295, %s2924_s11   ;;  %s3003_s13 = sadd.s32 1, %s2924_s11   ;;  %s2924_s11 = sphi %s2988_s11, %s3885_s11   ;;  %s2920_s10 = sphi %s2986_s10, %s3884_s10   ;;  %s2916_s30 = sphi %s2984_s30, %s3883_s30  }
   0x3   : > { %s155_s14 = ssub.s32 %s2924_s11, %s3003_s13  ;;  %s158_s15 = sadd.s32 1, %s2920_s10 }
   0x4   : > { %p156_p0 = scmp.eq.s32.totalorder %s155_s14, 0  ;;  %p165_p1 = scmp.ne.s32.totalorder %s2920_s10, %s2916_s30 }
   0x5   : > { %p166_p2 = scmp.eq.s32.totalorder %s2924_s11, 0  ;;  %p2542_p3 = scmp.ge.s32.totalorder %s2924_s11, 1 }
   0x6   : > { %s3013_s16 = scalar_select %p156_p0, %s2920_s10, %s158_s15  }
   0x7   : > { %p3015_p4 = por %p166_p2, %p165_p1  ;;  %p255_p5 = scmp.lt.s32.totalorder %s2924_s11, 3 }
   0x8   : > { %p2678_p6 = scmp.eq.s32.totalorder %s3000_s12, 0  ;;  %s282_s21 = sshll.u32 %s3879_s8, 4  ;;  %s283_s21 = int_to_ptr.vmem [resolvable:$true] %s282_s21 }
   0x9   : > { %p3021_p7 = pnand %p2542_p3, %p255_p5  ;;  %s2926_s22 = smov [#allocation7]  }
   0xa   : > { %p2544_p10 = scmp.ge.s32.totalorder %s2924_s11, 2 }
   0xb   : > { %p2674_p8 = pneg %p3021_p7 }
   0xc   : > { %289 = sbr.rel (%p2544_p10) target bundleno = 41 (0x29), region = 40 }
   0xd   : > { %p2675_p9 = pnand %p2678_p6, %p2674_p8 }
   0xf   : > { %2677 = dma.vmem_to_smem (!%p2675_p9), %s283_s21, 16, %s2926_s22, [#allocation8]  }
  0x11   : > { %301 = sbr.rel (!%p3015_p4) target bundleno = 29 (0x1d), region = 48  ;;  %s303_s23 = sand.u32 (%p3015_p4), 1, %s2920_s10  }
  0x12   : > { %s2546_s24 = sshll.u32 (%p3015_p4), %s2924_s11, 3  ;;  %s2545_s25 = sshll.u32 (%p3015_p4), %s303_s23, 6 }
  0x13   : > { %s307_s28 = scalar_lea.vmem (%p3015_p4), %s3877_s6, %s2546_s24  ;;  %s305_s29 = scalar_lea.vmem (%p3015_p4), [#allocation5], %s2545_s25 }
  0x14   : > { %v350_v0 = vld [vmem:[%s307_s28] sm:$0xff] (%p3015_p4)  ;;  %v352_v1 = vld [vmem:[%s307_s28 + $0x10] sm:$0xff] (%p3015_p4) }
  0x15   : > { %v354_v2 = vld [vmem:[%s307_s28 + $0x20] sm:$0xff] (%p3015_p4)  ;;  %351 = vst [vmem:[%s305_s29] sm:$0xff] (%p3015_p4), %v350_v0  ;;  %v356_v3 = vld [vmem:[%s307_s28 + $0x30] sm:$0xff] (%p3015_p4) }
  0x16   : > { %353 = vst [vmem:[%s305_s29 + $0x8] sm:$0xff] %v352_v1  ;;  %v358_v4 = vld [vmem:[%s307_s28 + $0x40] sm:$0xff]  ;;  %v360_v5 = vld [vmem:[%s307_s28 + $0x50] sm:$0xff] }
  0x17   : > { %355 = vst [vmem:[%s305_s29 + $0x10] sm:$0xff] %v354_v2  ;;  %v362_v6 = vld [vmem:[%s307_s28 + $0x60] sm:$0xff]  ;;  %v364_v7 = vld [vmem:[%s307_s28 + $0x70] sm:$0xff] }
  0x18   : > { %357 = vst [vmem:[%s305_s29 + $0x18] sm:$0xff] %v356_v3 }
  0x19   : > { %359 = vst [vmem:[%s305_s29 + $0x20] sm:$0xff] %v358_v4 }
  0x1a   : > { %361 = vst [vmem:[%s305_s29 + $0x28] sm:$0xff] %v360_v5 }
  0x1b   : > { %363 = vst [vmem:[%s305_s29 + $0x30] sm:$0xff] %v362_v6 }
  0x1c   : > { %365 = vst [vmem:[%s305_s29 + $0x38] sm:$0xff] %v364_v7 }
  0x1d PF: > { %371 = sbr.rel (!%p3015_p4) target bundleno = 41 (0x29), region = 86  ;;  %s373_s14 = sand.u32 (%p3015_p4), 1, %s2920_s10  }
  0x1e   : > { %s2548_s15 = sshll.u32 (%p3015_p4), %s2924_s11, 3  ;;  %s2547_s19 = sshll.u32 (%p3015_p4), %s373_s14, 6 }
  0x1f   : > { %s377_s22 = scalar_lea.vmem (%p3015_p4), %s3878_s7, %s2548_s15  ;;  %s375_s23 = scalar_lea.vmem (%p3015_p4), [#allocation6], %s2547_s19 }
  0x20   : > { %v420_v8 = vld [vmem:[%s377_s22] sm:$0xff] (%p3015_p4)  ;;  %v422_v9 = vld [vmem:[%s377_s22 + $0x10] sm:$0xff] (%p3015_p4) }
  0x21   : > { %v424_v10 = vld [vmem:[%s377_s22 + $0x20] sm:$0xff] (%p3015_p4)  ;;  %421 = vst [vmem:[%s375_s23] sm:$0xff] (%p3015_p4), %v420_v8  ;;  %v426_v11 = vld [vmem:[%s377_s22 + $0x30] sm:$0xff] (%p3015_p4) }
  0x22   : > { %423 = vst [vmem:[%s375_s23 + $0x8] sm:$0xff] %v422_v9  ;;  %v428_v12 = vld [vmem:[%s377_s22 + $0x40] sm:$0xff]  ;;  %v430_v13 = vld [vmem:[%s377_s22 + $0x50] sm:$0xff] }
  0x23   : > { %425 = vst [vmem:[%s375_s23 + $0x10] sm:$0xff] %v424_v10  ;;  %v432_v14 = vld [vmem:[%s377_s22 + $0x60] sm:$0xff]  ;;  %v434_v15 = vld [vmem:[%s377_s22 + $0x70] sm:$0xff] }
  0x24   : > { %427 = vst [vmem:[%s375_s23 + $0x18] sm:$0xff] %v426_v11 }
  0x25   : > { %429 = vst [vmem:[%s375_s23 + $0x20] sm:$0xff] %v428_v12 }
  0x26   : > { %431 = vst [vmem:[%s375_s23 + $0x28] sm:$0xff] %v430_v13 }
  0x27   : > { %433 = vst [vmem:[%s375_s23 + $0x30] sm:$0xff] %v432_v14 }
  0x28   : > { %435 = vst [vmem:[%s375_s23 + $0x38] sm:$0xff] %v434_v15 }
  0x29 PF: > { %444 = sbr.rel (%p3021_p7) target bundleno = 6429 (0x191d), region = 124  ;;  %s447_s11 = sand.u32 (!%p3021_p7), 1, %s2916_s30  }
  0x2a   : > { %s2550_s17 = sshll.u32 (!%p3021_p7), %s447_s11, 6 }
  0x2b   : > { %s3050_s24 = scalar_lea.vmem (!%p3021_p7), [#allocation5], %s2550_s17  ;;  %s3052_s25 = scalar_lea.vmem (!%p3021_p7), [#allocation6], %s2550_s17 }
  0x2e   : > { %2911 = dma.done.wait (%p2678_p6), [#allocation8], 16  }
  0x2f   : > { %2913 = vsyncadd (%p2678_p6), [#allocation8], 4294967280 }
  0x30   : > { %465 = sfence }
  0x31   : > { %v524_v16 = vld [vmem:[%s3872_s1 + $0x18] sm:$0xff]  ;;  %v522_v17 = vld [vmem:[%s3872_s1 + $0x8] sm:$0xff]  ;;  %s2553_s30 = sshll.u32 %s3000_s12, 3  ;;  %v3073_v19 = vld [vmem:[%s3875_s4 + $0x10] sm:$0xff]  ;;  %vm531_vm0 = vcmask 130048   ;;  %v2927_v26 = vmov 0.0  }
  0x32   : > { %2668 = vmatpush.msra.mxu3 %v524_v16  ;;  %p504_p11 = scmp.lt.s32.totalorder %s2553_s30, 15  ;;  %v3068_v18 = vld [vmem:[%s3875_s4 + $0x18] sm:$0xff]  ;;  %611 = vmatpush.msra.mxu1 %v524_v16  ;;  %v3085_v20 = vld [vmem:[%s3875_s4 + $0x8] sm:$0xff]  ;;  %v3095_v22 = vld [vmem:[%s3875_s4] sm:$0xff]  ;;  %s2929_s29 = smov 32   ;;  %vm663_vm5 = vcmask 261120  }
  0x33   : > { %v3132_v31 = vld [vmem:[%s3873_s2] sm:$0x3]  ;;  %v523_v59 = vld [vmem:[%s3872_s1 + $0x10] sm:$0xff]  ;;  %v3154_v61 = vld [vmem:[%s3874_s3 + $0x18] sm:$0xff]  ;;  %s2646_s21 = sld [smem:[#allocation7 + $0x4]]  ;;  %s2930_s27 = smov 1  }
  0x34   : > { %2669 = vmatpush.msra.mxu3 %v522_v17  ;;  %s3887_s30 = smov (!%p504_p11, %s2553_s30), 15  ;;  %612 = vmatpush.msra.mxu1 %v522_v17  ;;  %v3135_v32 = vperm.slane %v3132_v31, 1  ;;  %v521_v60 = vld [vmem:[%s3872_s1] sm:$0xff]  ;;  %v3161_v62 = vld [vmem:[%s3874_s3 + $0x10] sm:$0xff]  ;;  %v3169_v0 = vld [vmem:[%s3874_s3 + $0x8] sm:$0xff]  ;;  %s2647_s22 = sld [smem:[#allocation7 + $0x5]] }
  0x35   : > { %s2554_s20 = sshll.u32 %s3887_s30, 3  ;;  %s2928_s30 = smov 64   ;;  %2666 = vmatpush.msra.mxu2 %v523_v59  ;;  %570 = vmatpush.msra.mxu0 %v523_v59  ;;  %v3176_v1 = vld [vmem:[%s3874_s3] sm:$0xff] }
  0x36   : > { %739 = vmatpush.msrb.mxu3 %v3068_v18  ;;  %s3079_s23 = scalar_lea.vmem %s3871_s0, %s2554_s20  ;;  %s2634_s20 = sld [smem:[#allocation7 + $0x8]] }
  0x37   : > { %v3088_v21 = vld [vmem:[%s3079_s23 + $0x20] sm:$0xff]  ;;  %v3101_v23 = vld [vmem:[%s3079_s23 + $0x28] sm:$0xff]  ;;  %v3109_v24 = vld [vmem:[%s3079_s23 + $0x30] sm:$0xff]  ;;  %2667 = vmatpush.msra.mxu2 %v521_v60  ;;  %571 = vmatpush.msra.mxu0 %v521_v60  ;;  %s2648_s11 = sld [smem:[#allocation7 + $0x6]]  ;;  %p509_p12 = scmp.lt.s32.totalorder %s3000_s12, 1 }
  0x38   : > { %740 = vmatpush.msrb.mxu3 %v3073_v19  ;;  %v3114_v25 = vld [vmem:[%s3079_s23 + $0x38] sm:$0xff]  ;;  %2560 = vmatmul.msk.f32.vlgmr.msra.gmra.mxu2 %vm531_vm0, %v3088_v21  ;;  %v513_v63 = vld [vmem:[%s3079_s23] sm:$0xff]  ;;  %s3464_s17 = sld [smem:[#allocation7]] }
  0x39   : > { %2568 = vmatmul.msk.f32.vlgmr.msra.gmra.mxu3 %vm531_vm0, %v3088_v21  ;;  %679 = vmatpush.msrb.mxu2 %v3154_v61  ;;  %s3466_s26 = sld [smem:[#allocation7 + $0x1]]  ;;  %s3889_s12 = smov (!%p509_p12, %s3000_s12), 1 }
  0x3a   : > { %741 = vmatpush.msrb.mxu3 %v3085_v20  ;;  %2556 = vmatmul.msk.f32.vlgmr.msra.gmra.mxu0 %vm531_vm0, %v513_v63 }
  0x3b   : > { %2564 = vmatmul.msk.f32.vlgmr.msra.gmra.mxu1 %vm531_vm0, %v513_v63  ;;  %680 = vmatpush.msrb.mxu2 %v3161_v62 }
  0x3c   : > { %742 = vmatpush.msrb.mxu3 %v3095_v22 }
  0x3d   : > { %681 = vmatpush.msrb.mxu2 %v3169_v0 }
  0x3e   : > { %873 = vmatpush.msra.mxu3 %v3068_v18 }
  0x3f   : > { %682 = vmatpush.msrb.mxu2 %v3176_v1 }
  0x40   : > { %874 = vmatpush.msra.mxu3 %v3073_v19  ;;  %2561 = vmatmul.msk.f32.gmra.mxu2 %vm531_vm0, %v3101_v23 }
  0x41   : > { %2569 = vmatmul.msk.f32.gmra.mxu3 %vm531_vm0, %v3101_v23  ;;  %811 = vmatpush.msra.mxu2 %v3154_v61 }
  0x42   : > { %875 = vmatpush.msra.mxu3 %v3085_v20 }
  0x43   : > { %812 = vmatpush.msra.mxu2 %v3161_v62 }
  0x44   : > { %876 = vmatpush.msra.mxu3 %v3095_v22 }
  0x45   : > { %813 = vmatpush.msra.mxu2 %v3169_v0 }
  0x47   : > { %814 = vmatpush.msra.mxu2 %v3176_v1 }
  0x48   : > { %2562 = vmatmul.msk.f32.gmra.mxu2 %vm531_vm0, %v3109_v24 }
  0x49   : > { %2570 = vmatmul.msk.f32.gmra.mxu3 %vm531_vm0, %v3109_v24 }
  0x50   : > { %2563 = vmatmul.msk.f32.gmra.mxu2 %vm531_vm0, %v3114_v25 }
  0x51   : > { %2571 = vmatmul.msk.f32.gmra.mxu3 %vm531_vm0, %v3114_v25 }
  0x58   : > { %683 = vmatmul.f32.vlgmr.msrb.gmra.mxu2 %v2927_v26 }
  0x59   : > { %743 = vmatmul.f32.vlgmr.msrb.gmra.mxu3 %v2927_v26  ;;  %945 = vmatpush.msrb.mxu2 %v3154_v61 }
  0x5a   : > { %1007 = vmatpush.msrb.mxu3 %v3068_v18 }
  0x5b   : > { %946 = vmatpush.msrb.mxu2 %v3161_v62 }
  0x5c   : > { %1008 = vmatpush.msrb.mxu3 %v3073_v19 }
  0x5d   : > { %947 = vmatpush.msrb.mxu2 %v3169_v0 }
  0x5e   : > { %1009 = vmatpush.msrb.mxu3 %v3085_v20 }
  0x5f   : > { %948 = vmatpush.msrb.mxu2 %v3176_v1 }
  0x60   : > { %1010 = vmatpush.msrb.mxu3 %v3095_v22 }
  0xbb   : > { %v3203_v25 = vpop.f32.mrf.mxu2 }
  0xbc   : > { %v3123_v27 = vpop.f32.mrf.mxu3 }
  0xc3   : > { %v3206_v26 = vpop.f32.mrf.mxu2 }
  0xc4   : > { %v3125_v28 = vpop.f32.mrf.mxu3 }
  0xcc   : > { %v3127_v29 = vpop.f32.mrf.mxu3 }
  0xcd   : > { %v633_v3 = vadd.f32 %v3127_v29, %v3135_v32  ;;  %v3208_v29 = vpop.f32.mrf.mxu2 }
  0xd4   : > { %v635_v30 = vpop.f32.mrf.mxu3 }
  0xd5   : > { %v636_v33 = vadd.f32 %v635_v30, %v3135_v32  ;;  %v3210_v30 = vpop.f32.mrf.mxu2 }
  0xdc   : > { %v744_v34 = vpop.f32.mrf.mxu3 }
  0xdd   : > { %v747_v35 = vadd.f32 %v744_v34, %v636_v33  ;;  %v3213_v33 = vperm.slane %v3132_v31, 0  ;;  %v573_v34 = vpop.f32.mrf.mxu0 }
  0xdf   : > { %v2574_v36 = vmul.f32 -1.442695, %v747_v35  ;;  %v574_v35 = vadd.f32 %v573_v34, %v3213_v33 }
  0xe1   : > { %2723 = vpow2.f32 %v2574_v36  ;;  %v684_v36 = vpop.f32.mrf.mxu2 }
  0xe7   : > { %v2724_v37 = vpop.eup %2723 }
  0xe8   : > { %v751_v38 = vadd.f32 1.0, %v2724_v37  ;;  %v687_v37 = vadd.f32 %v684_v36, %v574_v35 }
  0xea   : > { %2725 = vrcp.f32 %v751_v38  ;;  %v763_v42 = vand.u32 2147483648, %v751_v38  ;;  %v761_v44 = vand.u32 2147483647, %v751_v38  ;;  %vm757_vm2 = vweird.f32 %v751_v38 }
  0xec   : > { %v764_v46 = vor.u32 1.1754944e-38, %v763_v42  ;;  %vm762_vm4 = vcmp.eq.f32.partialorder %v761_v44, 8.507059e+37 }
  0xf0   : > { %v2726_v39 = vpop.eup %2725 }
  0xf1   : > { %v753_v40 = vmul.f32 %v2726_v39, %v751_v38  ;;  %vm758_vm1 = vweird.f32 %v2726_v39  ;;  %v2572_v38 = vmul.f32 -1.442695, %v687_v37 }
  0xf2   : > { %vm759_vm3 = vmor %vm757_vm2, %vm758_vm1 }
  0xf3   : > { %v754_v41 = vsub.f32 1.0, %v753_v40 }
  0xf5   : > { %v755_v43 = vmul.f32 %v2726_v39, %v754_v41 }
  0xf7   : > { %v756_v45 = vadd.f32 %v2726_v39, %v755_v43 }
  0xf9   : > { %v760_v47 = vsel %vm759_vm3, %v2726_v39, %v756_v45 }
  0xfa   : > { %v765_v48 = vsel %vm762_vm4, %v764_v46, %v760_v47 }
  0xfb   : > { %v767_v49 = vmul.f32 2.0, %v765_v48  ;;  %v769_v53 = vmul.f32 0.0, %v765_v48 }
  0xfd   : > { %v2575_v50 = vadd.f32 -1.0, %v767_v49 }
  0xff   : > { %771 = vrot.lane.b32.xlu0 %v2575_v50, %s2928_s30 }
 0x171   : > { %v772_v51 = vpop.permute.xlu0 %771 }
 0x172   : > { %v774_v52 = vmul.f32 %v772_v51, %v765_v48 }
 0x174   : > { %776 = vrot.lane.b32.xlu0 %v774_v52, %s2929_s29 }
 0x1e6   : > { %v777_v54 = vpop.permute.xlu0 %776 }
 0x1e7   : > { %v3140_v55 = vadd.f32 %v777_v54, %v769_v53 }
 0x1e9   : > { %2727 = vtanh.f32 %v3140_v55 }
 0x1ef   : > { %v2728_v56 = vpop.eup %2727 }
 0x1f0   : > { %782 = vrot.lane.b32.xlu1 %v2728_v56, %s2928_s30 }
 0x262   : > { %v783_v57 = vpop.permute.xlu1 %782 }
 0x263   : > { %v785_v58 = vmul.f32 %v783_v57, %v765_v48 }
 0x265   : > { %792 = vrot.lane.b32.xlu1 %v785_v58, %s2929_s29 }
 0x2d7   : > { %v793_v2 = vpop.permute.xlu1 %792 }
 0x2d8   : > { %795 = vst.msk [vmem:[#allocation4 + $0x38] sm:$0xff] %vm663_vm5, %v793_v2  ;;  %2579 = vmatmul.msk.f32.vlgmr.msra.gmra.mxu3 %vm663_vm5, %v793_v2 }
 0x2d9   : > { %1141 = vmatpush.msra.mxu3 %v3068_v18 }
 0x2db   : > { %1142 = vmatpush.msra.mxu3 %v3073_v19 }
 0x2dd   : > { %1143 = vmatpush.msra.mxu3 %v3085_v20 }
 0x2df   : > { %1144 = vmatpush.msra.mxu3 %v3095_v22 }
 0x35b   : > { %v878_v4 = vpop.f32.mrf.mxu3 }
 0x35c   : > { %v881_v5 = vadd.f32 %v878_v4, %v633_v3 }
 0x35e   : > { %v2580_v6 = vmul.f32 -1.442695, %v881_v5 }
 0x360   : > { %2729 = vpow2.f32 %v2580_v6  ;;  %v514_v6 = vld [vmem:[%s3079_s23 + $0x8] sm:$0xff] }
 0x361   : > { %2565 = vmatmul.msk.f32.gmra.mxu1 %vm531_vm0, %v514_v6  ;;  %2557 = vmatmul.msk.f32.gmra.mxu0 %vm531_vm0, %v514_v6 }
 0x366   : > { %v2730_v7 = vpop.eup %2729 }
 0x367   : > { %v885_v8 = vadd.f32 1.0, %v2730_v7  ;;  %v515_v7 = vld [vmem:[%s3079_s23 + $0x10] sm:$0xff] }
 0x369   : > { %2731 = vrcp.f32 %v885_v8  ;;  %v897_v12 = vand.u32 2147483648, %v885_v8  ;;  %v895_v14 = vand.u32 2147483647, %v885_v8  ;;  %vm891_vm7 = vweird.f32 %v885_v8  ;;  %2566 = vmatmul.msk.f32.gmra.mxu1 %vm531_vm0, %v515_v7  ;;  %2558 = vmatmul.msk.f32.gmra.mxu0 %vm531_vm0, %v515_v7 }
 0x36a   : > { %2733 = vpow2.f32 %v2572_v38 }
 0x36b   : > { %v898_v16 = vor.u32 1.1754944e-38, %v897_v12  ;;  %vm896_vm9 = vcmp.eq.f32.partialorder %v895_v14, 8.507059e+37  ;;  %v1737_v12 = vld [vmem:[%s3876_s5 + $0x18] sm:$0xff]  ;;  %v1735_v14 = vld [vmem:[%s3876_s5 + $0x8] sm:$0xff] }
 0x36c   : > { %1859 = vmatpush.msrb.mxu1 %v1737_v12 }
 0x36f   : > { %v2732_v9 = vpop.eup %2731 }
 0x370   : > { %v887_v10 = vmul.f32 %v2732_v9, %v885_v8  ;;  %vm892_vm6 = vweird.f32 %v2732_v9  ;;  %v2734_v39 = vpop.eup %2733 }
 0x371   : > { %vm893_vm8 = vmor %vm891_vm7, %vm892_vm6  ;;  %v691_v40 = vadd.f32 1.0, %v2734_v39 }
 0x372   : > { %v888_v11 = vsub.f32 1.0, %v887_v10 }
 0x373   : > { %2735 = vrcp.f32 %v691_v40  ;;  %vm697_vm10 = vweird.f32 %v691_v40  ;;  %v703_v45 = vand.u32 2147483648, %v691_v40  ;;  %v701_v31 = vand.u32 2147483647, %v691_v40 }
 0x374   : > { %v889_v13 = vmul.f32 %v2732_v9, %v888_v11  ;;  %v516_v11 = vld [vmem:[%s3079_s23 + $0x18] sm:$0xff]  ;;  %s2649_s23 = sld [smem:[#allocation7 + $0x7]] }
 0x375   : > { %v704_v47 = vor.u32 1.1754944e-38, %v703_v45  ;;  %vm702_vm13 = vcmp.eq.f32.partialorder %v701_v31, 8.507059e+37  ;;  %2567 = vmatmul.msk.f32.gmra.mxu1 %vm531_vm0, %v516_v11  ;;  %2559 = vmatmul.msk.f32.gmra.mxu0 %vm531_vm0, %v516_v11 }
 0x376   : > { %v890_v15 = vadd.f32 %v2732_v9, %v889_v13  ;;  %v1736_v13 = vld [vmem:[%s3876_s5 + $0x10] sm:$0xff] }
 0x377   : > { %1860 = vmatpush.msrb.mxu1 %v1736_v13 }
 0x378   : > { %v894_v17 = vsel %vm893_vm8, %v2732_v9, %v890_v15  ;;  %v1734_v15 = vld [vmem:[%s3876_s5] sm:$0xff] }
 0x379   : > { %v899_v21 = vsel %vm896_vm9, %v898_v16, %v894_v17  ;;  %v2736_v41 = vpop.eup %2735  ;;  %1861 = vmatpush.msrb.mxu1 %v1735_v14 }
 0x37a   : > { %v901_v23 = vmul.f32 2.0, %v899_v21  ;;  %v693_v42 = vmul.f32 %v2736_v41, %v691_v40  ;;  %vm698_vm11 = vweird.f32 %v2736_v41  ;;  %v903_v54 = vmul.f32 %v899_v21, %v3140_v55 }
 0x37b   : > { %vm699_vm12 = vmor %vm697_vm10, %vm698_vm11  ;;  %1862 = vmatpush.msrb.mxu1 %v1734_v15 }
 0x37c   : > { %v2581_v24 = vadd.f32 -1.0, %v901_v23  ;;  %v694_v43 = vsub.f32 1.0, %v693_v42 }
 0x37e   : > { %905 = vrot.lane.b32.xlu2 %v2581_v24, %s2928_s30  ;;  %v695_v44 = vmul.f32 %v2736_v41, %v694_v43 }
 0x380   : > { %v696_v46 = vadd.f32 %v2736_v41, %v695_v44 }
 0x382   : > { %v700_v48 = vsel %vm699_vm12, %v2736_v41, %v696_v46 }
 0x383   : > { %v705_v50 = vsel %vm702_vm13, %v704_v47, %v700_v48 }
 0x384   : > { %v707_v52 = vmul.f32 2.0, %v705_v50  ;;  %v709_v3 = vmul.f32 0.0, %v705_v50 }
 0x386   : > { %v2573_v53 = vadd.f32 -1.0, %v707_v52 }
 0x3d8   : > { %v906_v49 = vpop.permute.xlu2 %905 }
 0x3d9   : > { %v908_v51 = vmul.f32 %v906_v49, %v899_v21 }
 0x3db   : > { %910 = vrot.lane.b32.xlu2 %v908_v51, %s2929_s29 }
 0x3de   : > { %v576_v47 = vpop.f32.mrf.mxu0 }
 0x3df   : > { %v577_v48 = vadd.f32 %v576_v47, %v3213_v33 }
 0x3e3   : > { %711 = vrot.lane.b32.xlu2 %v2573_v53, %s2928_s30 }
 0x435   : > { %v911_v56 = vpop.permute.xlu2 %910 }
 0x436   : > { %v3219_v57 = vadd.f32 %v911_v56, %v903_v54 }
 0x438   : > { %2737 = vtanh.f32 %v3219_v57 }
 0x43d   : > { %v712_v59 = vpop.permute.xlu2 %711 }
 0x43e   : > { %v2738_v58 = vpop.eup %2737  ;;  %v714_v60 = vmul.f32 %v712_v59, %v705_v50 }
 0x43f   : > { %916 = vrot.lane.b32.xlu0 %v2738_v58, %s2928_s30 }
 0x447   : > { %716 = vrot.lane.b32.xlu0 %v714_v60, %s2929_s29 }
 0x4b1   : > { %v917_v63 = vpop.permute.xlu0 %916 }
 0x4b2   : > { %v919_v2 = vmul.f32 %v917_v63, %v899_v21  ;;  %v630_v21 = vadd.f32 %v3125_v28, %v3135_v32 }
 0x4b4   : > { %926 = vrot.lane.b32.xlu1 %v919_v2, %s2929_s29 }
 0x4b9   : > { %v717_v55 = vpop.permute.xlu0 %716 }
 0x4ba   : > { %v3225_v4 = vadd.f32 %v717_v55, %v709_v3 }
 0x4bc   : > { %2739 = vtanh.f32 %v3225_v4 }
 0x4c2   : > { %v2740_v5 = vpop.eup %2739 }
 0x4c3   : > { %722 = vrot.lane.b32.xlu1 %v2740_v5, %s2928_s30 }
 0x526   : > { %v927_v8 = vpop.permute.xlu1 %926 }
 0x527   : > { %929 = vst.msk [vmem:[#allocation4 + $0x30] sm:$0xff] %vm663_vm5, %v927_v8  ;;  %2585 = vmatmul.msk.f32.vlgmr.msrb.gmra.mxu3 %vm663_vm5, %v927_v8 }
 0x528   : > { %1275 = vmatpush.msrb.mxu3 %v3068_v18 }
 0x52a   : > { %1276 = vmatpush.msrb.mxu3 %v3073_v19 }
 0x52c   : > { %1277 = vmatpush.msrb.mxu3 %v3085_v20 }
 0x52e   : > { %1278 = vmatpush.msrb.mxu3 %v3095_v22 }
 0x535   : > { %v723_v9 = vpop.permute.xlu1 %722 }
 0x536   : > { %v725_v10 = vmul.f32 %v723_v9, %v705_v50 }
 0x538   : > { %787 = vrot.lane.b32.xlu2 %v725_v10, %s2929_s29 }
 0x592   : > { %v788_v16 = vpop.permute.xlu2 %787 }
 0x593   : > { %790 = vst.msk [vmem:[#allocation3] sm:$0xff] %vm663_vm5, %v788_v16  ;;  %2576 = vmatmul.msk.f32.vlgmr.msra.gmra.mxu2 %vm663_vm5, %v788_v16 }
 0x594   : > { %1079 = vmatpush.msra.mxu2 %v3154_v61 }
 0x596   : > { %1080 = vmatpush.msra.mxu2 %v3161_v62 }
 0x598   : > { %1081 = vmatpush.msra.mxu2 %v3169_v0 }
 0x59a   : > { %v1742_v17 = vld [vmem:[#allocation3] sm:$0xff]  ;;  %1082 = vmatpush.msra.mxu2 %v3176_v1 }
 0x59b   : > { %2626 = vmatmul.msk.f32.vlgmr.msrb.gmra.mxu1 %vm663_vm5, %v1742_v17 }
 0x5aa   : > { %v1012_v23 = vpop.f32.mrf.mxu3 }
 0x5ab   : > { %v1015_v24 = vadd.f32 %v1012_v23, %v630_v21 }
 0x5ad   : > { %v2586_v34 = vmul.f32 -1.442695, %v1015_v24 }
 0x5af   : > { %2741 = vpow2.f32 %v2586_v34 }
 0x5b5   : > { %v2742_v35 = vpop.eup %2741 }
 0x5b6   : > { %v1019_v36 = vadd.f32 1.0, %v2742_v35 }
 0x5b8   : > { %2743 = vrcp.f32 %v1019_v36  ;;  %v1031_v40 = vand.u32 2147483648, %v1019_v36  ;;  %v1029_v42 = vand.u32 2147483647, %v1019_v36  ;;  %vm1025_vm15 = vweird.f32 %v1019_v36 }
 0x5ba   : > { %v1032_v44 = vor.u32 1.1754944e-38, %v1031_v40  ;;  %vm1030_vm1 = vcmp.eq.f32.partialorder %v1029_v42, 8.507059e+37 }
 0x5be   : > { %v2744_v37 = vpop.eup %2743 }
 0x5bf   : > { %v1021_v38 = vmul.f32 %v2744_v37, %v1019_v36  ;;  %vm1026_vm14 = vweird.f32 %v2744_v37  ;;  %v627_v36 = vadd.f32 %v3123_v27, %v3135_v32 }
 0x5c0   : > { %vm1027_vm0 = vmor %vm1025_vm15, %vm1026_vm14 }
 0x5c1   : > { %v1022_v39 = vsub.f32 1.0, %v1021_v38 }
 0x5c3   : > { %v1023_v41 = vmul.f32 %v2744_v37, %v1022_v39 }
 0x5c5   : > { %v1024_v43 = vadd.f32 %v2744_v37, %v1023_v41 }
 0x5c7   : > { %v1028_v45 = vsel %vm1027_vm0, %v2744_v37, %v1024_v43 }
 0x5c8   : > { %v1033_v28 = vsel %vm1030_vm1, %v1032_v44, %v1028_v45 }
 0x5c9   : > { %v1035_v46 = vmul.f32 2.0, %v1033_v28  ;;  %v1037_v10 = vmul.f32 %v1033_v28, %v3219_v57 }
 0x5cb   : > { %v2587_v31 = vadd.f32 -1.0, %v1035_v46 }
 0x5cd   : > { %1039 = vrot.lane.b32.xlu0 %v2587_v31, %s2928_s30 }
 0x616   : > { %v816_v49 = vpop.f32.mrf.mxu2 }
 0x617   : > { %v819_v50 = vadd.f32 %v816_v49, %v577_v48 }
 0x619   : > { %v2577_v51 = vmul.f32 -1.442695, %v819_v50 }
 0x61b   : > { %2745 = vpow2.f32 %v2577_v51 }
 0x621   : > { %v2746_v52 = vpop.eup %2745 }
 0x622   : > { %v823_v53 = vadd.f32 1.0, %v2746_v52 }
 0x624   : > { %2747 = vrcp.f32 %v823_v53  ;;  %v835_v63 = vand.u32 2147483648, %v823_v53  ;;  %vm829_vm3 = vweird.f32 %v823_v53  ;;  %v833_v2 = vand.u32 2147483647, %v823_v53 }
 0x626   : > { %v836_v5 = vor.u32 1.1754944e-38, %v835_v63  ;;  %vm834_vm6 = vcmp.eq.f32.partialorder %v833_v2, 8.507059e+37 }
 0x62a   : > { %v2748_v54 = vpop.eup %2747 }
 0x62b   : > { %v825_v56 = vmul.f32 %v2748_v54, %v823_v53  ;;  %vm830_vm2 = vweird.f32 %v2748_v54 }
 0x62c   : > { %vm831_vm4 = vmor %vm829_vm3, %vm830_vm2 }
 0x62d   : > { %v826_v58 = vsub.f32 1.0, %v825_v56  ;;  %v579_v56 = vpop.f32.mrf.mxu0 }
 0x62f   : > { %v827_v59 = vmul.f32 %v2748_v54, %v826_v58  ;;  %v580_v58 = vadd.f32 %v579_v56, %v3213_v33 }
 0x631   : > { %v828_v60 = vadd.f32 %v2748_v54, %v827_v59 }
 0x633   : > { %v832_v3 = vsel %vm831_vm4, %v2748_v54, %v828_v60 }
 0x634   : > { %v837_v7 = vsel %vm834_vm6, %v836_v5, %v832_v3 }
 0x635   : > { %v839_v8 = vmul.f32 2.0, %v837_v7  ;;  %v841_v21 = vmul.f32 %v837_v7, %v3225_v4 }
 0x637   : > { %v2578_v9 = vadd.f32 -1.0, %v839_v8 }
 0x63f   : > { %v1040_v55 = vpop.permute.xlu0 %1039 }
 0x640   : > { %v1042_v6 = vmul.f32 %v1040_v55, %v1033_v28 }
 0x642   : > { %1044 = vrot.lane.b32.xlu1 %v1042_v6, %s2929_s29 }
 0x64a   : > { %843 = vrot.lane.b32.xlu1 %v2578_v9, %s2928_s30 }
 0x6b4   : > { %v1045_v11 = vpop.permute.xlu1 %1044 }
 0x6b5   : > { %v3271_v12 = vadd.f32 %v1045_v11, %v1037_v10 }
 0x6b7   : > { %2749 = vtanh.f32 %v3271_v12 }
 0x6bc   : > { %v844_v14 = vpop.permute.xlu1 %843 }
 0x6bd   : > { %v2750_v13 = vpop.eup %2749  ;;  %v846_v15 = vmul.f32 %v844_v14, %v837_v7 }
 0x6be   : > { %1050 = vrot.lane.b32.xlu2 %v2750_v13, %s2928_s30 }
 0x6c6   : > { %848 = vrot.lane.b32.xlu2 %v846_v15, %s2929_s29 }
 0x718   : > { %v1051_v16 = vpop.permute.xlu2 %1050 }
 0x719   : > { %v1053_v17 = vmul.f32 %v1051_v16, %v1033_v28 }
 0x71b   : > { %1060 = vrot.lane.b32.xlu0 %v1053_v17, %s2929_s29 }
 0x720   : > { %v849_v23 = vpop.permute.xlu2 %848 }
 0x721   : > { %v3278_v57 = vadd.f32 %v849_v23, %v841_v21 }
 0x723   : > { %2751 = vtanh.f32 %v3278_v57 }
 0x729   : > { %v2752_v24 = vpop.eup %2751 }
 0x72a   : > { %854 = vrot.lane.b32.xlu0 %v2752_v24, %s2928_s30 }
 0x78d   : > { %v1061_v34 = vpop.permute.xlu0 %1060 }
 0x78e   : > { %1063 = vst.msk [vmem:[#allocation4 + $0x28] sm:$0xff] %vm663_vm5, %v1061_v34  ;;  %2591 = vmatmul.msk.f32.vlgmr.msra.gmra.mxu3 %vm663_vm5, %v1061_v34 }
 0x78f   : > { %1409 = vmatpush.msra.mxu3 %v3068_v18 }
 0x791   : > { %1410 = vmatpush.msra.mxu3 %v3073_v19 }
 0x793   : > { %1411 = vmatpush.msra.mxu3 %v3085_v20 }
 0x795   : > { %1412 = vmatpush.msra.mxu3 %v3095_v22 }
 0x79c   : > { %v855_v4 = vpop.permute.xlu0 %854 }
 0x79d   : > { %v857_v35 = vmul.f32 %v855_v4, %v837_v7 }
 0x79f   : > { %921 = vrot.lane.b32.xlu1 %v857_v35, %s2929_s29 }
 0x811   : > { %v1146_v37 = vpop.f32.mrf.mxu3  ;;  %v922_v38 = vpop.permute.xlu1 %921 }
 0x812   : > { %v1149_v39 = vadd.f32 %v1146_v37, %v627_v36  ;;  %924 = vst.msk [vmem:[#allocation3 + $0x8] sm:$0xff] %vm663_vm5, %v922_v38  ;;  %2582 = vmatmul.msk.f32.vlgmr.msrb.gmra.mxu2 %vm663_vm5, %v922_v38 }
 0x813   : > { %1213 = vmatpush.msrb.mxu2 %v3154_v61 }
 0x814   : > { %v2592_v40 = vmul.f32 -1.442695, %v1149_v39 }
 0x815   : > { %1214 = vmatpush.msrb.mxu2 %v3161_v62 }
 0x816   : > { %2753 = vpow2.f32 %v2592_v40 }
 0x817   : > { %1215 = vmatpush.msrb.mxu2 %v3169_v0 }
 0x819   : > { %v1743_v41 = vld [vmem:[#allocation3 + $0x8] sm:$0xff]  ;;  %1216 = vmatpush.msrb.mxu2 %v3176_v1 }
 0x81a   : > { %2627 = vmatmul.msk.f32.gmra.mxu1 %vm663_vm5, %v1743_v41 }
 0x81c   : > { %v2754_v27 = vpop.eup %2753 }
 0x81d   : > { %v1153_v42 = vadd.f32 1.0, %v2754_v27  ;;  %v3321_v27 = vpop.f32.mrf.mxu1 }
 0x81f   : > { %2755 = vrcp.f32 %v1153_v42  ;;  %v1165_v28 = vand.u32 2147483648, %v1153_v42  ;;  %v1163_v31 = vand.u32 2147483647, %v1153_v42  ;;  %vm1159_vm8 = vweird.f32 %v1153_v42 }
 0x821   : > { %v1166_v48 = vor.u32 1.1754944e-38, %v1165_v28  ;;  %vm1164_vm10 = vcmp.eq.f32.partialorder %v1163_v31, 8.507059e+37 }
 0x825   : > { %v2756_v43 = vpop.eup %2755 }
 0x826   : > { %v1155_v44 = vmul.f32 %v2756_v43, %v1153_v42  ;;  %vm1160_vm7 = vweird.f32 %v2756_v43  ;;  %v3323_v42 = vpop.f32.mrf.mxu1 }
 0x827   : > { %vm1161_vm9 = vmor %vm1159_vm8, %vm1160_vm7 }
 0x828   : > { %v1156_v45 = vsub.f32 1.0, %v1155_v44 }
 0x82a   : > { %v1157_v46 = vmul.f32 %v2756_v43, %v1156_v45 }
 0x82c   : > { %v1158_v47 = vadd.f32 %v2756_v43, %v1157_v46 }
 0x82e   : > { %v1162_v49 = vsel %vm1161_vm9, %v2756_v43, %v1158_v47  ;;  %v3325_v43 = vpop.f32.mrf.mxu1 }
 0x82f   : > { %v1167_v50 = vsel %vm1164_vm10, %v1166_v48, %v1162_v49 }
 0x830   : > { %v1169_v51 = vmul.f32 2.0, %v1167_v50  ;;  %v1171_v17 = vmul.f32 %v1167_v50, %v3271_v12 }
 0x832   : > { %v2593_v52 = vadd.f32 -1.0, %v1169_v51 }
 0x834   : > { %1173 = vrot.lane.b32.xlu2 %v2593_v52, %s2928_s30 }
 0x836   : > { %v623_v44 = vpop.f32.mrf.mxu1 }
 0x837   : > { %v624_v45 = vadd.f32 %v623_v44, %v3135_v32 }
 0x88e   : > { %v1174_v53 = vpop.permute.xlu2 %1173 }
 0x88f   : > { %v1176_v54 = vmul.f32 %v1174_v53, %v1167_v50 }
 0x891   : > { %1178 = vrot.lane.b32.xlu0 %v1176_v54, %s2929_s29 }
 0x895   : > { %v950_v59 = vpop.f32.mrf.mxu2 }
 0x896   : > { %v953_v60 = vadd.f32 %v950_v59, %v580_v58 }
 0x898   : > { %v2583_v63 = vmul.f32 -1.442695, %v953_v60 }
 0x89a   : > { %2757 = vpow2.f32 %v2583_v63 }
 0x8a0   : > { %v2758_v2 = vpop.eup %2757 }
 0x8a1   : > { %v957_v3 = vadd.f32 1.0, %v2758_v2 }
 0x8a3   : > { %2759 = vrcp.f32 %v957_v3  ;;  %v969_v7 = vand.u32 2147483648, %v957_v3  ;;  %v967_v9 = vand.u32 2147483647, %v957_v3  ;;  %vm963_vm12 = vweird.f32 %v957_v3 }
 0x8a5   : > { %v970_v11 = vor.u32 1.1754944e-38, %v969_v7  ;;  %vm968_vm14 = vcmp.eq.f32.partialorder %v967_v9, 8.507059e+37  ;;  %v582_v7 = vpop.f32.mrf.mxu0 }
 0x8a9   : > { %v2760_v55 = vpop.eup %2759 }
 0x8aa   : > { %v959_v5 = vmul.f32 %v2760_v55, %v957_v3  ;;  %vm964_vm11 = vweird.f32 %v2760_v55 }
 0x8ab   : > { %vm965_vm13 = vmor %vm963_vm12, %vm964_vm11 }
 0x8ac   : > { %v960_v6 = vsub.f32 1.0, %v959_v5 }
 0x8ae   : > { %v961_v8 = vmul.f32 %v2760_v55, %v960_v6 }
 0x8b0   : > { %v962_v10 = vadd.f32 %v2760_v55, %v961_v8  ;;  %v583_v8 = vadd.f32 %v582_v7, %v3213_v33 }
 0x8b2   : > { %v966_v13 = vsel %vm965_vm13, %v2760_v55, %v962_v10 }
 0x8b3   : > { %v971_v14 = vsel %vm968_vm14, %v970_v11, %v966_v13 }
 0x8b4   : > { %v973_v15 = vmul.f32 2.0, %v971_v14  ;;  %v975_v37 = vmul.f32 %v971_v14, %v3278_v57 }
 0x8b6   : > { %v2584_v16 = vadd.f32 -1.0, %v973_v15 }
 0x8b8   : > { %977 = vrot.lane.b32.xlu0 %v2584_v16, %s2928_s30 }
 0x903   : > { %v1179_v21 = vpop.permute.xlu0 %1178 }
 0x904   : > { %v3303_v23 = vadd.f32 %v1179_v21, %v1171_v17 }
 0x906   : > { %2761 = vtanh.f32 %v3303_v23 }
 0x90c   : > { %v2762_v24 = vpop.eup %2761 }
 0x90d   : > { %1184 = vrot.lane.b32.xlu1 %v2762_v24, %s2928_s30 }
 0x92a   : > { %v978_v34 = vpop.permute.xlu0 %977 }
 0x92b   : > { %v980_v4 = vmul.f32 %v978_v34, %v971_v14 }
 0x92d   : > { %982 = vrot.lane.b32.xlu1 %v980_v4, %s2929_s29 }
 0x97f   : > { %v1185_v35 = vpop.permute.xlu1 %1184 }
 0x980   : > { %v1187_v36 = vmul.f32 %v1185_v35, %v1167_v50 }
 0x982   : > { %1194 = vrot.lane.b32.xlu2 %v1187_v36, %s2929_s29 }
 0x99f   : > { %v983_v38 = vpop.permute.xlu1 %982 }
 0x9a0   : > { %v3310_v12 = vadd.f32 %v983_v38, %v975_v37 }
 0x9a2   : > { %2763 = vtanh.f32 %v3310_v12 }
 0x9a8   : > { %v2764_v39 = vpop.eup %2763 }
 0x9a9   : > { %988 = vrot.lane.b32.xlu2 %v2764_v39, %s2928_s30 }
 0x9dc   : > { %v1195_v40 = vpop.permute.xlu2 %1194 }
 0x9dd   : > { %1197 = vst.msk [vmem:[#allocation4 + $0x20] sm:$0xff] %vm663_vm5, %v1195_v40  ;;  %2597 = vmatmul.msk.f32.vlgmr.msrb.gmra.mxu3 %vm663_vm5, %v1195_v40 }
 0x9de   : > { %1543 = vmatpush.msrb.mxu3 %v3068_v18 }
 0x9e0   : > { %1544 = vmatpush.msrb.mxu3 %v3073_v19 }
 0x9e2   : > { %1545 = vmatpush.msrb.mxu3 %v3085_v20 }
 0x9e4   : > { %1546 = vmatpush.msrb.mxu3 %v3095_v22 }
 0xa03   : > { %v989_v57 = vpop.permute.xlu2 %988 }
 0xa04   : > { %v991_v41 = vmul.f32 %v989_v57, %v971_v14 }
 0xa06   : > { %1055 = vrot.lane.b32.xlu0 %v991_v41, %s2929_s29 }
 0xa60   : > { %v1280_v28 = vpop.f32.mrf.mxu3 }
 0xa61   : > { %v1283_v46 = vadd.f32 %v1280_v28, %v624_v45 }
 0xa63   : > { %v2598_v31 = vmul.f32 -1.442695, %v1283_v46 }
 0xa65   : > { %2765 = vpow2.f32 %v2598_v31 }
 0xa6b   : > { %v2766_v47 = vpop.eup %2765 }
 0xa6c   : > { %v1287_v48 = vadd.f32 1.0, %v2766_v47 }
 0xa6e   : > { %2767 = vrcp.f32 %v1287_v48  ;;  %v1299_v53 = vand.u32 2147483648, %v1287_v48  ;;  %v1297_v56 = vand.u32 2147483647, %v1287_v48  ;;  %vm1293_vm0 = vweird.f32 %v1287_v48 }
 0xa70   : > { %v1300_v59 = vor.u32 1.1754944e-38, %v1299_v53  ;;  %vm1298_vm2 = vcmp.eq.f32.partialorder %v1297_v56, 8.507059e+37 }
 0xa74   : > { %v2768_v49 = vpop.eup %2767 }
 0xa75   : > { %v1289_v50 = vmul.f32 %v2768_v49, %v1287_v48  ;;  %vm1294_vm15 = vweird.f32 %v2768_v49 }
 0xa76   : > { %vm1295_vm1 = vmor %vm1293_vm0, %vm1294_vm15 }
 0xa77   : > { %v1290_v51 = vsub.f32 1.0, %v1289_v50 }
 0xa78   : > { %v1056_v52 = vpop.permute.xlu0 %1055 }
 0xa79   : > { %1058 = vst.msk [vmem:[#allocation3 + $0x10] sm:$0xff] %vm663_vm5, %v1056_v52  ;;  %2588 = vmatmul.msk.f32.vlgmr.msra.gmra.mxu2 %vm663_vm5, %v1056_v52  ;;  %v1291_v54 = vmul.f32 %v2768_v49, %v1290_v51  ;;  %v621_v52 = vadd.f32 %v3325_v43, %v3135_v32 }
 0xa7a   : > { %1347 = vmatpush.msra.mxu2 %v3154_v61 }
 0xa7b   : > { %v1292_v58 = vadd.f32 %v2768_v49, %v1291_v54 }
 0xa7c   : > { %1348 = vmatpush.msra.mxu2 %v3161_v62 }
 0xa7d   : > { %v1296_v60 = vsel %vm1295_vm1, %v2768_v49, %v1292_v58 }
 0xa7e   : > { %v1301_v63 = vsel %vm1298_vm2, %v1300_v59, %v1296_v60  ;;  %1349 = vmatpush.msra.mxu2 %v3169_v0 }
 0xa7f   : > { %v1303_v2 = vmul.f32 2.0, %v1301_v63  ;;  %v1305_v40 = vmul.f32 %v1301_v63, %v3303_v23 }
 0xa80   : > { %v1744_v3 = vld [vmem:[#allocation3 + $0x10] sm:$0xff]  ;;  %1350 = vmatpush.msra.mxu2 %v3176_v1 }
 0xa81   : > { %2628 = vmatmul.msk.f32.gmra.mxu1 %vm663_vm5, %v1744_v3  ;;  %v2599_v55 = vadd.f32 -1.0, %v1303_v2 }
 0xa83   : > { %1307 = vrot.lane.b32.xlu1 %v2599_v55, %s2928_s30 }
 0xaf5   : > { %v1308_v5 = vpop.permute.xlu1 %1307 }
 0xaf6   : > { %v1310_v6 = vmul.f32 %v1308_v5, %v1301_v63 }
 0xaf8   : > { %1312 = vrot.lane.b32.xlu2 %v1310_v6, %s2929_s29 }
 0xafc   : > { %v1084_v9 = vpop.f32.mrf.mxu2 }
 0xafd   : > { %v1087_v10 = vadd.f32 %v1084_v9, %v583_v8  ;;  %v586_v9 = vadd.f32 %v3203_v25, %v3213_v33 }
 0xaff   : > { %v2589_v11 = vmul.f32 -1.442695, %v1087_v10 }
 0xb01   : > { %2769 = vpow2.f32 %v2589_v11 }
 0xb07   : > { %v2770_v13 = vpop.eup %2769 }
 0xb08   : > { %v1091_v14 = vadd.f32 1.0, %v2770_v13 }
 0xb0a   : > { %2771 = vrcp.f32 %v1091_v14  ;;  %v1103_v21 = vand.u32 2147483648, %v1091_v14  ;;  %v1101_v34 = vand.u32 2147483647, %v1091_v14  ;;  %vm1097_vm4 = vweird.f32 %v1091_v14 }
 0xb0c   : > { %v1104_v35 = vor.u32 1.1754944e-38, %v1103_v21  ;;  %vm1102_vm7 = vcmp.eq.f32.partialorder %v1101_v34, 8.507059e+37 }
 0xb10   : > { %v2772_v15 = vpop.eup %2771 }
 0xb11   : > { %v1093_v16 = vmul.f32 %v2772_v15, %v1091_v14  ;;  %vm1098_vm3 = vweird.f32 %v2772_v15 }
 0xb12   : > { %vm1099_vm6 = vmor %vm1097_vm4, %vm1098_vm3 }
 0xb13   : > { %v1094_v17 = vsub.f32 1.0, %v1093_v16 }
 0xb15   : > { %v1095_v24 = vmul.f32 %v2772_v15, %v1094_v17 }
 0xb17   : > { %v1096_v4 = vadd.f32 %v2772_v15, %v1095_v24 }
 0xb19   : > { %v1100_v36 = vsel %vm1099_vm6, %v2772_v15, %v1096_v4 }
 0xb1a   : > { %v1105_v37 = vsel %vm1102_vm7, %v1104_v35, %v1100_v36 }
 0xb1b   : > { %v1107_v38 = vmul.f32 2.0, %v1105_v37  ;;  %v1109_v47 = vmul.f32 %v1105_v37, %v3310_v12 }
 0xb1d   : > { %v2590_v39 = vadd.f32 -1.0, %v1107_v38 }
 0xb1f   : > { %1111 = vrot.lane.b32.xlu2 %v2590_v39, %s2928_s30 }
 0xb52   : > { %v1313_v57 = vpop.permute.xlu2 %1312 }
 0xb53   : > { %v3340_v41 = vadd.f32 %v1313_v57, %v1305_v40 }
 0xb55   : > { %2773 = vtanh.f32 %v3340_v41 }
 0xb5b   : > { %v2774_v44 = vpop.eup %2773 }
 0xb5c   : > { %1318 = vrot.lane.b32.xlu0 %v2774_v44, %s2928_s30 }
 0xb79   : > { %v1112_v45 = vpop.permute.xlu2 %1111 }
 0xb7a   : > { %v1114_v28 = vmul.f32 %v1112_v45, %v1105_v37 }
 0xb7c   : > { %1116 = vrot.lane.b32.xlu0 %v1114_v28, %s2929_s29 }
 0xbce   : > { %v1319_v46 = vpop.permute.xlu0 %1318 }
 0xbcf   : > { %v1321_v31 = vmul.f32 %v1319_v46, %v1301_v63 }
 0xbd1   : > { %1328 = vrot.lane.b32.xlu1 %v1321_v31, %s2929_s29 }
 0xbee   : > { %v1117_v48 = vpop.permute.xlu0 %1116 }
 0xbef   : > { %v3347_v23 = vadd.f32 %v1117_v48, %v1109_v47 }
 0xbf1   : > { %2775 = vtanh.f32 %v3347_v23 }
 0xbf7   : > { %v2776_v49 = vpop.eup %2775 }
 0xbf8   : > { %1122 = vrot.lane.b32.xlu1 %v2776_v49, %s2928_s30 }
 0xc43   : > { %v1329_v50 = vpop.permute.xlu1 %1328 }
 0xc44   : > { %1331 = vst.msk [vmem:[#allocation4 + $0x18] sm:$0xff] %vm663_vm5, %v1329_v50  ;;  %2603 = vmatmul.msk.f32.vlgmr.msra.gmra.mxu3 %vm663_vm5, %v1329_v50 }
 0xc45   : > { %1677 = vmatpush.msra.mxu3 %v3068_v18 }
 0xc47   : > { %1678 = vmatpush.msra.mxu3 %v3073_v19 }
 0xc49   : > { %1679 = vmatpush.msra.mxu3 %v3085_v20 }
 0xc4b   : > { %1680 = vmatpush.msra.mxu3 %v3095_v22 }
 0xc6a   : > { %v1123_v12 = vpop.permute.xlu1 %1122 }
 0xc6b   : > { %v1125_v51 = vmul.f32 %v1123_v12, %v1105_v37 }
 0xc6d   : > { %1189 = vrot.lane.b32.xlu2 %v1125_v51, %s2929_s29 }
 0xcc7   : > { %v1414_v53 = vpop.f32.mrf.mxu3  ;;  %v1190_v54 = vpop.permute.xlu2 %1189 }
 0xcc8   : > { %v1417_v56 = vadd.f32 %v1414_v53, %v621_v52  ;;  %1192 = vst.msk [vmem:[#allocation3 + $0x18] sm:$0xff] %vm663_vm5, %v1190_v54  ;;  %2594 = vmatmul.msk.f32.vlgmr.msrb.gmra.mxu2 %vm663_vm5, %v1190_v54 }
 0xcc9   : > { %1481 = vmatpush.msrb.mxu2 %v3154_v61 }
 0xcca   : > { %v2604_v18 = vmul.f32 -1.442695, %v1417_v56 }
 0xccb   : > { %1482 = vmatpush.msrb.mxu2 %v3161_v62 }
 0xccc   : > { %2777 = vpow2.f32 %v2604_v18 }
 0xccd   : > { %1483 = vmatpush.msrb.mxu2 %v3169_v0 }
 0xccf   : > { %v1745_v19 = vld [vmem:[#allocation3 + $0x18] sm:$0xff]  ;;  %1484 = vmatpush.msrb.mxu2 %v3176_v1 }
 0xcd0   : > { %2629 = vmatmul.msk.f32.gmra.mxu1 %vm663_vm5, %v1745_v19 }
 0xcd2   : > { %v2778_v20 = vpop.eup %2777 }
 0xcd3   : > { %v1421_v22 = vadd.f32 1.0, %v2778_v20 }
 0xcd5   : > { %2779 = vrcp.f32 %v1421_v22  ;;  %v1433_v60 = vand.u32 2147483648, %v1421_v22  ;;  %v1431_v2 = vand.u32 2147483647, %v1421_v22  ;;  %vm1427_vm9 = vweird.f32 %v1421_v22 }
 0xcd7   : > { %v1434_v55 = vor.u32 1.1754944e-38, %v1433_v60  ;;  %vm1432_vm11 = vcmp.eq.f32.partialorder %v1431_v2, 8.507059e+37 }
 0xcdb   : > { %v2780_v43 = vpop.eup %2779 }
 0xcdc   : > { %v1423_v58 = vmul.f32 %v2780_v43, %v1421_v22  ;;  %vm1428_vm8 = vweird.f32 %v2780_v43 }
 0xcdd   : > { %vm1429_vm10 = vmor %vm1427_vm9, %vm1428_vm8 }
 0xcde   : > { %v1424_v59 = vsub.f32 1.0, %v1423_v58 }
 0xce0   : > { %v1425_v63 = vmul.f32 %v2780_v43, %v1424_v59 }
 0xce2   : > { %v1426_v3 = vadd.f32 %v2780_v43, %v1425_v63 }
 0xce4   : > { %v1430_v5 = vsel %vm1429_vm10, %v2780_v43, %v1426_v3 }
 0xce5   : > { %v1435_v6 = vsel %vm1432_vm11, %v1434_v55, %v1430_v5 }
 0xce6   : > { %v1437_v7 = vmul.f32 2.0, %v1435_v6  ;;  %v1439_v44 = vmul.f32 %v1435_v6, %v3340_v41 }
 0xce8   : > { %v2605_v8 = vadd.f32 -1.0, %v1437_v7 }
 0xcea   : > { %1441 = vrot.lane.b32.xlu0 %v2605_v8, %s2928_s30  ;;  %v589_v8 = vadd.f32 %v3206_v26, %v3213_v33 }
 0xd4b   : > { %v1218_v10 = vpop.f32.mrf.mxu2 }
 0xd4c   : > { %v1221_v11 = vadd.f32 %v1218_v10, %v586_v9 }
 0xd4e   : > { %v2595_v13 = vmul.f32 -1.442695, %v1221_v11 }
 0xd50   : > { %2781 = vpow2.f32 %v2595_v13 }
 0xd56   : > { %v2782_v14 = vpop.eup %2781 }
 0xd57   : > { %v1225_v15 = vadd.f32 1.0, %v2782_v14 }
 0xd59   : > { %2783 = vrcp.f32 %v1225_v15  ;;  %v1237_v4 = vand.u32 2147483648, %v1225_v15  ;;  %v1235_v36 = vand.u32 2147483647, %v1225_v15  ;;  %vm1231_vm13 = vweird.f32 %v1225_v15 }
 0xd5b   : > { %v1238_v25 = vor.u32 1.1754944e-38, %v1237_v4  ;;  %vm1236_vm15 = vcmp.eq.f32.partialorder %v1235_v36, 8.507059e+37 }
 0xd5c   : > { %v1442_v16 = vpop.permute.xlu0 %1441 }
 0xd5d   : > { %v1444_v17 = vmul.f32 %v1442_v16, %v1435_v6 }
 0xd5f   : > { %v2784_v21 = vpop.eup %2783  ;;  %1446 = vrot.lane.b32.xlu1 %v1444_v17, %s2929_s29 }
 0xd60   : > { %v1227_v24 = vmul.f32 %v2784_v21, %v1225_v15  ;;  %vm1232_vm12 = vweird.f32 %v2784_v21 }
 0xd61   : > { %vm1233_vm14 = vmor %vm1231_vm13, %vm1232_vm12 }
 0xd62   : > { %v1228_v34 = vsub.f32 1.0, %v1227_v24 }
 0xd64   : > { %v1229_v35 = vmul.f32 %v2784_v21, %v1228_v34 }
 0xd66   : > { %v1230_v37 = vadd.f32 %v2784_v21, %v1229_v35 }
 0xd68   : > { %v1234_v38 = vsel %vm1233_vm14, %v2784_v21, %v1230_v37 }
 0xd69   : > { %v1239_v39 = vsel %vm1236_vm15, %v1238_v25, %v1234_v38 }
 0xd6a   : > { %v1241_v40 = vmul.f32 2.0, %v1239_v39  ;;  %v1243_v50 = vmul.f32 %v1239_v39, %v3347_v23  ;;  %v618_v23 = vadd.f32 %v3323_v42, %v3135_v32 }
 0xd6c   : > { %v2596_v57 = vadd.f32 -1.0, %v1241_v40 }
 0xd6e   : > { %1245 = vrot.lane.b32.xlu1 %v2596_v57, %s2928_s30 }
 0xdd1   : > { %v1447_v45 = vpop.permute.xlu1 %1446 }
 0xdd2   : > { %v3373_v28 = vadd.f32 %v1447_v45, %v1439_v44 }
 0xdd4   : > { %2785 = vtanh.f32 %v3373_v28 }
 0xdda   : > { %v2786_v46 = vpop.eup %2785 }
 0xddb   : > { %1452 = vrot.lane.b32.xlu2 %v2786_v46, %s2928_s30 }
 0xde0   : > { %v1246_v31 = vpop.permute.xlu1 %1245 }
 0xde1   : > { %v1248_v47 = vmul.f32 %v1246_v31, %v1239_v39 }
 0xde3   : > { %1250 = vrot.lane.b32.xlu2 %v1248_v47, %s2929_s29 }
 0xe35   : > { %v1453_v48 = vpop.permute.xlu2 %1452 }
 0xe36   : > { %v1455_v49 = vmul.f32 %v1453_v48, %v1435_v6 }
 0xe38   : > { %1462 = vrot.lane.b32.xlu0 %v1455_v49, %s2929_s29 }
 0xe3d   : > { %v1251_v12 = vpop.permute.xlu2 %1250 }
 0xe3e   : > { %v3380_v41 = vadd.f32 %v1251_v12, %v1243_v50 }
 0xe40   : > { %2787 = vtanh.f32 %v3380_v41 }
 0xe46   : > { %v2788_v51 = vpop.eup %2787 }
 0xe47   : > { %1256 = vrot.lane.b32.xlu0 %v2788_v51, %s2928_s30 }
 0xeaa   : > { %v1463_v52 = vpop.permute.xlu0 %1462 }
 0xeab   : > { %1465 = vst.msk [vmem:[#allocation4 + $0x10] sm:$0xff] %vm663_vm5, %v1463_v52  ;;  %2609 = vmatmul.msk.f32.vlgmr.msrb.gmra.mxu3 %vm663_vm5, %v1463_v52 }
 0xeb9   : > { %v1257_v53 = vpop.permute.xlu0 %1256 }
 0xeba   : > { %v1259_v54 = vmul.f32 %v1257_v53, %v1239_v39 }
 0xebc   : > { %1323 = vrot.lane.b32.xlu1 %v1259_v54, %s2929_s29 }
 0xf2e   : > { %v1548_v56 = vpop.f32.mrf.mxu3  ;;  %v1324_v18 = vpop.permute.xlu1 %1323 }
 0xf2f   : > { %v1551_v19 = vadd.f32 %v1548_v56, %v618_v23  ;;  %1326 = vst.msk [vmem:[#allocation3 + $0x20] sm:$0xff] %vm663_vm5, %v1324_v18  ;;  %2600 = vmatmul.msk.f32.vlgmr.msra.gmra.mxu2 %vm663_vm5, %v1324_v18 }
 0xf30   : > { %1615 = vmatpush.msra.mxu2 %v3154_v61 }
 0xf31   : > { %v2610_v20 = vmul.f32 -1.442695, %v1551_v19 }
 0xf32   : > { %1616 = vmatpush.msra.mxu2 %v3161_v62 }
 0xf33   : > { %2789 = vpow2.f32 %v2610_v20 }
 0xf34   : > { %1617 = vmatpush.msra.mxu2 %v3169_v0 }
 0xf36   : > { %v1746_v22 = vld [vmem:[#allocation3 + $0x20] sm:$0xff]  ;;  %1618 = vmatpush.msra.mxu2 %v3176_v1 }
 0xf37   : > { %2630 = vmatmul.msk.f32.gmra.mxu1 %vm663_vm5, %v1746_v22 }
 0xf39   : > { %v2790_v42 = vpop.eup %2789 }
 0xf3a   : > { %v1555_v43 = vadd.f32 1.0, %v2790_v42 }
 0xf3c   : > { %2791 = vrcp.f32 %v1555_v43  ;;  %v1567_v63 = vand.u32 2147483648, %v1555_v43  ;;  %v1565_v61 = vand.u32 2147483647, %v1555_v43  ;;  %vm1561_vm1 = vweird.f32 %v1555_v43 }
 0xf3e   : > { %v1568_v62 = vor.u32 1.1754944e-38, %v1567_v63  ;;  %vm1566_vm3 = vcmp.eq.f32.partialorder %v1565_v61, 8.507059e+37 }
 0xf42   : > { %v2792_v58 = vpop.eup %2791 }
 0xf43   : > { %v1557_v59 = vmul.f32 %v2792_v58, %v1555_v43  ;;  %vm1562_vm0 = vweird.f32 %v2792_v58 }
 0xf44   : > { %vm1563_vm2 = vmor %vm1561_vm1, %vm1562_vm0 }
 0xf45   : > { %v1558_v60 = vsub.f32 1.0, %v1557_v59 }
 0xf47   : > { %v1559_v2 = vmul.f32 %v2792_v58, %v1558_v60 }
 0xf49   : > { %v1560_v3 = vadd.f32 %v2792_v58, %v1559_v2 }
 0xf4b   : > { %v1564_v0 = vsel %vm1563_vm2, %v2792_v58, %v1560_v3 }
 0xf4c   : > { %v1569_v55 = vsel %vm1566_vm3, %v1568_v62, %v1564_v0  ;;  %v592_v0 = vadd.f32 %v3208_v29, %v3213_v33 }
 0xf4d   : > { %v1571_v1 = vmul.f32 2.0, %v1569_v55  ;;  %v1573_v38 = vmul.f32 %v1569_v55, %v3373_v28 }
 0xf4f   : > { %v2611_v5 = vadd.f32 -1.0, %v1571_v1 }
 0xf51   : > { %1575 = vrot.lane.b32.xlu2 %v2611_v5, %s2928_s30 }
 0xfab   : > { %v1576_v6 = vpop.permute.xlu2 %1575 }
 0xfac   : > { %v1578_v7 = vmul.f32 %v1576_v6, %v1569_v55 }
 0xfae   : > { %1580 = vrot.lane.b32.xlu0 %v1578_v7, %s2929_s29 }
 0xfb2   : > { %v1352_v9 = vpop.f32.mrf.mxu2 }
 0xfb3   : > { %v1355_v10 = vadd.f32 %v1352_v9, %v589_v8 }
 0xfb5   : > { %v2601_v11 = vmul.f32 -1.442695, %v1355_v10 }
 0xfb7   : > { %2793 = vpow2.f32 %v2601_v11 }
 0xfbd   : > { %v2794_v13 = vpop.eup %2793 }
 0xfbe   : > { %v1359_v14 = vadd.f32 1.0, %v2794_v13 }
 0xfc0   : > { %2795 = vrcp.f32 %v1359_v14  ;;  %v1371_v21 = vand.u32 2147483648, %v1359_v14  ;;  %v1369_v34 = vand.u32 2147483647, %v1359_v14  ;;  %vm1365_vm6 = vweird.f32 %v1359_v14 }
 0xfc2   : > { %v1372_v35 = vor.u32 1.1754944e-38, %v1371_v21  ;;  %vm1370_vm8 = vcmp.eq.f32.partialorder %v1369_v34, 8.507059e+37 }
 0xfc6   : > { %v2796_v15 = vpop.eup %2795 }
 0xfc7   : > { %v1361_v16 = vmul.f32 %v2796_v15, %v1359_v14  ;;  %vm1366_vm4 = vweird.f32 %v2796_v15 }
 0xfc8   : > { %vm1367_vm7 = vmor %vm1365_vm6, %vm1366_vm4 }
 0xfc9   : > { %v1362_v17 = vsub.f32 1.0, %v1361_v16 }
 0xfcb   : > { %v1363_v24 = vmul.f32 %v2796_v15, %v1362_v17 }
 0xfcd   : > { %v1364_v4 = vadd.f32 %v2796_v15, %v1363_v24 }
 0xfcf   : > { %v1368_v36 = vsel %vm1367_vm7, %v2796_v15, %v1364_v4 }
 0xfd0   : > { %v1373_v26 = vsel %vm1370_vm8, %v1372_v35, %v1368_v36 }
 0xfd1   : > { %v1375_v37 = vmul.f32 2.0, %v1373_v26  ;;  %v1377_v47 = vmul.f32 %v1373_v26, %v3380_v41  ;;  %v615_v41 = vadd.f32 %v3321_v27, %v3135_v32 }
 0xfd3   : > { %v2602_v25 = vadd.f32 -1.0, %v1375_v37 }
 0xfd5   : > { %1379 = vrot.lane.b32.xlu0 %v2602_v25, %s2928_s30 }
0x1020   : > { %v1581_v39 = vpop.permute.xlu0 %1580 }
0x1021   : > { %v3402_v40 = vadd.f32 %v1581_v39, %v1573_v38  ;;  %v1741_v39 = vld [vmem:[%s3876_s5 + $0x38] sm:$0xff] }
0x1022   : > { %1794 = vmatpush.msrb.mxu0 %v1741_v39 }
0x1023   : > { %2797 = vtanh.f32 %v3402_v40 }
0x1029   : > { %v2798_v57 = vpop.eup %2797 }
0x102a   : > { %1586 = vrot.lane.b32.xlu1 %v2798_v57, %s2928_s30  ;;  %v1739_v57 = vld [vmem:[%s3876_s5 + $0x28] sm:$0xff] }
0x1047   : > { %v1380_v44 = vpop.permute.xlu0 %1379 }
0x1048   : > { %v1382_v45 = vmul.f32 %v1380_v44, %v1373_v26 }
0x104a   : > { %1384 = vrot.lane.b32.xlu1 %v1382_v45, %s2929_s29 }
0x109c   : > { %v1587_v46 = vpop.permute.xlu1 %1586 }
0x109d   : > { %v1589_v31 = vmul.f32 %v1587_v46, %v1569_v55 }
0x109f   : > { %1596 = vrot.lane.b32.xlu2 %v1589_v31, %s2929_s29 }
0x10bc   : > { %v1385_v48 = vpop.permute.xlu1 %1384 }
0x10bd   : > { %v3409_v28 = vadd.f32 %v1385_v48, %v1377_v47  ;;  %v1738_v47 = vld [vmem:[%s3876_s5 + $0x20] sm:$0xff] }
0x10bf   : > { %2799 = vtanh.f32 %v3409_v28 }
0x10c5   : > { %v2800_v49 = vpop.eup %2799 }
0x10c6   : > { %1390 = vrot.lane.b32.xlu2 %v2800_v49, %s2928_s30 }
0x10f9   : > { %v1597_v50 = vpop.permute.xlu2 %1596 }
0x10fa   : > { %1599 = vst.msk [vmem:[#allocation4 + $0x8] sm:$0xff] %vm663_vm5, %v1597_v50  ;;  %2615 = vmatmul.msk.f32.vlgmr.msra.gmra.mxu3 %vm663_vm5, %v1597_v50  ;;  %v1752_v50 = vld [vmem:[#allocation4 + $0x10] sm:$0xff] }
0x1120   : > { %v1391_v12 = vpop.permute.xlu2 %1390 }
0x1121   : > { %v1393_v51 = vmul.f32 %v1391_v12, %v1373_v26  ;;  %v1753_v12 = vld [vmem:[#allocation4 + $0x18] sm:$0xff] }
0x1123   : > { %1457 = vrot.lane.b32.xlu0 %v1393_v51, %s2929_s29 }
0x117d   : > { %v1682_v52 = vpop.f32.mrf.mxu3 }
0x117e   : > { %v1685_v53 = vadd.f32 %v1682_v52, %v615_v41  ;;  %v1754_v52 = vld [vmem:[#allocation4 + $0x20] sm:$0xff] }
0x1180   : > { %v2616_v54 = vmul.f32 -1.442695, %v1685_v53  ;;  %v1755_v53 = vld [vmem:[#allocation4 + $0x28] sm:$0xff] }
0x1182   : > { %2801 = vpow2.f32 %v2616_v54  ;;  %v1756_v54 = vld [vmem:[#allocation4 + $0x30] sm:$0xff] }
0x1188   : > { %v2802_v23 = vpop.eup %2801 }
0x1189   : > { %v1689_v56 = vadd.f32 1.0, %v2802_v23  ;;  %v1757_v23 = vld [vmem:[#allocation4 + $0x38] sm:$0xff] }
0x118b   : > { %2803 = vrcp.f32 %v1689_v56  ;;  %v1701_v42 = vand.u32 2147483648, %v1689_v56  ;;  %v1699_v58 = vand.u32 2147483647, %v1689_v56  ;;  %vm1695_vm10 = vweird.f32 %v1689_v56 }
0x118d   : > { %v1702_v27 = vor.u32 1.1754944e-38, %v1701_v42  ;;  %vm1700_vm12 = vcmp.eq.f32.partialorder %v1699_v58, 8.507059e+37 }
0x1191   : > { %v2804_v18 = vpop.eup %2803 }
0x1192   : > { %v1691_v19 = vmul.f32 %v2804_v18, %v1689_v56  ;;  %vm1696_vm9 = vweird.f32 %v2804_v18 }
0x1193   : > { %vm1697_vm11 = vmor %vm1695_vm10, %vm1696_vm9 }
0x1194   : > { %v1692_v20 = vsub.f32 1.0, %v1691_v19 }
0x1195   : > { %v1458_v22 = vpop.permute.xlu0 %1457 }
0x1196   : > { %1460 = vst.msk [vmem:[#allocation3 + $0x28] sm:$0xff] %vm663_vm5, %v1458_v22  ;;  %2606 = vmatmul.msk.f32.vlgmr.msrb.gmra.mxu2 %vm663_vm5, %v1458_v22  ;;  %v1693_v43 = vmul.f32 %v2804_v18, %v1692_v20  ;;  %v3459_v20 = vstv %s2634_s20 }
0x1198   : > { %v1694_v32 = vadd.f32 %v2804_v18, %v1693_v43 }
0x119a   : > { %v1698_v59 = vsel %vm1697_vm11, %v2804_v18, %v1694_v32  ;;  %v1864_v18 = vpop.f32.mrf.mxu1 }
0x119b   : > { %v1703_v60 = vsel %vm1700_vm12, %v1702_v27, %v1698_v59 }
0x119c   : > { %v1705_v63 = vmul.f32 2.0, %v1703_v60  ;;  %v1707_v34 = vmul.f32 %v1703_v60, %v3402_v40  ;;  %v1740_v40 = vld [vmem:[%s3876_s5 + $0x30] sm:$0xff] }
0x119d   : > { %v1747_v2 = vld [vmem:[#allocation3 + $0x28] sm:$0xff]  ;;  %1795 = vmatpush.msrb.mxu0 %v1740_v40 }
0x119e   : > { %2631 = vmatmul.msk.f32.gmra.mxu1 %vm663_vm5, %v1747_v2  ;;  %v2617_v61 = vadd.f32 -1.0, %v1705_v63 }
0x119f   : > { %1796 = vmatpush.msrb.mxu0 %v1739_v57  ;;  %v2102_v57 = vstv %s3466_s26 }
0x11a0   : > { %1709 = vrot.lane.b32.xlu1 %v2617_v61, %s2928_s30 }
0x11a1   : > { %1797 = vmatpush.msrb.mxu0 %v1738_v47 }
0x11a2   : > { %v1867_v32 = vpop.f32.mrf.mxu1 }
0x1212   : > { %v1710_v3 = vpop.permute.xlu1 %1709 }
0x1213   : > { %v1712_v62 = vmul.f32 %v1710_v3, %v1703_v60 }
0x1215   : > { %1714 = vrot.lane.b32.xlu2 %v1712_v62, %s2929_s29 }
0x1219   : > { %v1486_v55 = vpop.f32.mrf.mxu2 }
0x121a   : > { %v1489_v1 = vadd.f32 %v1486_v55, %v592_v0 }
0x121c   : > { %v2607_v5 = vmul.f32 -1.442695, %v1489_v1 }
0x121e   : > { %2805 = vpow2.f32 %v2607_v5 }
0x1224   : > { %v2806_v6 = vpop.eup %2805 }
0x1225   : > { %v1493_v7 = vadd.f32 1.0, %v2806_v6 }
0x1227   : > { %2807 = vrcp.f32 %v1493_v7  ;;  %v1505_v11 = vand.u32 2147483648, %v1493_v7  ;;  %v1503_v14 = vand.u32 2147483647, %v1493_v7  ;;  %vm1499_vm14 = vweird.f32 %v1493_v7 }
0x1229   : > { %v1506_v16 = vor.u32 1.1754944e-38, %v1505_v11  ;;  %vm1504_vm0 = vcmp.eq.f32.partialorder %v1503_v14, 8.507059e+37 }
0x122d   : > { %v2808_v8 = vpop.eup %2807 }
0x122e   : > { %v1495_v9 = vmul.f32 %v2808_v8, %v1493_v7  ;;  %vm1500_vm13 = vweird.f32 %v2808_v8 }
0x122f   : > { %vm1501_vm15 = vmor %vm1499_vm14, %vm1500_vm13  ;;  %vm2090_vm13 = vcmask 7168  }
0x1230   : > { %v1496_v10 = vsub.f32 1.0, %v1495_v9 }
0x1232   : > { %v1497_v13 = vmul.f32 %v2808_v8, %v1496_v10 }
0x1234   : > { %v1498_v15 = vadd.f32 %v2808_v8, %v1497_v13 }
0x1236   : > { %v1502_v17 = vsel %vm1501_vm15, %v2808_v8, %v1498_v15  ;;  %v3471_v15 = vld [vmem:[%s3050_s24 + $0x8] sm:$0xff] }
0x1237   : > { %v1507_v29 = vsel %vm1504_vm0, %v1506_v16, %v1502_v17  ;;  %v3475_v17 = vstv %s2646_s21  ;;  %vm2130_vm7 = vcmp.ne.s32.totalorder %v3471_v15, 0 }
0x1238   : > { %v1509_v21 = vmul.f32 2.0, %v1507_v29  ;;  %v1511_v44 = vmul.f32 %v1507_v29, %v3409_v28  ;;  %v1751_v28 = vld [vmem:[#allocation4 + $0x8] sm:$0xff] }
0x123a   : > { %v2608_v24 = vadd.f32 -1.0, %v1509_v21  ;;  %v3477_v21 = vstv %s2647_s22 }
0x123b   : > { %v2132_v40 = vsel %vm2130_vm7, %v3477_v21, %v3475_v17 }
0x123c   : > { %1513 = vrot.lane.b32.xlu2 %v2608_v24, %s2928_s30  ;;  %v3479_v24 = vstv %s2648_s11 }
0x126f   : > { %v1715_v4 = vpop.permute.xlu2 %1714 }
0x1270   : > { %v1717_v35 = vadd.f32 %v1715_v4, %v1707_v34  ;;  %v3481_v34 = vstv %s2649_s23 }
0x1271   : > { %v2131_v39 = vsel %vm2130_vm7, %v3481_v34, %v3479_v24 }
0x1272   : > { %2809 = vtanh.f32 %v1717_v35 }
0x1278   : > { %v2810_v36 = vpop.eup %2809 }
0x1279   : > { %1720 = vrot.lane.b32.xlu0 %v2810_v36, %s2928_s30  ;;  %v3485_v36 = vld [vmem:[%s3050_s24] sm:$0xff] }
0x127a   : > { %vm2119_vm10 = vcmp.ne.s32.totalorder %v3485_v36, 0 }
0x1296   : > { %v1514_v26 = vpop.permute.xlu2 %1513 }
0x1297   : > { %v1516_v37 = vmul.f32 %v1514_v26, %v1507_v29  ;;  %v2100_v26 = vstv %s3464_s17 }
0x1299   : > { %1518 = vrot.lane.b32.xlu0 %v1516_v37, %s2929_s29 }
0x12eb   : > { %v1721_v25 = vpop.permute.xlu0 %1720 }
0x12ec   : > { %v1723_v38 = vmul.f32 %v1721_v25, %v1703_v60 }
0x12ee   : > { %1730 = vrot.lane.b32.xlu1 %v1723_v38, %s2929_s29 }
0x130b   : > { %v1519_v45 = vpop.permute.xlu0 %1518 }
0x130c   : > { %v3440_v46 = vadd.f32 %v1519_v45, %v1511_v44 }
0x130e   : > { %2811 = vtanh.f32 %v3440_v46 }
0x1314   : > { %v2812_v31 = vpop.eup %2811 }
0x1315   : > { %1524 = vrot.lane.b32.xlu1 %v2812_v31, %s2928_s30  ;;  %v3502_v31 = vld [vmem:[%s3052_s25 + $0x8] sm:$0xff] }
0x1316   : > { %vm2129_vm12 = vcmp.gt.f32.partialorder %v3502_v31, 0.5 }
0x1360   : > { %v1731_v48 = vpop.permute.xlu1 %1730 }
0x1361   : > { %1733 = vst.msk [vmem:[#allocation4] sm:$0xff] %vm663_vm5, %v1731_v48  ;;  %v2133_v48 = vsel %vm2119_vm10, %v2131_v39, %v2132_v40  ;;  %v3546_v40 = vsel %vm2090_vm13, %v3479_v24, %v3481_v34 }
0x1368   : > { %v1750_v49 = vld [vmem:[#allocation4] sm:$0xff] }
0x1369   : > { %2618 = vmatmul.msk.f32.vlgmr.msrb.gmra.mxu0 %vm663_vm5, %v1750_v49  ;;  %v2120_v49 = vsel %vm2119_vm10, %v2102_v57, %v2100_v26 }
0x1371   : > { %2619 = vmatmul.msk.f32.gmra.mxu0 %vm663_vm5, %v1751_v28 }
0x1379   : > { %2620 = vmatmul.msk.f32.gmra.mxu0 %vm663_vm5, %v1752_v50 }
0x1381   : > { %2621 = vmatmul.msk.f32.gmra.mxu0 %vm663_vm5, %v1753_v12 }
0x1387   : > { %v1525_v51 = vpop.permute.xlu1 %1524 }
0x1388   : > { %v1527_v41 = vmul.f32 %v1525_v51, %v1507_v29 }
0x1389   : > { %2622 = vmatmul.msk.f32.gmra.mxu0 %vm663_vm5, %v1754_v52 }
0x138a   : > { %1591 = vrot.lane.b32.xlu2 %v1527_v41, %s2929_s29 }
0x1391   : > { %2623 = vmatmul.msk.f32.gmra.mxu0 %vm663_vm5, %v1755_v53 }
0x1399   : > { %2624 = vmatmul.msk.f32.gmra.mxu0 %vm663_vm5, %v1756_v54  ;;  %v1870_v54 = vpop.f32.mrf.mxu1 }
0x13a1   : > { %2625 = vmatmul.msk.f32.gmra.mxu0 %vm663_vm5, %v1757_v23 }
0x13e4   : > { %v1592_v56 = vpop.permute.xlu2 %1591 }
0x13e5   : > { %1594 = vst.msk [vmem:[#allocation3 + $0x30] sm:$0xff] %vm663_vm5, %v1592_v56  ;;  %2612 = vmatmul.msk.f32.vlgmr.msra.gmra.mxu2 %vm663_vm5, %v1592_v56 }
0x13e6   : > { %v1799_v19 = vpop.f32.mrf.mxu0 }
0x13e7   : > { %v1865_v22 = vadd.f32 %v1864_v18, %v1799_v19  ;;  %v2931_v18 = vmov 1   ;;  %v2932_v19 = vmov 0  }
0x13e8   : > { %2713 = vset.pattern.permute.xlu2 %v2931_v18  ;;  %2712 = vset.pattern.permute.xlu1 %v2932_v19 }
0x13e9   : > { %v1890_v42 = vadd.f32 %v3459_v20, %v1865_v22  ;;  %2715 = vset.pattern.permute.xlu0 %v2931_v18 }
0x13eb   : > { %v2635_v43 = vmul.f32 -1.442695, %v1890_v42  ;;  %v595_v42 = vadd.f32 %v3210_v30, %v3213_v33 }
0x13ec   : > { %v1748_v58 = vld [vmem:[#allocation3 + $0x30] sm:$0xff] }
0x13ed   : > { %2813 = vpow2.f32 %v2635_v43  ;;  %2632 = vmatmul.msk.f32.gmra.mxu1 %vm663_vm5, %v1748_v58 }
0x13ee   : > { %v1802_v27 = vpop.f32.mrf.mxu0 }
0x13ef   : > { %v1868_v59 = vadd.f32 %v1867_v32, %v1802_v27 }
0x13f1   : > { %v1891_v60 = vadd.f32 %v3459_v20, %v1868_v59 }
0x13f3   : > { %v2814_v63 = vpop.eup %2813  ;;  %v2636_v2 = vmul.f32 -1.442695, %v1891_v60 }
0x13f4   : > { %v1922_v61 = vadd.f32 1.0, %v2814_v63 }
0x13f5   : > { %2815 = vpow2.f32 %v2636_v2 }
0x13f6   : > { %2817 = vrcp.f32 %v1922_v61  ;;  %v1941_v5 = vand.u32 2147483648, %v1922_v61  ;;  %v1939_v7 = vand.u32 2147483647, %v1922_v61  ;;  %vm1935_vm2 = vweird.f32 %v1922_v61  ;;  %v1805_v53 = vpop.f32.mrf.mxu0 }
0x13f7   : > { %v1871_v23 = vadd.f32 %v1870_v54, %v1805_v53 }
0x13f8   : > { %v1942_v10 = vor.u32 1.1754944e-38, %v1941_v5  ;;  %vm1940_vm4 = vcmp.eq.f32.partialorder %v1939_v7, 8.507059e+37 }
0x13f9   : > { %v1892_v56 = vadd.f32 %v3459_v20, %v1871_v23 }
0x13fb   : > { %v2816_v3 = vpop.eup %2815  ;;  %v2637_v22 = vmul.f32 -1.442695, %v1892_v56 }
0x13fc   : > { %v2818_v62 = vpop.eup %2817  ;;  %v1923_v0 = vadd.f32 1.0, %v2816_v3 }
0x13fd   : > { %v1931_v55 = vmul.f32 %v2818_v62, %v1922_v61  ;;  %vm1936_vm1 = vweird.f32 %v2818_v62  ;;  %v2123_v61 = vsel %vm2090_vm13, %v2100_v26, %v2102_v57 }
0x13fe   : > { %2819 = vrcp.f32 %v1923_v0  ;;  %vm1937_vm3 = vmor %vm1935_vm2, %vm1936_vm1  ;;  %v1956_v29 = vand.u32 2147483648, %v1923_v0  ;;  %v1954_v35 = vand.u32 2147483647, %v1923_v0  ;;  %vm1950_vm8 = vweird.f32 %v1923_v0 }
0x13ff   : > { %v1932_v1 = vsub.f32 1.0, %v1931_v55  ;;  %2821 = vpow2.f32 %v2637_v22 }
0x1400   : > { %v1957_v38 = vor.u32 1.1754944e-38, %v1956_v29  ;;  %vm1955_vm11 = vcmp.eq.f32.partialorder %v1954_v35, 8.507059e+37 }
0x1401   : > { %v1933_v6 = vmul.f32 %v2818_v62, %v1932_v1 }
0x1403   : > { %v1934_v8 = vadd.f32 %v2818_v62, %v1933_v6 }
0x1404   : > { %v2820_v9 = vpop.eup %2819 }
0x1405   : > { %v1938_v11 = vsel %vm1937_vm3, %v2818_v62, %v1934_v8  ;;  %v1946_v13 = vmul.f32 %v2820_v9, %v1923_v0  ;;  %vm1951_vm6 = vweird.f32 %v2820_v9  ;;  %v2822_v58 = vpop.eup %2821  ;;  %v2160_v8 = vsel %vm2129_vm12, 1, %v2932_v19 }
0x1406   : > { %v3468_v14 = vsel %vm1940_vm4, %v1942_v10, %v1938_v11  ;;  %vm1952_vm9 = vmor %vm1950_vm8, %vm1951_vm6  ;;  %v1924_v59 = vadd.f32 1.0, %v2822_v58 }
0x1407   : > { %2066 = vrot.lane.b32.xlu0 %v3468_v14, %s2930_s27  ;;  %v1947_v16 = vsub.f32 1.0, %v1946_v13  ;;  %v2050_v25 = vsub.f32 1.0, %v3468_v14 }
0x1408   : > { %vm1965_vm0 = vweird.f32 %v1924_v59  ;;  %v1971_v11 = vand.u32 2147483648, %v1924_v59 }
0x1409   : > { %v1948_v4 = vmul.f32 %v2820_v9, %v1947_v16  ;;  %v2121_v28 = vsel %vm2119_vm10, %v3468_v14, %v2050_v25  ;;  %v1969_v14 = vand.u32 2147483647, %v1924_v59 }
0x140a   : > { %v2122_v51 = vadd.f32 %v2121_v28, %v2120_v49  ;;  %v1972_v35 = vor.u32 1.1754944e-38, %v1971_v11 }
0x140b   : > { %v1949_v37 = vadd.f32 %v2820_v9, %v1948_v4  ;;  %vm1970_vm4 = vcmp.eq.f32.partialorder %v1969_v14, 8.507059e+37 }
0x140d   : > { %v1953_v44 = vsel %vm1952_vm9, %v2820_v9, %v1949_v37 }
0x140e   : > { %v3499_v45 = vsel %vm1955_vm11, %v1957_v38, %v1953_v44  ;;  %v3551_v44 = vsel %vm2090_vm13, %v3475_v17, %v3477_v21 }
0x140f   : > { %v2051_v47 = vsub.f32 1.0, %v3499_v45  ;;  %2068 = vrot.lane.b32.xlu0 %v3499_v45, %s2930_s27 }
0x1411   : > { %v2134_v50 = vsel %vm2130_vm7, %v3499_v45, %v2051_v47 }
0x1412   : > { %v2135_v12 = vadd.f32 %v2134_v50, %v2133_v48 }
0x1414   : > { %v2136_v41 = vsel %vm2129_vm12, %v2135_v12, 0.0 }
0x1415   : > { %v3516_v52 = vadd.f32 %v2136_v41, %v2122_v51 }
0x1468   : > { %v1620_v43 = vpop.f32.mrf.mxu2 }
0x1469   : > { %v1623_v32 = vadd.f32 %v1620_v43, %v595_v42 }
0x146b   : > { %v2613_v27 = vmul.f32 -1.442695, %v1623_v32 }
0x146d   : > { %2823 = vpow2.f32 %v2613_v27 }
0x146e   : > { %2825 = vrcp.f32 %v1924_v59 }
0x1473   : > { %v2824_v60 = vpop.eup %2823 }
0x1474   : > { %v1627_v63 = vadd.f32 1.0, %v2824_v60  ;;  %v2826_v2 = vpop.eup %2825 }
0x1475   : > { %v1961_v62 = vmul.f32 %v2826_v2, %v1924_v59  ;;  %vm1966_vm14 = vweird.f32 %v2826_v2 }
0x1476   : > { %2827 = vrcp.f32 %v1627_v63  ;;  %v1639_v13 = vand.u32 2147483648, %v1627_v63  ;;  %vm1967_vm1 = vmor %vm1965_vm0, %vm1966_vm14  ;;  %vm1633_vm2 = vweird.f32 %v1627_v63  ;;  %v1637_v16 = vand.u32 2147483647, %v1627_v63 }
0x1477   : > { %v1962_v1 = vsub.f32 1.0, %v1961_v62  ;;  %v1808_v62 = vpop.f32.mrf.mxu0 }
0x1478   : > { %v1640_v26 = vor.u32 1.1754944e-38, %v1639_v13  ;;  %vm1638_vm6 = vcmp.eq.f32.partialorder %v1637_v16, 8.507059e+37 }
0x1479   : > { %v2067_v3 = vpop.permute.xlu0 %2066  ;;  %v1963_v6 = vmul.f32 %v2826_v2, %v1962_v1 }
0x147a   : > { %v2091_v0 = vsel %vm2090_vm13, %v2050_v25, %v2067_v3 }
0x147b   : > { %v3526_v55 = vadd.f32 %v2123_v61, %v2091_v0  ;;  %v1964_v9 = vadd.f32 %v2826_v2, %v1963_v6  ;;  %v3562_v61 = vld [vmem:[%s3052_s25 + $0x10] sm:$0xff]  ;;  %v1873_v0 = vpop.f32.mrf.mxu1 }
0x147c   : > { %v2828_v30 = vpop.eup %2827  ;;  %vm2171_vm9 = vcmp.gt.f32.partialorder %v3562_v61, 0.5  ;;  %v1874_v45 = vadd.f32 %v1873_v0, %v1808_v62 }
0x147d   : > { %v1629_v33 = vmul.f32 %v2828_v30, %v1627_v63  ;;  %2145 = vperm.xlu2 %2713, %v3526_v55   ;;  %2140 = vperm.xlu1 %2712, %v3526_v55   ;;  %vm1634_vm15 = vweird.f32 %v2828_v30  ;;  %v1968_v29 = vsel %vm1967_vm1, %v2826_v2, %v1964_v9  ;;  %v2202_v3 = vsel %vm2171_vm9, 1, %v2932_v19 }
0x147e   : > { %vm1635_vm3 = vmor %vm1633_vm2, %vm1634_vm15  ;;  %v3534_v37 = vsel %vm1970_vm4, %v1972_v35, %v1968_v29 }
0x147f   : > { %v1630_v5 = vsub.f32 1.0, %v1629_v33 }
0x1481   : > { %v1631_v7 = vmul.f32 %v2828_v30, %v1630_v5  ;;  %v2069_v58 = vpop.permute.xlu0 %2068 }
0x1482   : > { %v2092_v60 = vsel %vm2090_vm13, %v2051_v47, %v2069_v58  ;;  %v1893_v47 = vadd.f32 %v3459_v20, %v1874_v45 }
0x1483   : > { %v1632_v10 = vadd.f32 %v2828_v30, %v1631_v7 }
0x1484   : > { %v2638_v1 = vmul.f32 -1.442695, %v1893_v47 }
0x1485   : > { %2162 = vperm.xlu1 %2712, %v2160_v8   ;;  %2714 = vset.pattern.permute.xlu2 %v2932_v19  ;;  %v1636_v4 = vsel %vm1635_vm3, %v2828_v30, %v1632_v10 }
0x1486   : > { %v3536_v25 = vsel %vm1638_vm6, %v1640_v26, %v1636_v4 }
0x1487   : > { %v1643_v38 = vmul.f32 2.0, %v3536_v25  ;;  %v1645_v30 = vmul.f32 %v3536_v25, %v3440_v46 }
0x1489   : > { %v2614_v39 = vadd.f32 -1.0, %v1643_v38 }
0x148d   : > { %2070 = vrot.lane.b32.xlu1 %v3534_v37, %s2930_s27 }
0x148e   : > { %2717 = vset.pattern.permute.xlu1 %v2931_v18 }
0x1495   : > { %1647 = vrot.lane.b32.xlu1 %v2614_v39, %s2928_s30 }
0x14d7   : > { %v2146_v57 = vpop.permute.xlu2 %2145 }
0x14d8   : > { %v2148_v49 = vadd.f32 %v2146_v57, %v3546_v40 }
0x14ef   : > { %v2141_v48 = vpop.permute.xlu1 %2140 }
0x14f0   : > { %v2143_v28 = vadd.f32 %v2141_v48, %v3551_v44 }
0x14f2   : > { %v2150_v50 = vsub.f32 %v2143_v28, %v2148_v49  ;;  %v2149_v32 = vmax.f32 %v2143_v28, %v2148_v49  ;;  %v2052_v49 = vsub.f32 1.0, %v3534_v37 }
0x14f4   : > { %v2151_v12 = vand.u32 2147483647, %v2150_v50 }
0x14f6   : > { %v2152_v51 = vsub.f32 0.0, %v2151_v12 }
0x14f7   : > { %v2163_v41 = vpop.permute.xlu1 %2162 }
0x14f8   : > { %v2153_v53 = vmul.f32 1.442695, %v2152_v51  ;;  %vm2164_vm8 = vcmp.eq.s32.totalorder %v2163_v41, 1 }
0x14fa   : > { %2829 = vpow2.f32 %v2153_v53 }
0x14ff   : > { %v2071_v54 = vpop.permute.xlu1 %2070 }
0x1500   : > { %v2830_v23 = vpop.eup %2829  ;;  %v2093_v12 = vsel %vm2090_vm13, %v2052_v49, %v2071_v54 }
0x1501   : > { %v2155_v56 = vadd.f32 1.0, %v2830_v23 }
0x1503   : > { %2831 = vlog2.f32 %v2155_v56 }
0x1507   : > { %v1648_v22 = vpop.permute.xlu1 %1647 }
0x1508   : > { %v1650_v42 = vmul.f32 %v1648_v22, %v3536_v25 }
0x1509   : > { %v2832_v43 = vpop.eup %2831 }
0x150a   : > { %v2157_v27 = vmul.f32 0.6931472, %v2832_v43  ;;  %1652 = vrot.lane.b32.xlu1 %v1650_v42, %s2929_s29  ;;  %v3583_v42 = vld [vmem:[%s3052_s25 + $0x18] sm:$0xff] }
0x150b   : > { %vm2213_vm0 = vcmp.gt.f32.partialorder %v3583_v42, 0.5 }
0x150c   : > { %v2158_v59 = vadd.f32 %v2157_v27, %v2149_v32  ;;  %v2244_v58 = vsel %vm2213_vm0, 1, %v2932_v19  ;;  %v3595_v27 = vld [vmem:[%s3052_s25 + $0x20] sm:$0xff] }
0x150d   : > { %vm2255_vm2 = vcmp.gt.f32.partialorder %v3595_v27, 0.5 }
0x150e   : > { %v2159_v63 = vadd.f32 %v2158_v59, %v2092_v60  ;;  %v2286_v59 = vsel %vm2255_vm2, 1, %v2932_v19  ;;  %v1811_v60 = vpop.f32.mrf.mxu0 }
0x1510   : > { %v2165_v2 = vsel %vm2164_vm8, %v2159_v63, %v3526_v55  ;;  %v1876_v63 = vpop.f32.mrf.mxu1 }
0x1511   : > { %2187 = vperm.xlu0 %2715, %v2165_v2   ;;  %2182 = vperm.xlu2 %2714, %v2165_v2  }
0x1516   : > { %v1814_v62 = vpop.f32.mrf.mxu0 }
0x1518   : > { %v1879_v0 = vpop.f32.mrf.mxu1 }
0x1519   : > { %2204 = vperm.xlu2 %2714, %v2202_v3   ;;  %v1880_v47 = vadd.f32 %v1879_v0, %v1814_v62 }
0x156b   : > { %v2183_v5 = vpop.permute.xlu2 %2182 }
0x156c   : > { %v2185_v7 = vadd.f32 %v2183_v5, %v3551_v44 }
0x1573   : > { %v2205_v50 = vpop.permute.xlu2 %2204 }
0x1574   : > { %vm2206_vm10 = vcmp.eq.s32.totalorder %v2205_v50, 1 }
0x157c   : > { %v1653_v55 = vpop.permute.xlu1 %1652 }
0x157d   : > { %v1655_v33 = vadd.f32 %v1653_v55, %v1645_v30  ;;  %v1895_v55 = vadd.f32 %v3459_v20, %v1880_v47 }
0x157f   : > { %2833 = vtanh.f32 %v1655_v33 }
0x1580   : > { %2835 = vpow2.f32 %v2638_v1 }
0x1583   : > { %v2188_v6 = vpop.permute.xlu0 %2187 }
0x1584   : > { %v2190_v8 = vadd.f32 %v2188_v6, %v3546_v40 }
0x1585   : > { %v2834_v9 = vpop.eup %2833 }
0x1586   : > { %v2192_v10 = vsub.f32 %v2185_v7, %v2190_v8  ;;  %1658 = vrot.lane.b32.xlu1 %v2834_v9, %s2928_s30  ;;  %v2836_v13 = vpop.eup %2835  ;;  %v2191_v57 = vmax.f32 %v2185_v7, %v2190_v8  ;;  %v2640_v7 = vmul.f32 -1.442695, %v1895_v55  ;;  %s2933_s30 = smov 127  }
0x1587   : > { %v1925_v16 = vadd.f32 1.0, %v2836_v13 }
0x1588   : > { %v2193_v11 = vand.u32 2147483647, %v2192_v10 }
0x1589   : > { %v1986_v56 = vand.u32 2147483648, %v1925_v16  ;;  %vm1980_vm14 = vweird.f32 %v1925_v16  ;;  %v1984_v22 = vand.u32 2147483647, %v1925_v16 }
0x158a   : > { %v2194_v14 = vsub.f32 0.0, %v2193_v11 }
0x158b   : > { %v1987_v54 = vor.u32 1.1754944e-38, %v1986_v56  ;;  %vm1985_vm1 = vcmp.eq.f32.partialorder %v1984_v22, 8.507059e+37 }
0x158c   : > { %v2195_v46 = vmul.f32 1.442695, %v2194_v14 }
0x158e   : > { %2837 = vpow2.f32 %v2195_v46 }
0x158f   : > { %2839 = vrcp.f32 %v1925_v16 }
0x1594   : > { %v2838_v29 = vpop.eup %2837 }
0x1595   : > { %v2197_v4 = vadd.f32 1.0, %v2838_v29  ;;  %v2840_v35 = vpop.eup %2839 }
0x1596   : > { %v1976_v26 = vmul.f32 %v2840_v35, %v1925_v16  ;;  %vm1981_vm11 = vweird.f32 %v2840_v35 }
0x1597   : > { %2841 = vlog2.f32 %v2197_v4  ;;  %vm1982_vm15 = vmor %vm1980_vm14, %vm1981_vm11 }
0x1598   : > { %v1977_v39 = vsub.f32 1.0, %v1976_v26 }
0x159a   : > { %v1978_v51 = vmul.f32 %v2840_v35, %v1977_v39 }
0x159c   : > { %v1979_v23 = vadd.f32 %v2840_v35, %v1978_v51 }
0x159d   : > { %v2842_v38 = vpop.eup %2841 }
0x159e   : > { %v2199_v48 = vmul.f32 0.6931472, %v2842_v38  ;;  %v1983_v43 = vsel %vm1982_vm15, %v2840_v35, %v1979_v23 }
0x159f   : > { %v3589_v32 = vsel %vm1985_vm1, %v1987_v54, %v1983_v43 }
0x15a0   : > { %v2200_v28 = vadd.f32 %v2199_v48, %v2191_v57  ;;  %v2053_v50 = vsub.f32 1.0, %v3589_v32 }
0x15a2   : > { %v2201_v41 = vadd.f32 %v2200_v28, %v2093_v12 }
0x15a4   : > { %v3578_v53 = vsel %vm2206_vm10, %v2201_v41, %v2165_v2  ;;  %v1877_v2 = vadd.f32 %v1876_v63, %v1811_v60 }
0x15a5   : > { %2229 = vperm.xlu0 %2715, %v3578_v53   ;;  %2224 = vperm.xlu2 %2714, %v3578_v53  }
0x15a6   : > { %v1894_v3 = vadd.f32 %v3459_v20, %v1877_v2 }
0x15a8   : > { %v2639_v45 = vmul.f32 -1.442695, %v1894_v3 }
0x15aa   : > { %2843 = vpow2.f32 %v2639_v45 }
0x15ab   : > { %2845 = vpow2.f32 %v2640_v7 }
0x15ad   : > { %2072 = vrot.lane.b32.xlu2 %v3589_v32, %s2930_s27  ;;  %2716 = vset.pattern.permute.xlu0 %v2932_v19 }
0x15ae   : > { %2246 = vperm.xlu0 %2716, %v2244_v58  }
0x15b0   : > { %v2844_v9 = vpop.eup %2843 }
0x15b1   : > { %v1926_v11 = vadd.f32 1.0, %v2844_v9  ;;  %v2846_v14 = vpop.eup %2845 }
0x15b2   : > { %v1927_v46 = vadd.f32 1.0, %v2846_v14 }
0x15b3   : > { %vm1995_vm6 = vweird.f32 %v1926_v11  ;;  %v1999_v60 = vand.u32 2147483647, %v1926_v11 }
0x15b4   : > { %v2016_v47 = vand.u32 2147483648, %v1927_v46  ;;  %vm2010_vm14 = vweird.f32 %v1927_v46 }
0x15b5   : > { %vm2000_vm10 = vcmp.eq.f32.partialorder %v1999_v60, 8.507059e+37 }
0x15b6   : > { %2288 = vperm.xlu0 %2716, %v2286_v59   ;;  %v2001_v59 = vand.u32 2147483648, %v1926_v11 }
0x15b8   : > { %v2002_v62 = vor.u32 1.1754944e-38, %v2001_v59 }
0x15be   : > { %2718 = vset.pattern.permute.xlu0 %v2931_v18 }
0x15f8   : > { %v1659_v63 = vpop.permute.xlu1 %1658 }
0x15f9   : > { %v1661_v0 = vmul.f32 %v1659_v63, %v3536_v25 }
0x15ff   : > { %v2225_v30 = vpop.permute.xlu2 %2224 }
0x1600   : > { %v2227_v1 = vadd.f32 %v2225_v30, %v3551_v44  ;;  %v2014_v30 = vand.u32 2147483647, %v1927_v46 }
0x1602   : > { %vm2015_vm1 = vcmp.eq.f32.partialorder %v2014_v30, 8.507059e+37 }
0x1607   : > { %v2073_v57 = vpop.permute.xlu2 %2072 }
0x1608   : > { %v2094_v41 = vsel %vm2090_vm13, %v2053_v50, %v2073_v57 }
0x1617   : > { %v2230_v33 = vpop.permute.xlu0 %2229 }
0x1618   : > { %v2232_v5 = vadd.f32 %v2230_v33, %v3546_v40  ;;  %v2017_v33 = vor.u32 1.1754944e-38, %v2016_v47 }
0x161a   : > { %v2234_v6 = vsub.f32 %v2227_v1, %v2232_v5  ;;  %v2233_v48 = vmax.f32 %v2227_v1, %v2232_v5  ;;  %v1882_v1 = vpop.f32.mrf.mxu1  ;;  %v1817_v5 = vpop.f32.mrf.mxu0 }
0x161c   : > { %v2235_v8 = vand.u32 2147483647, %v2234_v6  ;;  %v1883_v6 = vadd.f32 %v1882_v1, %v1817_v5 }
0x161e   : > { %v2236_v10 = vsub.f32 0.0, %v2235_v8  ;;  %v1896_v7 = vadd.f32 %v3459_v20, %v1883_v6 }
0x1620   : > { %v2237_v13 = vmul.f32 1.442695, %v2236_v10  ;;  %v2247_v51 = vpop.permute.xlu0 %2246  ;;  %v2641_v8 = vmul.f32 -1.442695, %v1896_v7 }
0x1621   : > { %vm2248_vm3 = vcmp.eq.s32.totalorder %v2247_v51, 1 }
0x1622   : > { %2847 = vpow2.f32 %v2237_v13 }
0x1623   : > { %2849 = vrcp.f32 %v1926_v11 }
0x1628   : > { %v2848_v16 = vpop.eup %2847 }
0x1629   : > { %v2239_v29 = vadd.f32 1.0, %v2848_v16  ;;  %v2850_v4 = vpop.eup %2849 }
0x162a   : > { %v1991_v35 = vmul.f32 %v2850_v4, %v1926_v11  ;;  %vm1996_vm4 = vweird.f32 %v2850_v4 }
0x162b   : > { %2851 = vlog2.f32 %v2239_v29  ;;  %vm1997_vm8 = vmor %vm1995_vm6, %vm1996_vm4 }
0x162c   : > { %2853 = vrcp.f32 %v1927_v46  ;;  %v1992_v38 = vsub.f32 1.0, %v1991_v35 }
0x162d   : > { %2855 = vpow2.f32 %v2641_v8  ;;  %v3654_v8 = vld [vmem:[%s3050_s24 + $0x10] sm:$0xff] }
0x162e   : > { %v1993_v23 = vmul.f32 %v2850_v4, %v1992_v38 }
0x1630   : > { %v1994_v54 = vadd.f32 %v2850_v4, %v1993_v23 }
0x1631   : > { %v2852_v26 = vpop.eup %2851 }
0x1632   : > { %v2854_v39 = vpop.eup %2853  ;;  %v2241_v28 = vmul.f32 0.6931472, %v2852_v26  ;;  %v1998_v2 = vsel %vm1997_vm8, %v2850_v4, %v1994_v54  ;;  %v2289_v54 = vpop.permute.xlu0 %2288 }
0x1633   : > { %v2006_v56 = vmul.f32 %v2854_v39, %v1927_v46  ;;  %vm2011_vm11 = vweird.f32 %v2854_v39  ;;  %v2856_v46 = vpop.eup %2855 }
0x1634   : > { %v2242_v12 = vadd.f32 %v2241_v28, %v2233_v48  ;;  %vm2012_vm15 = vmor %vm2010_vm14, %vm2011_vm11  ;;  %v1928_v35 = vadd.f32 1.0, %v2856_v46  ;;  %vm2172_vm11 = vcmp.ne.s32.totalorder %v3654_v8, 0 }
0x1635   : > { %v2007_v58 = vsub.f32 1.0, %v2006_v56 }
0x1636   : > { %v2243_v22 = vadd.f32 %v2242_v12, %v2094_v41  ;;  %vm2025_vm4 = vweird.f32 %v1928_v35 }
0x1637   : > { %v2008_v3 = vmul.f32 %v2854_v39, %v2007_v58 }
0x1638   : > { %v3611_v43 = vsel %vm2248_vm3, %v2243_v22, %v3578_v53  ;;  %v3616_v53 = vsel %vm2000_vm10, %v2002_v62, %v1998_v2  ;;  %v2031_v62 = vand.u32 2147483648, %v1928_v35 }
0x1639   : > { %2271 = vperm.xlu1 %2717, %v3611_v43   ;;  %2266 = vperm.xlu2 %2714, %v3611_v43   ;;  %v2009_v45 = vadd.f32 %v2854_v39, %v2008_v3  ;;  %v2054_v22 = vsub.f32 1.0, %v3616_v53 }
0x163a   : > { %v2032_v30 = vor.u32 1.1754944e-38, %v2031_v62 }
0x163b   : > { %v2013_v55 = vsel %vm2012_vm15, %v2854_v39, %v2009_v45  ;;  %v2029_v45 = vand.u32 2147483647, %v1928_v35 }
0x163c   : > { %v3622_v25 = vsel %vm2015_vm1, %v2017_v33, %v2013_v55  ;;  %v1820_v33 = vpop.f32.mrf.mxu0 }
0x163d   : > { %vm2030_vm10 = vcmp.eq.f32.partialorder %v2029_v45, 8.507059e+37 }
0x1641   : > { %1725 = vrot.lane.b32.xlu1 %v1661_v0, %s2929_s29  ;;  %2074 = vrot.lane.b32.xlu2 %v3616_v53, %s2930_s27  ;;  %v3641_v0 = vld [vmem:[%s3052_s25 + $0x28] sm:$0xff]  ;;  %s2555_s29 = sshll.u32 %s3889_s12, 3 }
0x1642   : > { %2719 = vset.pattern.permute.xlu1 %v2932_v19  ;;  %vm2297_vm8 = vcmp.gt.f32.partialorder %v3641_v0, 0.5  ;;  %s512_s14 = scalar_lea.vmem %s3880_s9, %s2555_s29 }
0x1649   : > { %2076 = vrot.lane.b32.xlu1 %v3622_v25, %s2930_s27 }
0x1693   : > { %v2267_v9 = vpop.permute.xlu2 %2266 }
0x1694   : > { %v2269_v11 = vadd.f32 %v2267_v9, %v3551_v44 }
0x169b   : > { %v2075_v41 = vpop.permute.xlu2 %2074 }
0x169c   : > { %v2095_v59 = vsel %vm2090_vm13, %v2054_v22, %v2075_v41 }
0x16ab   : > { %v2272_v10 = vpop.permute.xlu1 %2271 }
0x16ac   : > { %v2274_v13 = vadd.f32 %v2272_v10, %v3546_v40 }
0x16ae   : > { %v2276_v14 = vsub.f32 %v2269_v11, %v2274_v13  ;;  %v2275_v23 = vmax.f32 %v2269_v11, %v2274_v13 }
0x16b0   : > { %v2277_v16 = vand.u32 2147483647, %v2276_v14  ;;  %v2173_v14 = vsel %vm2172_vm11, %v3481_v34, %v3479_v24 }
0x16b2   : > { %v2278_v29 = vsub.f32 0.0, %v2277_v16  ;;  %v2174_v16 = vsel %vm2172_vm11, %v3477_v21, %v3475_v17 }
0x16b3   : > { %v1726_v4 = vpop.permute.xlu1 %1725 }
0x16b4   : > { %v2279_v26 = vmul.f32 1.442695, %v2278_v29  ;;  %1728 = vst.msk [vmem:[#allocation3 + $0x38] sm:$0xff] %vm663_vm5, %v1726_v4  ;;  %v3678_v4 = vld [vmem:[%s3050_s24 + $0x20] sm:$0xff] }
0x16b6   : > { %2857 = vpow2.f32 %v2279_v26  ;;  %v2175_v26 = vsel %vm2130_vm7, %v2173_v14, %v2174_v16  ;;  %vm2256_vm7 = vcmp.ne.s32.totalorder %v3678_v4, 0 }
0x16b7   : > { %2859 = vrcp.f32 %v1928_v35 }
0x16bb   : > { %v1749_v38 = vld [vmem:[#allocation3 + $0x38] sm:$0xff] }
0x16bc   : > { %v2858_v39 = vpop.eup %2857  ;;  %2633 = vmatmul.msk.f32.gmra.mxu1 %vm663_vm5, %v1749_v38  ;;  %vm2290_vm5 = vcmp.eq.s32.totalorder %v2289_v54, 1  ;;  %v2176_v38 = vsel %vm2172_vm11, %v3534_v37, %v2052_v49  ;;  %v3701_v37 = vld [vmem:[%s3050_s24 + $0x30] sm:$0xff] }
0x16bd   : > { %v2281_v57 = vadd.f32 1.0, %v2858_v39  ;;  %v2860_v48 = vpop.eup %2859  ;;  %v3688_v39 = vld [vmem:[%s3050_s24 + $0x28] sm:$0xff]  ;;  %vm2340_vm1 = vcmp.ne.s32.totalorder %v3701_v37, 0 }
0x16be   : > { %v2021_v28 = vmul.f32 %v2860_v48, %v1928_v35  ;;  %vm2026_vm3 = vweird.f32 %v2860_v48  ;;  %vm2298_vm15 = vcmp.ne.s32.totalorder %v3688_v39, 0 }
0x16bf   : > { %2861 = vlog2.f32 %v2281_v57  ;;  %vm2027_vm6 = vmor %vm2025_vm4, %vm2026_vm3  ;;  %v2299_v54 = vsel %vm2298_vm15, %v3481_v34, %v3479_v24 }
0x16c0   : > { %v2022_v51 = vsub.f32 1.0, %v2021_v28 }
0x16c2   : > { %v2023_v60 = vmul.f32 %v2860_v48, %v2022_v51  ;;  %v2177_v51 = vadd.f32 %v2176_v38, %v2175_v26 }
0x16c4   : > { %v2024_v3 = vadd.f32 %v2860_v48, %v2023_v60 }
0x16c5   : > { %v2862_v12 = vpop.eup %2861 }
0x16c6   : > { %v2283_v56 = vmul.f32 0.6931472, %v2862_v12  ;;  %v2028_v47 = vsel %vm2027_vm6, %v2860_v48, %v2024_v3  ;;  %v2260_v3 = vsel %vm2256_vm7, %v3616_v53, %v2054_v22  ;;  %v3750_v22 = vld [vmem:[%s3050_s24 + $0x38] sm:$0xff] }
0x16c7   : > { %v3647_v55 = vsel %vm2030_vm10, %v2032_v30, %v2028_v47  ;;  %v2341_v47 = vsel %vm2340_vm1, %v3481_v34, %v3479_v24  ;;  %v2342_v30 = vsel %vm2340_vm1, %v3477_v21, %v3475_v17  ;;  %vm2382_vm3 = vcmp.ne.s32.totalorder %v3750_v22, 0 }
0x16c8   : > { %v2284_v58 = vadd.f32 %v2283_v56, %v2275_v23  ;;  %v2257_v23 = vsel %vm2256_vm7, %v3481_v34, %v3479_v24  ;;  %v2258_v56 = vsel %vm2256_vm7, %v3477_v21, %v3475_v17  ;;  %v2056_v62 = vsub.f32 1.0, %v3647_v55 }
0x16ca   : > { %v2285_v63 = vadd.f32 %v2284_v58, %v2095_v59  ;;  %v2055_v58 = vsub.f32 1.0, %v3622_v25  ;;  %v2300_v59 = vsel %vm2298_vm15, %v3477_v21, %v3475_v17 }
0x16cc   : > { %v3636_v2 = vsel %vm2290_vm5, %v2285_v63, %v3611_v43  ;;  %v2328_v43 = vsel %vm2297_vm8, 1, %v2932_v19 }
0x16cd   : > { %2313 = vperm.xlu0 %2718, %v3636_v2   ;;  %2308 = vperm.xlu2 %2714, %v3636_v2  }
0x16d5   : > { %2078 = vrot.lane.b32.xlu0 %v3647_v55, %s2930_s27  ;;  %2330 = vperm.xlu2 %2714, %v2328_v43  }
0x16dd   : > { %2720 = vset.pattern.permute.xlu2 %v2931_v18  ;;  %v3664_v18 = vld [vmem:[%s3050_s24 + $0x18] sm:$0xff]  ;;  %s3822_s24 = sld [smem:[#allocation7 + $0x2]] }
0x16de   : > { %vm2214_vm14 = vcmp.ne.s32.totalorder %v3664_v18, 0 }
0x16df   : > { %v2215_v48 = vsel %vm2214_vm14, %v3481_v34, %v3479_v24  ;;  %v2216_v28 = vsel %vm2214_vm14, %v3477_v21, %v3475_v17  ;;  %v2218_v41 = vsel %vm2214_vm14, %v3589_v32, %v2053_v50  ;;  %v2178_v32 = vsel %vm2171_vm9, %v2177_v51, 0.0 }
0x16e0   : > { %v2217_v49 = vsel %vm2172_vm11, %v2215_v48, %v2216_v28  ;;  %v2259_v63 = vsel %vm2214_vm14, %v2257_v23, %v2258_v56  ;;  %v2383_v28 = vsel %vm2382_vm3, %v3481_v34, %v3479_v24  ;;  %v3784_v56 = vld [vmem:[%s3052_s25 + $0x38] sm:$0xff] }
0x16e1   : > { %v2219_v50 = vadd.f32 %v2218_v41, %v2217_v49  ;;  %vm2381_vm14 = vcmp.gt.f32.partialorder %v3784_v56, 0.5 }
0x1727   : > { %v2309_v7 = vpop.permute.xlu2 %2308 }
0x1728   : > { %v3657_v11 = vadd.f32 %v2309_v7, %v3551_v44  ;;  %v2302_v7 = vsel %vm2298_vm15, %v3622_v25, %v2055_v58 }
0x1739   : > { %v1885_v1 = vpop.f32.mrf.mxu1 }
0x173a   : > { %v1886_v5 = vadd.f32 %v1885_v1, %v1820_v33  ;;  %v2179_v33 = vadd.f32 %v2178_v32, %v3516_v52  ;;  %v2301_v1 = vsel %vm2256_vm7, %v2299_v54, %v2300_v59  ;;  %v2344_v52 = vsel %vm2340_vm1, %v3647_v55, %v2056_v62  ;;  %v2077_v54 = vpop.permute.xlu1 %2076  ;;  %v2331_v59 = vpop.permute.xlu2 %2330 }
0x173b   : > { %vm2332_vm7 = vcmp.eq.s32.totalorder %v2331_v59, 1 }
0x173c   : > { %v1897_v6 = vadd.f32 %v3459_v20, %v1886_v5  ;;  %v2220_v5 = vsel %vm2213_vm0, %v2219_v50, 0.0 }
0x173d   : > { %v2221_v25 = vadd.f32 %v2220_v5, %v2179_v33 }
0x173e   : > { %v2642_v9 = vmul.f32 -1.442695, %v1897_v6  ;;  %v2261_v6 = vadd.f32 %v2260_v3, %v2259_v63 }
0x173f   : > { %v2314_v10 = vpop.permute.xlu0 %2313 }
0x1740   : > { %2863 = vpow2.f32 %v2642_v9  ;;  %v3660_v13 = vadd.f32 %v2314_v10, %v3546_v40  ;;  %v2343_v10 = vsel %vm2298_vm15, %v2341_v47, %v2342_v30 }
0x1741   : > { %v2345_v38 = vadd.f32 %v2344_v52, %v2343_v10 }
0x1742   : > { %v2318_v20 = vsub.f32 %v3657_v11, %v3660_v13  ;;  %v2317_v24 = vmax.f32 %v3657_v11, %v3660_v13  ;;  %v2096_v11 = vsel %vm2090_vm13, %v2055_v58, %v2077_v54 }
0x1744   : > { %v2319_v46 = vand.u32 2147483647, %v2318_v20 }
0x1746   : > { %v2864_v29 = vpop.eup %2863  ;;  %v2320_v35 = vsub.f32 0.0, %v2319_v46  ;;  %v2303_v46 = vadd.f32 %v2302_v7, %v2301_v1 }
0x1747   : > { %v1929_v57 = vadd.f32 1.0, %v2864_v29  ;;  %v3766_v29 = vld [vmem:[%s3052_s25 + $0x30] sm:$0xff]  ;;  %s3824_s25 = sld [smem:[#allocation7 + $0x3]] }
0x1748   : > { %v2321_v12 = vmul.f32 1.442695, %v2320_v35  ;;  %v2262_v35 = vsel %vm2255_vm2, %v2261_v6, 0.0  ;;  %vm2339_vm10 = vcmp.gt.f32.partialorder %v3766_v29, 0.5 }
0x1749   : > { %2865 = vrcp.f32 %v1929_v57  ;;  %v2046_v20 = vand.u32 2147483648, %v1929_v57  ;;  %v2044_v16 = vand.u32 2147483647, %v1929_v57  ;;  %vm2040_vm4 = vweird.f32 %v1929_v57 }
0x174a   : > { %2867 = vpow2.f32 %v2321_v12  ;;  %v2384_v12 = vsel %vm2382_vm3, %v3477_v21, %v3475_v17  ;;  %v2263_v41 = vadd.f32 %v2262_v35, %v2221_v25  ;;  %v2346_v32 = vsel %vm2339_vm10, %v2345_v38, 0.0 }
0x174b   : > { %v2047_v48 = vor.u32 1.1754944e-38, %v2046_v20  ;;  %vm2045_vm11 = vcmp.eq.f32.partialorder %v2044_v16, 8.507059e+37  ;;  %v2385_v21 = vsel %vm2340_vm1, %v2383_v28, %v2384_v12  ;;  %v2370_v33 = vsel %vm2339_vm10, 1, %v2932_v19 }
0x174c   : > { %v2412_v28 = vsel %vm2381_vm14, 1, %v2932_v19 }
0x174f   : > { %v2866_v60 = vpop.eup %2865 }
0x1750   : > { %v2868_v45 = vpop.eup %2867  ;;  %v2036_v43 = vmul.f32 %v2866_v60, %v1929_v57  ;;  %vm2041_vm5 = vweird.f32 %v2866_v60  ;;  %v2304_v57 = vsel %vm2297_vm8, %v2303_v46, 0.0 }
0x1751   : > { %v2323_v53 = vadd.f32 1.0, %v2868_v45  ;;  %vm2042_vm6 = vmor %vm2040_vm4, %vm2041_vm5  ;;  %v2305_v50 = vadd.f32 %v2304_v57, %v2263_v41 }
0x1752   : > { %v2037_v9 = vsub.f32 1.0, %v2036_v43 }
0x1753   : > { %2869 = vlog2.f32 %v2323_v53  ;;  %v2347_v45 = vadd.f32 %v2346_v32, %v2305_v50 }
0x1754   : > { %v2038_v14 = vmul.f32 %v2866_v60, %v2037_v9 }
0x1756   : > { %v2039_v26 = vadd.f32 %v2866_v60, %v2038_v14  ;;  %v2079_v14 = vpop.permute.xlu0 %2078 }
0x1758   : > { %v2043_v51 = vsel %vm2042_vm6, %v2866_v60, %v2039_v26  ;;  %v2097_v26 = vsel %vm2090_vm13, %v2056_v62, %v2079_v14 }
0x1759   : > { %v2870_v49 = vpop.eup %2869  ;;  %v3781_v23 = vsel %vm2045_vm11, %v2047_v48, %v2043_v51 }
0x175a   : > { %v2325_v34 = vmul.f32 0.6931472, %v2870_v49  ;;  %v2057_v17 = vsub.f32 1.0, %v3781_v23 }
0x175c   : > { %v2326_v60 = vadd.f32 %v2325_v34, %v2317_v24  ;;  %v2386_v63 = vsel %vm2382_vm3, %v3781_v23, %v2057_v17 }
0x175d   : > { %v2387_v13 = vadd.f32 %v2386_v63, %v2385_v21  ;;  %v2106_v63 = vstv %s3824_s25 }
0x175e   : > { %v2327_v3 = vadd.f32 %v2326_v60, %v2096_v11  ;;  %v2104_v60 = vstv %s3822_s24 }
0x175f   : > { %v2388_v47 = vsel %vm2381_vm14, %v2387_v13, 0.0  ;;  %v2117_v11 = vsel %vm2090_vm13, %v2104_v60, %v2106_v63 }
0x1760   : > { %v2333_v30 = vsel %vm2332_vm7, %v2327_v3, %v3636_v2  ;;  %v3803_v43 = vadd.f32 %v2388_v47, %v2347_v45  ;;  %v2166_v47 = vsel %vm2129_vm12, %v3471_v15, %v3485_v36 }
0x1761   : > { %2355 = vperm.xlu2 %2720, %v2333_v30   ;;  %2350 = vperm.xlu1 %2719, %v2333_v30  }
0x1769   : > { %2372 = vperm.xlu1 %2719, %v2370_v33   ;;  %2721 = vset.pattern.permute.xlu2 %v2932_v19 }
0x1771   : > { %2080 = vrot.lane.b32.xlu1 %v3781_v23, %s2930_s27 }
0x17bb   : > { %v2356_v58 = vpop.permute.xlu2 %2355 }
0x17bc   : > { %v2358_v53 = vadd.f32 %v2356_v58, %v3546_v40 }
0x17d3   : > { %v2351_v1 = vpop.permute.xlu1 %2350 }
0x17d4   : > { %v2353_v2 = vadd.f32 %v2351_v1, %v3551_v44 }
0x17d6   : > { %v2360_v5 = vsub.f32 %v2353_v2, %v2358_v53  ;;  %v2359_v16 = vmax.f32 %v2353_v2, %v2358_v53 }
0x17d8   : > { %v2361_v6 = vand.u32 2147483647, %v2360_v5 }
0x17da   : > { %v2362_v7 = vsub.f32 0.0, %v2361_v6 }
0x17db   : > { %v2373_v35 = vpop.permute.xlu1 %2372 }
0x17dc   : > { %v2363_v9 = vmul.f32 1.442695, %v2362_v7  ;;  %vm2374_vm15 = vcmp.eq.s32.totalorder %v2373_v35, 1 }
0x17de   : > { %2871 = vpow2.f32 %v2363_v9 }
0x17e3   : > { %v2081_v21 = vpop.permute.xlu1 %2080 }
0x17e4   : > { %v2872_v10 = vpop.eup %2871  ;;  %v2098_v59 = vsel %vm2090_vm13, %v2057_v17, %v2081_v21  ;;  %v2208_v17 = vsel %vm2171_vm9, %v3654_v8, %v2166_v47 }
0x17e5   : > { %v2365_v52 = vadd.f32 1.0, %v2872_v10  ;;  %v2250_v1 = vsel %vm2213_vm0, %v3664_v18, %v2208_v17 }
0x17e6   : > { %v2292_v2 = vsel %vm2255_vm2, %v3678_v4, %v2250_v1 }
0x17e7   : > { %2873 = vlog2.f32 %v2365_v52  ;;  %v2334_v15 = vsel %vm2297_vm8, %v3688_v39, %v2292_v2 }
0x17e8   : > { %v2376_v31 = vsel %vm2339_vm10, %v3701_v37, %v2334_v15 }
0x17e9   : > { %v2418_v42 = vsel %vm2381_vm14, %v3750_v22, %v2376_v31 }
0x17ea   : > { %vm2419_vm12 = vcmp.ne.s32.totalorder %v2418_v42, 0 }
0x17eb   : > { %v2420_v8 = vsel %vm2419_vm12, %v2106_v63, %v2104_v60 }
0x17ec   : > { %v2421_v4 = vadd.f32 %v2420_v8, %v3803_v43 }
0x17ed   : > { %v2874_v20 = vpop.eup %2873 }
0x17ee   : > { %v2367_v46 = vmul.f32 0.6931472, %v2874_v20 }
0x17f0   : > { %v2368_v25 = vadd.f32 %v2367_v46, %v2359_v16 }
0x17f2   : > { %v2369_v38 = vadd.f32 %v2368_v25, %v2097_v26 }
0x17f4   : > { %v2375_v48 = vsel %vm2374_vm15, %v2369_v38, %v2333_v30 }
0x17f5   : > { %2397 = vperm.xlu0 %2718, %v2375_v48   ;;  %2392 = vperm.xlu2 %2721, %v2375_v48  }
0x17fd   : > { %2414 = vperm.xlu2 %2721, %v2412_v28   ;;  %2722 = vset.pattern.permute.xlu0 %v2932_v19 }
0x184f   : > { %v2393_v12 = vpop.permute.xlu2 %2392 }
0x1850   : > { %v2395_v49 = vadd.f32 %v2393_v12, %v3551_v44 }
0x1867   : > { %v2398_v51 = vpop.permute.xlu0 %2397 }
0x1868   : > { %v2400_v55 = vadd.f32 %v2398_v51, %v3546_v40  ;;  %v2415_v40 = vpop.permute.xlu2 %2414 }
0x1869   : > { %vm2416_vm1 = vcmp.eq.s32.totalorder %v2415_v40, 1 }
0x186a   : > { %v2402_v41 = vsub.f32 %v2395_v49, %v2400_v55  ;;  %v2401_v32 = vmax.f32 %v2395_v49, %v2400_v55 }
0x186c   : > { %v2403_v62 = vand.u32 2147483647, %v2402_v41 }
0x186e   : > { %v2404_v57 = vsub.f32 0.0, %v2403_v62 }
0x1870   : > { %v2405_v54 = vmul.f32 1.442695, %v2404_v57 }
0x1872   : > { %2875 = vpow2.f32 %v2405_v54 }
0x1878   : > { %v2876_v24 = vpop.eup %2875 }
0x1879   : > { %v2407_v34 = vadd.f32 1.0, %v2876_v24 }
0x187b   : > { %2877 = vlog2.f32 %v2407_v34 }
0x1881   : > { %v2878_v19 = vpop.eup %2877 }
0x1882   : > { %v2409_v44 = vmul.f32 0.6931472, %v2878_v19 }
0x1884   : > { %v2410_v50 = vadd.f32 %v2409_v44, %v2401_v32 }
0x1886   : > { %v2411_v13 = vadd.f32 %v2410_v50, %v2098_v59 }
0x1888   : > { %v2417_v3 = vsel %vm2416_vm1, %v2411_v13, %v2375_v48 }
0x1889   : > { %v2422_v45 = vadd.f32 %v2417_v3, %v2117_v11 }
0x188b   : > { %2424 = vrot.lane.b32.xlu0 %v2422_v45, %s2933_s30 }
0x18fd   : > { %v2425_v30 = vpop.permute.xlu0 %2424 }
0x18fe   : > { %v2428_v23 = vsub.f32 %v2422_v45, %v2425_v30  ;;  %v2427_v18 = vmax.f32 %v2422_v45, %v2425_v30 }
0x1900   : > { %v2429_v33 = vand.u32 2147483647, %v2428_v23 }
0x1902   : > { %v2430_v58 = vsub.f32 0.0, %v2429_v33 }
0x1904   : > { %v2431_v53 = vmul.f32 1.442695, %v2430_v58 }
0x1906   : > { %2879 = vpow2.f32 %v2431_v53 }
0x190c   : > { %v2880_v36 = vpop.eup %2879 }
0x190d   : > { %v2433_v61 = vadd.f32 1.0, %v2880_v36 }
0x190f   : > { %2881 = vlog2.f32 %v2433_v61 }
0x1915   : > { %v2882_v27 = vpop.eup %2881 }
0x1916   : > { %v2435_v0 = vmul.f32 0.6931472, %v2882_v27 }
0x1918   : > { %v2436_v39 = vadd.f32 %v2435_v0, %v2427_v18 }
0x191a   : > { %v2437_v37 = vsub.f32 %v2421_v4, %v2436_v39 }
0x191c   : > { %2438 = vst.msk [vmem:[%s512_s14] sm:$0xff] %vm2090_vm13, %v2437_v37 }
0x191d PF: > { %p17_p13 = scmp.ge.s32.totalorder %s3003_s13, 4   ;;  %s3883_s30 = smov %s2920_s10 }
0x191e   : > { %s3884_s10 = smov %s3013_s16  ;;  %s3885_s11 = smov %s3003_s13 }
0x191f   :  { %19 = sbr.rel (!%p17_p13) target bundleno = 2 (0x2), region = 197 }
0x1924   :  { %2458 = vsyncpa [#allocation8], 1 }
0x1925   :  { %2460 = vsyncpa [#allocation8 + $0x1], 1 }

</bundles_post_ra>
